<compile_context>
chip_gen: v6e
topology: v6e:2x2x1
jax: 0.10.0
libtpu: 0.0.40
codegen_flags: <defaults>
</compile_context>

<pallas_src>
import functools
import math

import jax
import jax.numpy as jnp
from jax import lax
from jax.experimental import pallas as pl
from jax.experimental.pallas import tpu as pltpu

# ---------------- config (synthetic, small) ----------------
POOLING_DIM = 64       # PairwiseFeatureExtractor.pooling_dim
H_DIM = 32             # cfg.MODEL.ROI_RELATION_HEAD.RGCN.H_DIM
NUM_CLASSES_OBJ = 9    # cfg.MODEL.ROI_BOX_HEAD.NUM_CLASSES
NUM_CLASSES_PRED = 11  # cfg.MODEL.ROI_RELATION_HEAD.NUM_CLASSES
TOPK = 3               # cfg.MGAT.TOPK (IS_TOPK = True)
FEAT_UPDATE_STEP = 1
SCORE_UPDATE_STEP = 1

_VMEM = pl.BlockSpec(memory_space=pltpu.MemorySpace.VMEM)


# ---------------- fused MaskGAT forward kernel ----------------
def _maskgat_fused_kernel(*refs, topk, feat_steps, score_steps):
    NEG = -1000000000000000.0     # -1e15 sentinel (plain python float -> literal)

    n_in = 6 + 8 + 20 + 4 + 20
    in_refs = refs[:n_in]
    node_out_ref, rel_out_ref = refs[n_in:]

    (nf_ref, ef_ref, psrc_ref, pdst_ref, qsrc_ref, qdst_ref) = in_refs[:6]
    (ow1, ob1, ow2, ob2, rw1, rb1, rw2, rb2) = in_refs[6:14]
    mgat_params = in_refs[14:34]
    (ocw, ocb, rcw, rcb) = in_refs[34:38]
    mgat_score_params = in_refs[38:58]

    Psrc = psrc_ref[...]          # (E, N) one-hot of edge_index[0]
    Pdst = pdst_ref[...]          # (E, N) one-hot of edge_index[1]
    Qsrc = qsrc_ref[...]          # (Es, N) one-hot of edgeskip_index[0]
    Qdst = qdst_ref[...]          # (Es, N) one-hot of edgeskip_index[1]

    def dotT(a, b):
        # a^T @ b, contracting the leading (edge) axis -> no explicit transposes
        return lax.dot_general(a, b, (((0,), (0,)), ((), ())),
                               preferred_element_type=jnp.float32)

    # static graph coverage matrices, computed ONCE and reused everywhere
    covP = dotT(Psrc, Pdst)       # (N, N): #rel-edges with (src=a, dst=b)
    covQ = dotT(Qsrc, Qdst)       # (N, N): skip graph coverage

    def linear(x, w_ref, b_ref, relu=False):
        y = jnp.dot(x, w_ref[...], preferred_element_type=jnp.float32) + b_ref[...]
        return jnp.maximum(y, 0.0) if relu else y

    def lin2(xa, xb, w_ref, b_ref):
        # cat([xa, xb], -1) @ W + b as split matmuls (no concat needed)
        da = xa.shape[1]
        w = w_ref[...]
        return (jnp.dot(xa, w[:da, :], preferred_element_type=jnp.float32)
                + jnp.dot(xb, w[da:, :], preferred_element_type=jnp.float32)
                + b_ref[...])

    def attn(m, a_ref, ab_ref):
        # nn.Linear(D, 1): weight stored as (1, D) row vector, bias (1, 1)
        return jnp.sum(m * a_ref[...], axis=1, keepdims=True) + ab_ref[...]

    def leaky(x):
        return jnp.where(x > 0, x, 0.2 * x)

    def elu(x):
        return jnp.where(x > 0, x, jnp.exp(jnp.minimum(x, 0.0)) - 1.0)

    def seg_softmax(e, P):
        # e: (E,1) scores, P: (E,N) one-hot segment id; torch_geometric softmax
        masked = jnp.where(P > 0, e, -1e30)
        segmax = jnp.max(masked, axis=0, keepdims=True)          # (1, N)
        gmax = jnp.sum(P * segmax, axis=1, keepdims=True)        # (E, 1)
        out = jnp.exp(e - gmax)
        segsum = jnp.sum(P * out, axis=0, keepdims=True)         # (1, N)
        gsum = jnp.sum(P * segsum, axis=1, keepdims=True)        # (E, 1)
        return out / (gsum + 1e-16)

    def purifier(e, Pa, Pb, cov, j):
        # dense N x N mask: mask[a,b] = e of edge (a,b), else -1e15
        vals = dotT(Pa, e * Pb)                                  # (N, N)
        mask = jnp.where(cov > 0, vals, NEG)
        # k-th largest along axis j == min(topk(mask, k, dim=j).values, dim=j)
        iota = lax.broadcasted_iota(jnp.int32, mask.shape, j)
        work = mask
        for _ in range(topk - 1):
            cur_max = jnp.max(work, axis=j, keepdims=True)
            cand = jnp.where(work == cur_max, iota, mask.shape[j])
            first = jnp.min(cand, axis=j, keepdims=True)
            work = jnp.where(iota == first, NEG, work)
        thr = jnp.max(work, axis=j, keepdims=True)
        # matches torch: indices_to_remove = mask <= (k-th largest); then set NEG
        mask = jnp.where(mask <= thr, NEG, mask)
        # gather mask[edge_index[0], edge_index[1]]
        mattn = jnp.sum(jnp.dot(Pa, mask, preferred_element_type=jnp.float32) * Pb,
                        axis=1, keepdims=True)                   # (E, 1)
        return mattn

    def mgat_layer(nf, ef, params):
        (w_s2r, b_s2r, a_s2r, ab_s2r,
         w_o2r, b_o2r, a_o2r, ab_o2r,
         w_r2s, b_r2s, a_r2s, ab_r2s,
         w_r2o, b_r2o, a_r2o, ab_r2o,
         w_sk, b_sk, a_sk, ab_sk) = params

        x_src = jnp.dot(Psrc, nf, preferred_element_type=jnp.float32)  # nf[edge_index[0]]
        x_dst = jnp.dot(Pdst, nf, preferred_element_type=jnp.float32)  # nf[edge_index[1]]

        # --- sub2rel --- cat([nf[dst], nf[src]]), softmax over edge_index[1]
        m = lin2(x_dst, x_src, w_s2r, b_s2r)
        e = leaky(attn(m, a_s2r, ab_s2r))
        sub2rel = ef + seg_softmax(e, Pdst) * m

        # --- obj2rel --- cat([nf[src], nf[dst]]), softmax over edge_index[0]
        m = lin2(x_src, x_dst, w_o2r, b_o2r)
        e = leaky(attn(m, a_o2r, ab_o2r))
        obj2rel = ef + seg_softmax(e, Psrc) * m

        rel_emb = (sub2rel + obj2rel) * 0.5

        # --- rel2sub --- cat([nf[src], rel_emb]), purifier j=1, softmax over edge_index[0]
        m = lin2(x_src, rel_emb, w_r2s, b_r2s)
        e = leaky(attn(m, a_r2s, ab_r2s))
        sub_msg = seg_softmax(purifier(e, Psrc, Pdst, covP, j=1), Psrc) * m

        # --- rel2obj --- cat([nf[dst], rel_emb]), purifier j=0, softmax over edge_index[1]
        m = lin2(x_dst, rel_emb, w_r2o, b_r2o)
        e = leaky(attn(m, a_r2o, ab_r2o))
        obj_msg = seg_softmax(purifier(e, Psrc, Pdst, covP, j=0), Pdst) * m

        # --- skip --- cat([nf[skip_dst], nf[skip_src]]), purifier j=0, softmax over skip[1]
        xs_src = jnp.dot(Qsrc, nf, preferred_element_type=jnp.float32)
        xs_dst = jnp.dot(Qdst, nf, preferred_element_type=jnp.float32)
        m = lin2(xs_dst, xs_src, w_sk, b_sk)
        e = leaky(attn(m, a_sk, ab_sk))
        skip_msg = seg_softmax(purifier(e, Qsrc, Qdst, covQ, j=0), Qdst) * m

        # --- aggregate (scatter-sum via transposed contraction) + update ---
        sub_agg = dotT(Psrc, sub_msg)    # scatter over edge_index[0]
        obj_agg = dotT(Pdst, obj_msg)    # scatter over edge_index[1]
        skip_agg = dotT(Qdst, skip_msg)  # scatter over edgeskip_index[1]
        node_emb = (3.0 * nf + sub_agg + obj_agg + skip_agg) / 3.0
        return node_emb, rel_emb

    # --- obj / rel embedding MLPs (Linear+ReLU, Linear+ReLU) ---
    nf = linear(nf_ref[...], ow1, ob1, relu=True)
    nf = linear(nf, ow2, ob2, relu=True)
    ef = linear(ef_ref[...], rw1, rb1, relu=True)
    ef = linear(ef, rw2, rb2, relu=True)

    # --- feature update steps (unrolled inside the fused kernel, VMEM resident) ---
    for _ in range(feat_steps):
        nf, ef = mgat_layer(nf, ef, mgat_params)
        nf = elu(nf)
        ef = elu(ef)

    # --- classifiers ---
    obj_logits = linear(nf, ocw, ocb)
    pred_logits = linear(ef, rcw, rcb)

    # --- score update steps ---
    for _ in range(score_steps):
        obj_logits, pred_logits = mgat_layer(obj_logits, pred_logits, mgat_score_params)
        obj_logits = elu(obj_logits)
        pred_logits = elu(pred_logits)

    node_out_ref[...] = obj_logits
    rel_out_ref[...] = pred_logits


def mask_gat_forward(nf_pool, ef_pool, graph, params):
    Psrc, Pdst, Qsrc, Qdst = graph
    N = Psrc.shape[1]
    E = Psrc.shape[0]
    inputs = [nf_pool, ef_pool, Psrc, Pdst, Qsrc, Qdst,
              params["obj_emb_w1"], params["obj_emb_b1"],
              params["obj_emb_w2"], params["obj_emb_b2"],
              params["rel_emb_w1"], params["rel_emb_b1"],
              params["rel_emb_w2"], params["rel_emb_b2"],
              *params["mgat"],
              params["obj_cls_w"], params["obj_cls_b"],
              params["rel_cls_w"], params["rel_cls_b"],
              *params["mgat_score"]]
    kernel = functools.partial(_maskgat_fused_kernel, topk=TOPK,
                               feat_steps=FEAT_UPDATE_STEP,
                               score_steps=SCORE_UPDATE_STEP)
    obj_logits, pred_logits = pl.pallas_call(
        kernel,
        out_shape=(jax.ShapeDtypeStruct((N, NUM_CLASSES_OBJ), jnp.float32),
                   jax.ShapeDtypeStruct((E, NUM_CLASSES_PRED), jnp.float32)),
        in_specs=[_VMEM] * len(inputs),
        out_specs=(_VMEM, _VMEM),
    )(*inputs)
    return obj_logits, pred_logits


# ---------------- parameter init (deterministic, PyTorch-Linear style) ----------------
def _init_linear(key, fan_in, fan_out, as_attn=False):
    kw, kb = jax.random.split(key)
    lim = 1.0 / math.sqrt(fan_in)
    if as_attn:   # nn.Linear(D, 1) -> weight as (1, D) row, bias (1, 1)
        w = jax.random.uniform(kw, (1, fan_in), jnp.float32, -lim, lim)
        b = jax.random.uniform(kb, (1, 1), jnp.float32, -lim, lim)
    else:         # weight stored as (fan_in, fan_out) so y = x @ W + b
        w = jax.random.uniform(kw, (fan_in, fan_out), jnp.float32, -lim, lim)
        b = jax.random.uniform(kb, (1, fan_out), jnp.float32, -lim, lim)
    return w, b


def init_mgat_layer_params(key, node_in, edge_out, node_out):
    ks = jax.random.split(key, 10)
    w_s2r, b_s2r = _init_linear(ks[0], 2 * node_in, edge_out)
    a_s2r, ab_s2r = _init_linear(ks[1], edge_out, 1, as_attn=True)
    w_o2r, b_o2r = _init_linear(ks[2], 2 * node_in, edge_out)
    a_o2r, ab_o2r = _init_linear(ks[3], edge_out, 1, as_attn=True)
    w_r2s, b_r2s = _init_linear(ks[4], node_in + edge_out, node_out)
    a_r2s, ab_r2s = _init_linear(ks[5], node_out, 1, as_attn=True)
    w_r2o, b_r2o = _init_linear(ks[6], node_in + edge_out, node_out)
    a_r2o, ab_r2o = _init_linear(ks[7], node_out, 1, as_attn=True)
    w_sk, b_sk = _init_linear(ks[8], 2 * node_in, node_out)
    a_sk, ab_sk = _init_linear(ks[9], node_out, 1, as_attn=True)
    return (w_s2r, b_s2r, a_s2r, ab_s2r,
            w_o2r, b_o2r, a_o2r, ab_o2r,
            w_r2s, b_r2s, a_r2s, ab_r2s,
            w_r2o, b_r2o, a_r2o, ab_r2o,
            w_sk, b_sk, a_sk, ab_sk)


def init_maskgat_params(key):
    ks = jax.random.split(key, 10)
    p = {}
    p["obj_emb_w1"], p["obj_emb_b1"] = _init_linear(ks[0], POOLING_DIM, 2 * H_DIM)
    p["obj_emb_w2"], p["obj_emb_b2"] = _init_linear(ks[1], 2 * H_DIM, H_DIM)
    p["rel_emb_w1"], p["rel_emb_b1"] = _init_linear(ks[2], POOLING_DIM, 2 * H_DIM)
    p["rel_emb_w2"], p["rel_emb_b2"] = _init_linear(ks[3], 2 * H_DIM, H_DIM)
    p["mgat"] = init_mgat_layer_params(ks[4], H_DIM, H_DIM, H_DIM)
    p["obj_cls_w"], p["obj_cls_b"] = _init_linear(ks[5], H_DIM, NUM_CLASSES_OBJ)
    p["rel_cls_w"], p["rel_cls_b"] = _init_linear(ks[6], H_DIM, NUM_CLASSES_PRED)
    p["mgat_score"] = init_mgat_layer_params(
        ks[7], NUM_CLASSES_OBJ, NUM_CLASSES_PRED, NUM_CLASSES_OBJ)
    return p


# ---------------- graph construction glue (== _get_map_idxs) ----------------
def build_graph(nodes_per_img, n_img, base_pairs):
    N = nodes_per_img * n_img
    rel_src, rel_dst = [], []
    skip_src, skip_dst = [], []
    for img in range(n_img):
        off = img * nodes_per_img
        for (s, d) in base_pairs:
            rel_src.append(s + off)
            rel_dst.append(d + off)
        # obj_obj_map = 1 - eye  -> dense_to_sparse (row-major)
        for i in range(nodes_per_img):
            for j in range(nodes_per_img):
                if i != j:
                    skip_src.append(i + off)
                    skip_dst.append(j + off)
    to1h = lambda idx: jax.nn.one_hot(jnp.array(idx, jnp.int32), N, dtype=jnp.float32)
    return N, (to1h(rel_src), to1h(rel_dst), to1h(skip_src), to1h(skip_dst))


if __name__ == "__main__":
    key = jax.random.PRNGKey(0)
    k_nf, k_ef, k_par = jax.random.split(key, 3)

    # 2 images x 4 proposals = 8 nodes; 6 relation pairs per image = 12 rel edges;
    # skip graph = full graph minus diagonal per image = 24 edges.
    base_pairs = [(0, 1), (1, 0), (0, 2), (2, 3), (3, 1), (1, 2)]
    N, graph = build_graph(nodes_per_img=4, n_img=2, base_pairs=base_pairs)
    E = graph[0].shape[0]

    nf_pool = jax.random.normal(k_nf, (N, POOLING_DIM), jnp.float32)
    ef_pool = jax.random.normal(k_ef, (E, POOLING_DIM), jnp.float32)
    params = init_maskgat_params(k_par)

    obj_logits, pred_logits = mask_gat_forward(nf_pool, ef_pool, graph, params)
    jax.block_until_ready((obj_logits, pred_logits))

    assert obj_logits.shape == (N, NUM_CLASSES_OBJ)
    assert pred_logits.shape == (E, NUM_CLASSES_PRED)
    assert bool(jnp.all(jnp.isfinite(obj_logits))) and bool(jnp.all(jnp.isfinite(pred_logits)))
    print("KERNEL_OK")
</pallas_src>

<mosaic_0001>
module attributes {stable_mosaic.version = 11 : i64} {
  func.func @_maskgat_fused_kernel(%arg0: memref<8x64xf32, #tpu.memory_space<vmem>>, %arg1: memref<12x64xf32, #tpu.memory_space<vmem>>, %arg2: memref<12x8xf32, #tpu.memory_space<vmem>>, %arg3: memref<12x8xf32, #tpu.memory_space<vmem>>, %arg4: memref<24x8xf32, #tpu.memory_space<vmem>>, %arg5: memref<24x8xf32, #tpu.memory_space<vmem>>, %arg6: memref<64x64xf32, #tpu.memory_space<vmem>>, %arg7: memref<1x64xf32, #tpu.memory_space<vmem>>, %arg8: memref<64x32xf32, #tpu.memory_space<vmem>>, %arg9: memref<1x32xf32, #tpu.memory_space<vmem>>, %arg10: memref<64x64xf32, #tpu.memory_space<vmem>>, %arg11: memref<1x64xf32, #tpu.memory_space<vmem>>, %arg12: memref<64x32xf32, #tpu.memory_space<vmem>>, %arg13: memref<1x32xf32, #tpu.memory_space<vmem>>, %arg14: memref<64x32xf32, #tpu.memory_space<vmem>>, %arg15: memref<1x32xf32, #tpu.memory_space<vmem>>, %arg16: memref<1x32xf32, #tpu.memory_space<vmem>>, %arg17: memref<1x1xf32, #tpu.memory_space<vmem>>, %arg18: memref<64x32xf32, #tpu.memory_space<vmem>>, %arg19: memref<1x32xf32, #tpu.memory_space<vmem>>, %arg20: memref<1x32xf32, #tpu.memory_space<vmem>>, %arg21: memref<1x1xf32, #tpu.memory_space<vmem>>, %arg22: memref<64x32xf32, #tpu.memory_space<vmem>>, %arg23: memref<1x32xf32, #tpu.memory_space<vmem>>, %arg24: memref<1x32xf32, #tpu.memory_space<vmem>>, %arg25: memref<1x1xf32, #tpu.memory_space<vmem>>, %arg26: memref<64x32xf32, #tpu.memory_space<vmem>>, %arg27: memref<1x32xf32, #tpu.memory_space<vmem>>, %arg28: memref<1x32xf32, #tpu.memory_space<vmem>>, %arg29: memref<1x1xf32, #tpu.memory_space<vmem>>, %arg30: memref<64x32xf32, #tpu.memory_space<vmem>>, %arg31: memref<1x32xf32, #tpu.memory_space<vmem>>, %arg32: memref<1x32xf32, #tpu.memory_space<vmem>>, %arg33: memref<1x1xf32, #tpu.memory_space<vmem>>, %arg34: memref<32x9xf32, #tpu.memory_space<vmem>>, %arg35: memref<1x9xf32, #tpu.memory_space<vmem>>, %arg36: memref<32x11xf32, #tpu.memory_space<vmem>>, %arg37: memref<1x11xf32, #tpu.memory_space<vmem>>, %arg38: memref<18x11xf32, #tpu.memory_space<vmem>>, %arg39: memref<1x11xf32, #tpu.memory_space<vmem>>, %arg40: memref<1x11xf32, #tpu.memory_space<vmem>>, %arg41: memref<1x1xf32, #tpu.memory_space<vmem>>, %arg42: memref<18x11xf32, #tpu.memory_space<vmem>>, %arg43: memref<1x11xf32, #tpu.memory_space<vmem>>, %arg44: memref<1x11xf32, #tpu.memory_space<vmem>>, %arg45: memref<1x1xf32, #tpu.memory_space<vmem>>, %arg46: memref<20x9xf32, #tpu.memory_space<vmem>>, %arg47: memref<1x9xf32, #tpu.memory_space<vmem>>, %arg48: memref<1x9xf32, #tpu.memory_space<vmem>>, %arg49: memref<1x1xf32, #tpu.memory_space<vmem>>, %arg50: memref<20x9xf32, #tpu.memory_space<vmem>>, %arg51: memref<1x9xf32, #tpu.memory_space<vmem>>, %arg52: memref<1x9xf32, #tpu.memory_space<vmem>>, %arg53: memref<1x1xf32, #tpu.memory_space<vmem>>, %arg54: memref<18x9xf32, #tpu.memory_space<vmem>>, %arg55: memref<1x9xf32, #tpu.memory_space<vmem>>, %arg56: memref<1x9xf32, #tpu.memory_space<vmem>>, %arg57: memref<1x1xf32, #tpu.memory_space<vmem>>, %arg58: memref<8x9xf32, #tpu.memory_space<vmem>>, %arg59: memref<12x11xf32, #tpu.memory_space<vmem>>) attributes {dimension_semantics = [], scalar_prefetch = 0 : i64, scratch_operands = 0 : i64, tpu.core_type = #tpu.core_type<tc>} {
    %c0 = arith.constant 0 : index
    %c0_0 = arith.constant 0 : index
    %0 = vector.load %arg2[%c0, %c0_0] : memref<12x8xf32, #tpu.memory_space<vmem>>, vector<12x8xf32>
    %c0_1 = arith.constant 0 : index
    %c0_2 = arith.constant 0 : index
    %1 = vector.load %arg3[%c0_1, %c0_2] : memref<12x8xf32, #tpu.memory_space<vmem>>, vector<12x8xf32>
    %c0_3 = arith.constant 0 : index
    %c0_4 = arith.constant 0 : index
    %2 = vector.load %arg4[%c0_3, %c0_4] : memref<24x8xf32, #tpu.memory_space<vmem>>, vector<24x8xf32>
    %c0_5 = arith.constant 0 : index
    %c0_6 = arith.constant 0 : index
    %3 = vector.load %arg5[%c0_5, %c0_6] : memref<24x8xf32, #tpu.memory_space<vmem>>, vector<24x8xf32>
    %cst = arith.constant dense<0.000000e+00> : vector<8x8xf32>
    %4 = tpu.matmul %0, %1, %cst {dimension_numbers = #tpu.dot_dimension_numbers<[0], [0], [1], [1], [0, 1, 1, 1], [], []>} : vector<12x8xf32>, vector<12x8xf32>, vector<8x8xf32> -> vector<8x8xf32>
    %cst_7 = arith.constant dense<0.000000e+00> : vector<8x8xf32>
    %5 = tpu.matmul %2, %3, %cst_7 {dimension_numbers = #tpu.dot_dimension_numbers<[0], [0], [1], [1], [0, 1, 1, 1], [], []>} : vector<24x8xf32>, vector<24x8xf32>, vector<8x8xf32> -> vector<8x8xf32>
    %c0_8 = arith.constant 0 : index
    %c0_9 = arith.constant 0 : index
    %6 = vector.load %arg0[%c0_8, %c0_9] : memref<8x64xf32, #tpu.memory_space<vmem>>, vector<8x64xf32>
    %c0_10 = arith.constant 0 : index
    %c0_11 = arith.constant 0 : index
    %7 = vector.load %arg6[%c0_10, %c0_11] : memref<64x64xf32, #tpu.memory_space<vmem>>, vector<64x64xf32>
    %cst_12 = arith.constant dense<0.000000e+00> : vector<8x64xf32>
    %8 = tpu.matmul %6, %7, %cst_12 {dimension_numbers = #tpu.dot_dimension_numbers<[1], [0], [0], [1], [0, 0, 1, 1], [], []>} : vector<8x64xf32>, vector<64x64xf32>, vector<8x64xf32> -> vector<8x64xf32>
    %c0_13 = arith.constant 0 : index
    %c0_14 = arith.constant 0 : index
    %9 = vector.load %arg7[%c0_13, %c0_14] : memref<1x64xf32, #tpu.memory_space<vmem>>, vector<1x64xf32>
    %10 = vector.broadcast %9 : vector<1x64xf32> to vector<8x64xf32>
    %11 = arith.addf %8, %10 : vector<8x64xf32>
    %cst_15 = arith.constant 0.000000e+00 : f32
    %12 = vector.broadcast %cst_15 : f32 to vector<8x64xf32>
    %13 = arith.maximumf %11, %12 : vector<8x64xf32>
    %c0_16 = arith.constant 0 : index
    %c0_17 = arith.constant 0 : index
    %14 = vector.load %arg8[%c0_16, %c0_17] : memref<64x32xf32, #tpu.memory_space<vmem>>, vector<64x32xf32>
    %cst_18 = arith.constant dense<0.000000e+00> : vector<8x32xf32>
    %15 = tpu.matmul %13, %14, %cst_18 {dimension_numbers = #tpu.dot_dimension_numbers<[1], [0], [0], [1], [0, 0, 1, 1], [], []>} : vector<8x64xf32>, vector<64x32xf32>, vector<8x32xf32> -> vector<8x32xf32>
    %c0_19 = arith.constant 0 : index
    %c0_20 = arith.constant 0 : index
    %16 = vector.load %arg9[%c0_19, %c0_20] : memref<1x32xf32, #tpu.memory_space<vmem>>, vector<1x32xf32>
    %17 = vector.broadcast %16 : vector<1x32xf32> to vector<8x32xf32>
    %18 = arith.addf %15, %17 : vector<8x32xf32>
    %cst_21 = arith.constant 0.000000e+00 : f32
    %19 = vector.broadcast %cst_21 : f32 to vector<8x32xf32>
    %20 = arith.maximumf %18, %19 : vector<8x32xf32>
    %c0_22 = arith.constant 0 : index
    %c0_23 = arith.constant 0 : index
    %21 = vector.load %arg1[%c0_22, %c0_23] : memref<12x64xf32, #tpu.memory_space<vmem>>, vector<12x64xf32>
    %c0_24 = arith.constant 0 : index
    %c0_25 = arith.constant 0 : index
    %22 = vector.load %arg10[%c0_24, %c0_25] : memref<64x64xf32, #tpu.memory_space<vmem>>, vector<64x64xf32>
    %cst_26 = arith.constant dense<0.000000e+00> : vector<12x64xf32>
    %23 = tpu.matmul %21, %22, %cst_26 {dimension_numbers = #tpu.dot_dimension_numbers<[1], [0], [0], [1], [0, 0, 1, 1], [], []>} : vector<12x64xf32>, vector<64x64xf32>, vector<12x64xf32> -> vector<12x64xf32>
    %c0_27 = arith.constant 0 : index
    %c0_28 = arith.constant 0 : index
    %24 = vector.load %arg11[%c0_27, %c0_28] : memref<1x64xf32, #tpu.memory_space<vmem>>, vector<1x64xf32>
    %25 = vector.broadcast %24 : vector<1x64xf32> to vector<12x64xf32>
    %26 = arith.addf %23, %25 : vector<12x64xf32>
    %cst_29 = arith.constant 0.000000e+00 : f32
    %27 = vector.broadcast %cst_29 : f32 to vector<12x64xf32>
    %28 = arith.maximumf %26, %27 : vector<12x64xf32>
    %c0_30 = arith.constant 0 : index
    %c0_31 = arith.constant 0 : index
    %29 = vector.load %arg12[%c0_30, %c0_31] : memref<64x32xf32, #tpu.memory_space<vmem>>, vector<64x32xf32>
    %cst_32 = arith.constant dense<0.000000e+00> : vector<12x32xf32>
    %30 = tpu.matmul %28, %29, %cst_32 {dimension_numbers = #tpu.dot_dimension_numbers<[1], [0], [0], [1], [0, 0, 1, 1], [], []>} : vector<12x64xf32>, vector<64x32xf32>, vector<12x32xf32> -> vector<12x32xf32>
    %c0_33 = arith.constant 0 : index
    %c0_34 = arith.constant 0 : index
    %31 = vector.load %arg13[%c0_33, %c0_34] : memref<1x32xf32, #tpu.memory_space<vmem>>, vector<1x32xf32>
    %32 = vector.broadcast %31 : vector<1x32xf32> to vector<12x32xf32>
    %33 = arith.addf %30, %32 : vector<12x32xf32>
    %cst_35 = arith.constant 0.000000e+00 : f32
    %34 = vector.broadcast %cst_35 : f32 to vector<12x32xf32>
    %35 = arith.maximumf %33, %34 : vector<12x32xf32>
    %cst_36 = arith.constant dense<0.000000e+00> : vector<12x32xf32>
    %36 = tpu.matmul %0, %20, %cst_36 {dimension_numbers = #tpu.dot_dimension_numbers<[1], [0], [0], [1], [0, 0, 1, 1], [], []>} : vector<12x8xf32>, vector<8x32xf32>, vector<12x32xf32> -> vector<12x32xf32>
    %cst_37 = arith.constant dense<0.000000e+00> : vector<12x32xf32>
    %37 = tpu.matmul %1, %20, %cst_37 {dimension_numbers = #tpu.dot_dimension_numbers<[1], [0], [0], [1], [0, 0, 1, 1], [], []>} : vector<12x8xf32>, vector<8x32xf32>, vector<12x32xf32> -> vector<12x32xf32>
    %c0_38 = arith.constant 0 : index
    %c0_39 = arith.constant 0 : index
    %38 = vector.load %arg14[%c0_38, %c0_39] : memref<64x32xf32, #tpu.memory_space<vmem>>, vector<64x32xf32>
    %39 = vector.extract_strided_slice %38 {offsets = [0, 0], sizes = [32, 32], strides = [1, 1]} : vector<64x32xf32> to vector<32x32xf32>
    %cst_40 = arith.constant dense<0.000000e+00> : vector<12x32xf32>
    %40 = tpu.matmul %37, %39, %cst_40 {dimension_numbers = #tpu.dot_dimension_numbers<[1], [0], [0], [1], [0, 0, 1, 1], [], []>} : vector<12x32xf32>, vector<32x32xf32>, vector<12x32xf32> -> vector<12x32xf32>
    %41 = vector.extract_strided_slice %38 {offsets = [32, 0], sizes = [32, 32], strides = [1, 1]} : vector<64x32xf32> to vector<32x32xf32>
    %cst_41 = arith.constant dense<0.000000e+00> : vector<12x32xf32>
    %42 = tpu.matmul %36, %41, %cst_41 {dimension_numbers = #tpu.dot_dimension_numbers<[1], [0], [0], [1], [0, 0, 1, 1], [], []>} : vector<12x32xf32>, vector<32x32xf32>, vector<12x32xf32> -> vector<12x32xf32>
    %43 = arith.addf %40, %42 : vector<12x32xf32>
    %c0_42 = arith.constant 0 : index
    %c0_43 = arith.constant 0 : index
    %44 = vector.load %arg15[%c0_42, %c0_43] : memref<1x32xf32, #tpu.memory_space<vmem>>, vector<1x32xf32>
    %45 = vector.broadcast %44 : vector<1x32xf32> to vector<12x32xf32>
    %46 = arith.addf %43, %45 : vector<12x32xf32>
    %c0_44 = arith.constant 0 : index
    %c0_45 = arith.constant 0 : index
    %47 = vector.load %arg16[%c0_44, %c0_45] : memref<1x32xf32, #tpu.memory_space<vmem>>, vector<1x32xf32>
    %48 = vector.broadcast %47 : vector<1x32xf32> to vector<12x32xf32>
    %49 = arith.mulf %46, %48 : vector<12x32xf32>
    %cst_46 = arith.constant dense<0.000000e+00> : vector<12xf32>
    %50 = vector.multi_reduction <add>, %49, %cst_46 [1] : vector<12x32xf32> to vector<12xf32>
    %51 = vector.shape_cast %50 : vector<12xf32> to vector<12x1xf32>
    %c0_47 = arith.constant 0 : index
    %c0_48 = arith.constant 0 : index
    %52 = vector.load %arg17[%c0_47, %c0_48] : memref<1x1xf32, #tpu.memory_space<vmem>>, vector<1x1xf32>
    %53 = vector.broadcast %52 : vector<1x1xf32> to vector<12x1xf32>
    %54 = arith.addf %51, %53 : vector<12x1xf32>
    %cst_49 = arith.constant 0.000000e+00 : f32
    %55 = vector.broadcast %cst_49 : f32 to vector<12x1xf32>
    %56 = arith.cmpf ogt, %54, %55 : vector<12x1xf32>
    %cst_50 = arith.constant 2.000000e-01 : f32
    %57 = vector.broadcast %cst_50 : f32 to vector<12x1xf32>
    %58 = arith.mulf %57, %54 : vector<12x1xf32>
    %59 = arith.select %56, %54, %58 : vector<12x1xi1>, vector<12x1xf32>
    %cst_51 = arith.constant 0.000000e+00 : f32
    %60 = vector.broadcast %cst_51 : f32 to vector<12x8xf32>
    %61 = arith.cmpf ogt, %1, %60 : vector<12x8xf32>
    %cst_52 = arith.constant -1.000000e+30 : f32
    %62 = vector.shape_cast %59 : vector<12x1xf32> to vector<12x1xf32>
    %63 = vector.broadcast %62 : vector<12x1xf32> to vector<12x8xf32>
    %64 = vector.broadcast %cst_52 : f32 to vector<12x8xf32>
    %65 = arith.select %61, %63, %64 : vector<12x8xi1>, vector<12x8xf32>
    %cst_53 = arith.constant dense<0xFF800000> : vector<8xf32>
    %66 = vector.multi_reduction <maximumf>, %65, %cst_53 [0] : vector<12x8xf32> to vector<8xf32>
    %67 = vector.shape_cast %66 : vector<8xf32> to vector<1x8xf32>
    %68 = vector.broadcast %67 : vector<1x8xf32> to vector<12x8xf32>
    %69 = arith.mulf %1, %68 : vector<12x8xf32>
    %cst_54 = arith.constant dense<0.000000e+00> : vector<12xf32>
    %70 = vector.multi_reduction <add>, %69, %cst_54 [1] : vector<12x8xf32> to vector<12xf32>
    %71 = vector.shape_cast %70 : vector<12xf32> to vector<12x1xf32>
    %72 = arith.subf %59, %71 : vector<12x1xf32>
    %73 = math.exp %72 : vector<12x1xf32>
    %74 = vector.broadcast %73 : vector<12x1xf32> to vector<12x8xf32>
    %75 = arith.mulf %1, %74 : vector<12x8xf32>
    %cst_55 = arith.constant dense<0.000000e+00> : vector<8xf32>
    %76 = vector.multi_reduction <add>, %75, %cst_55 [0] : vector<12x8xf32> to vector<8xf32>
    %77 = vector.shape_cast %76 : vector<8xf32> to vector<1x8xf32>
    %78 = vector.broadcast %77 : vector<1x8xf32> to vector<12x8xf32>
    %79 = arith.mulf %1, %78 : vector<12x8xf32>
    %cst_56 = arith.constant dense<0.000000e+00> : vector<12xf32>
    %80 = vector.multi_reduction <add>, %79, %cst_56 [1] : vector<12x8xf32> to vector<12xf32>
    %81 = vector.shape_cast %80 : vector<12xf32> to vector<12x1xf32>
    %cst_57 = arith.constant 1.000000e-16 : f32
    %82 = vector.broadcast %cst_57 : f32 to vector<12x1xf32>
    %83 = arith.addf %81, %82 : vector<12x1xf32>
    %84 = arith.divf %73, %83 : vector<12x1xf32>
    %85 = vector.broadcast %84 : vector<12x1xf32> to vector<12x32xf32>
    %86 = arith.mulf %85, %46 : vector<12x32xf32>
    %87 = arith.addf %35, %86 : vector<12x32xf32>
    %c0_58 = arith.constant 0 : index
    %c0_59 = arith.constant 0 : index
    %88 = vector.load %arg18[%c0_58, %c0_59] : memref<64x32xf32, #tpu.memory_space<vmem>>, vector<64x32xf32>
    %89 = vector.extract_strided_slice %88 {offsets = [0, 0], sizes = [32, 32], strides = [1, 1]} : vector<64x32xf32> to vector<32x32xf32>
    %cst_60 = arith.constant dense<0.000000e+00> : vector<12x32xf32>
    %90 = tpu.matmul %36, %89, %cst_60 {dimension_numbers = #tpu.dot_dimension_numbers<[1], [0], [0], [1], [0, 0, 1, 1], [], []>} : vector<12x32xf32>, vector<32x32xf32>, vector<12x32xf32> -> vector<12x32xf32>
    %91 = vector.extract_strided_slice %88 {offsets = [32, 0], sizes = [32, 32], strides = [1, 1]} : vector<64x32xf32> to vector<32x32xf32>
    %cst_61 = arith.constant dense<0.000000e+00> : vector<12x32xf32>
    %92 = tpu.matmul %37, %91, %cst_61 {dimension_numbers = #tpu.dot_dimension_numbers<[1], [0], [0], [1], [0, 0, 1, 1], [], []>} : vector<12x32xf32>, vector<32x32xf32>, vector<12x32xf32> -> vector<12x32xf32>
    %93 = arith.addf %90, %92 : vector<12x32xf32>
    %c0_62 = arith.constant 0 : index
    %c0_63 = arith.constant 0 : index
    %94 = vector.load %arg19[%c0_62, %c0_63] : memref<1x32xf32, #tpu.memory_space<vmem>>, vector<1x32xf32>
    %95 = vector.broadcast %94 : vector<1x32xf32> to vector<12x32xf32>
    %96 = arith.addf %93, %95 : vector<12x32xf32>
    %c0_64 = arith.constant 0 : index
    %c0_65 = arith.constant 0 : index
    %97 = vector.load %arg20[%c0_64, %c0_65] : memref<1x32xf32, #tpu.memory_space<vmem>>, vector<1x32xf32>
    %98 = vector.broadcast %97 : vector<1x32xf32> to vector<12x32xf32>
    %99 = arith.mulf %96, %98 : vector<12x32xf32>
    %cst_66 = arith.constant dense<0.000000e+00> : vector<12xf32>
    %100 = vector.multi_reduction <add>, %99, %cst_66 [1] : vector<12x32xf32> to vector<12xf32>
    %101 = vector.shape_cast %100 : vector<12xf32> to vector<12x1xf32>
    %c0_67 = arith.constant 0 : index
    %c0_68 = arith.constant 0 : index
    %102 = vector.load %arg21[%c0_67, %c0_68] : memref<1x1xf32, #tpu.memory_space<vmem>>, vector<1x1xf32>
    %103 = vector.broadcast %102 : vector<1x1xf32> to vector<12x1xf32>
    %104 = arith.addf %101, %103 : vector<12x1xf32>
    %cst_69 = arith.constant 0.000000e+00 : f32
    %105 = vector.broadcast %cst_69 : f32 to vector<12x1xf32>
    %106 = arith.cmpf ogt, %104, %105 : vector<12x1xf32>
    %cst_70 = arith.constant 2.000000e-01 : f32
    %107 = vector.broadcast %cst_70 : f32 to vector<12x1xf32>
    %108 = arith.mulf %107, %104 : vector<12x1xf32>
    %109 = arith.select %106, %104, %108 : vector<12x1xi1>, vector<12x1xf32>
    %cst_71 = arith.constant 0.000000e+00 : f32
    %110 = vector.broadcast %cst_71 : f32 to vector<12x8xf32>
    %111 = arith.cmpf ogt, %0, %110 : vector<12x8xf32>
    %cst_72 = arith.constant -1.000000e+30 : f32
    %112 = vector.shape_cast %109 : vector<12x1xf32> to vector<12x1xf32>
    %113 = vector.broadcast %112 : vector<12x1xf32> to vector<12x8xf32>
    %114 = vector.broadcast %cst_72 : f32 to vector<12x8xf32>
    %115 = arith.select %111, %113, %114 : vector<12x8xi1>, vector<12x8xf32>
    %cst_73 = arith.constant dense<0xFF800000> : vector<8xf32>
    %116 = vector.multi_reduction <maximumf>, %115, %cst_73 [0] : vector<12x8xf32> to vector<8xf32>
    %117 = vector.shape_cast %116 : vector<8xf32> to vector<1x8xf32>
    %118 = vector.broadcast %117 : vector<1x8xf32> to vector<12x8xf32>
    %119 = arith.mulf %0, %118 : vector<12x8xf32>
    %cst_74 = arith.constant dense<0.000000e+00> : vector<12xf32>
    %120 = vector.multi_reduction <add>, %119, %cst_74 [1] : vector<12x8xf32> to vector<12xf32>
    %121 = vector.shape_cast %120 : vector<12xf32> to vector<12x1xf32>
    %122 = arith.subf %109, %121 : vector<12x1xf32>
    %123 = math.exp %122 : vector<12x1xf32>
    %124 = vector.broadcast %123 : vector<12x1xf32> to vector<12x8xf32>
    %125 = arith.mulf %0, %124 : vector<12x8xf32>
    %cst_75 = arith.constant dense<0.000000e+00> : vector<8xf32>
    %126 = vector.multi_reduction <add>, %125, %cst_75 [0] : vector<12x8xf32> to vector<8xf32>
    %127 = vector.shape_cast %126 : vector<8xf32> to vector<1x8xf32>
    %128 = vector.broadcast %127 : vector<1x8xf32> to vector<12x8xf32>
    %129 = arith.mulf %0, %128 : vector<12x8xf32>
    %cst_76 = arith.constant dense<0.000000e+00> : vector<12xf32>
    %130 = vector.multi_reduction <add>, %129, %cst_76 [1] : vector<12x8xf32> to vector<12xf32>
    %131 = vector.shape_cast %130 : vector<12xf32> to vector<12x1xf32>
    %cst_77 = arith.constant 1.000000e-16 : f32
    %132 = vector.broadcast %cst_77 : f32 to vector<12x1xf32>
    %133 = arith.addf %131, %132 : vector<12x1xf32>
    %134 = arith.divf %123, %133 : vector<12x1xf32>
    %135 = vector.broadcast %134 : vector<12x1xf32> to vector<12x32xf32>
    %136 = arith.mulf %135, %96 : vector<12x32xf32>
    %137 = arith.addf %35, %136 : vector<12x32xf32>
    %138 = arith.addf %87, %137 : vector<12x32xf32>
    %cst_78 = arith.constant 5.000000e-01 : f32
    %139 = vector.broadcast %cst_78 : f32 to vector<12x32xf32>
    %140 = arith.mulf %138, %139 : vector<12x32xf32>
    %c0_79 = arith.constant 0 : index
    %c0_80 = arith.constant 0 : index
    %141 = vector.load %arg22[%c0_79, %c0_80] : memref<64x32xf32, #tpu.memory_space<vmem>>, vector<64x32xf32>
    %142 = vector.extract_strided_slice %141 {offsets = [0, 0], sizes = [32, 32], strides = [1, 1]} : vector<64x32xf32> to vector<32x32xf32>
    %cst_81 = arith.constant dense<0.000000e+00> : vector<12x32xf32>
    %143 = tpu.matmul %36, %142, %cst_81 {dimension_numbers = #tpu.dot_dimension_numbers<[1], [0], [0], [1], [0, 0, 1, 1], [], []>} : vector<12x32xf32>, vector<32x32xf32>, vector<12x32xf32> -> vector<12x32xf32>
    %144 = vector.extract_strided_slice %141 {offsets = [32, 0], sizes = [32, 32], strides = [1, 1]} : vector<64x32xf32> to vector<32x32xf32>
    %cst_82 = arith.constant dense<0.000000e+00> : vector<12x32xf32>
    %145 = tpu.matmul %140, %144, %cst_82 {dimension_numbers = #tpu.dot_dimension_numbers<[1], [0], [0], [1], [0, 0, 1, 1], [], []>} : vector<12x32xf32>, vector<32x32xf32>, vector<12x32xf32> -> vector<12x32xf32>
    %146 = arith.addf %143, %145 : vector<12x32xf32>
    %c0_83 = arith.constant 0 : index
    %c0_84 = arith.constant 0 : index
    %147 = vector.load %arg23[%c0_83, %c0_84] : memref<1x32xf32, #tpu.memory_space<vmem>>, vector<1x32xf32>
    %148 = vector.broadcast %147 : vector<1x32xf32> to vector<12x32xf32>
    %149 = arith.addf %146, %148 : vector<12x32xf32>
    %c0_85 = arith.constant 0 : index
    %c0_86 = arith.constant 0 : index
    %150 = vector.load %arg24[%c0_85, %c0_86] : memref<1x32xf32, #tpu.memory_space<vmem>>, vector<1x32xf32>
    %151 = vector.broadcast %150 : vector<1x32xf32> to vector<12x32xf32>
    %152 = arith.mulf %149, %151 : vector<12x32xf32>
    %cst_87 = arith.constant dense<0.000000e+00> : vector<12xf32>
    %153 = vector.multi_reduction <add>, %152, %cst_87 [1] : vector<12x32xf32> to vector<12xf32>
    %154 = vector.shape_cast %153 : vector<12xf32> to vector<12x1xf32>
    %c0_88 = arith.constant 0 : index
    %c0_89 = arith.constant 0 : index
    %155 = vector.load %arg25[%c0_88, %c0_89] : memref<1x1xf32, #tpu.memory_space<vmem>>, vector<1x1xf32>
    %156 = vector.broadcast %155 : vector<1x1xf32> to vector<12x1xf32>
    %157 = arith.addf %154, %156 : vector<12x1xf32>
    %cst_90 = arith.constant 0.000000e+00 : f32
    %158 = vector.broadcast %cst_90 : f32 to vector<12x1xf32>
    %159 = arith.cmpf ogt, %157, %158 : vector<12x1xf32>
    %cst_91 = arith.constant 2.000000e-01 : f32
    %160 = vector.broadcast %cst_91 : f32 to vector<12x1xf32>
    %161 = arith.mulf %160, %157 : vector<12x1xf32>
    %162 = arith.select %159, %157, %161 : vector<12x1xi1>, vector<12x1xf32>
    %163 = vector.broadcast %162 : vector<12x1xf32> to vector<12x8xf32>
    %164 = arith.mulf %163, %1 : vector<12x8xf32>
    %cst_92 = arith.constant dense<0.000000e+00> : vector<8x8xf32>
    %165 = tpu.matmul %0, %164, %cst_92 {dimension_numbers = #tpu.dot_dimension_numbers<[0], [0], [1], [1], [0, 1, 1, 1], [], []>} : vector<12x8xf32>, vector<12x8xf32>, vector<8x8xf32> -> vector<8x8xf32>
    %cst_93 = arith.constant 0.000000e+00 : f32
    %166 = vector.broadcast %cst_93 : f32 to vector<8x8xf32>
    %167 = arith.cmpf ogt, %4, %166 : vector<8x8xf32>
    %cst_94 = arith.constant -9.99999986E+14 : f32
    %168 = vector.broadcast %cst_94 : f32 to vector<8x8xf32>
    %169 = arith.select %167, %165, %168 : vector<8x8xi1>, vector<8x8xf32>
    %170 = tpu.iota {dimensions = array<i32: 1>} : vector<8x8xi32>
    %cst_95 = arith.constant dense<0xFF800000> : vector<8xf32>
    %171 = vector.multi_reduction <maximumf>, %169, %cst_95 [1] : vector<8x8xf32> to vector<8xf32>
    %172 = vector.shape_cast %171 : vector<8xf32> to vector<8x1xf32>
    %173 = vector.broadcast %172 : vector<8x1xf32> to vector<8x8xf32>
    %174 = arith.cmpf oeq, %169, %173 : vector<8x8xf32>
    %c8_i32 = arith.constant 8 : i32
    %175 = vector.broadcast %c8_i32 : i32 to vector<8x8xi32>
    %176 = arith.select %174, %170, %175 : vector<8x8xi1>, vector<8x8xi32>
    %cst_96 = arith.constant dense<2147483647> : vector<8xi32>
    %177 = vector.multi_reduction <minsi>, %176, %cst_96 [1] : vector<8x8xi32> to vector<8xi32>
    %178 = vector.shape_cast %177 : vector<8xi32> to vector<8x1xi32>
    %179 = vector.broadcast %178 : vector<8x1xi32> to vector<8x8xi32>
    %180 = arith.cmpi eq, %170, %179 : vector<8x8xi32>
    %cst_97 = arith.constant -9.99999986E+14 : f32
    %181 = vector.broadcast %cst_97 : f32 to vector<8x8xf32>
    %182 = arith.select %180, %181, %169 : vector<8x8xi1>, vector<8x8xf32>
    %cst_98 = arith.constant dense<0xFF800000> : vector<8xf32>
    %183 = vector.multi_reduction <maximumf>, %182, %cst_98 [1] : vector<8x8xf32> to vector<8xf32>
    %184 = vector.shape_cast %183 : vector<8xf32> to vector<8x1xf32>
    %185 = vector.broadcast %184 : vector<8x1xf32> to vector<8x8xf32>
    %186 = arith.cmpf oeq, %182, %185 : vector<8x8xf32>
    %c8_i32_99 = arith.constant 8 : i32
    %187 = vector.broadcast %c8_i32_99 : i32 to vector<8x8xi32>
    %188 = arith.select %186, %170, %187 : vector<8x8xi1>, vector<8x8xi32>
    %cst_100 = arith.constant dense<2147483647> : vector<8xi32>
    %189 = vector.multi_reduction <minsi>, %188, %cst_100 [1] : vector<8x8xi32> to vector<8xi32>
    %190 = vector.shape_cast %189 : vector<8xi32> to vector<8x1xi32>
    %191 = vector.broadcast %190 : vector<8x1xi32> to vector<8x8xi32>
    %192 = arith.cmpi eq, %170, %191 : vector<8x8xi32>
    %cst_101 = arith.constant -9.99999986E+14 : f32
    %193 = vector.broadcast %cst_101 : f32 to vector<8x8xf32>
    %194 = arith.select %192, %193, %182 : vector<8x8xi1>, vector<8x8xf32>
    %cst_102 = arith.constant dense<0xFF800000> : vector<8xf32>
    %195 = vector.multi_reduction <maximumf>, %194, %cst_102 [1] : vector<8x8xf32> to vector<8xf32>
    %196 = vector.shape_cast %195 : vector<8xf32> to vector<8x1xf32>
    %197 = vector.broadcast %196 : vector<8x1xf32> to vector<8x8xf32>
    %198 = arith.cmpf ole, %169, %197 : vector<8x8xf32>
    %cst_103 = arith.constant -9.99999986E+14 : f32
    %199 = vector.broadcast %cst_103 : f32 to vector<8x8xf32>
    %200 = arith.select %198, %199, %169 : vector<8x8xi1>, vector<8x8xf32>
    %cst_104 = arith.constant dense<0.000000e+00> : vector<12x8xf32>
    %201 = tpu.matmul %0, %200, %cst_104 {dimension_numbers = #tpu.dot_dimension_numbers<[1], [0], [0], [1], [0, 0, 1, 1], [], []>} : vector<12x8xf32>, vector<8x8xf32>, vector<12x8xf32> -> vector<12x8xf32>
    %202 = arith.mulf %201, %1 : vector<12x8xf32>
    %cst_105 = arith.constant dense<0.000000e+00> : vector<12xf32>
    %203 = vector.multi_reduction <add>, %202, %cst_105 [1] : vector<12x8xf32> to vector<12xf32>
    %204 = vector.shape_cast %203 : vector<12xf32> to vector<12x1xf32>
    %cst_106 = arith.constant 0.000000e+00 : f32
    %205 = vector.broadcast %cst_106 : f32 to vector<12x8xf32>
    %206 = arith.cmpf ogt, %0, %205 : vector<12x8xf32>
    %cst_107 = arith.constant -1.000000e+30 : f32
    %207 = vector.shape_cast %204 : vector<12x1xf32> to vector<12x1xf32>
    %208 = vector.broadcast %207 : vector<12x1xf32> to vector<12x8xf32>
    %209 = vector.broadcast %cst_107 : f32 to vector<12x8xf32>
    %210 = arith.select %206, %208, %209 : vector<12x8xi1>, vector<12x8xf32>
    %cst_108 = arith.constant dense<0xFF800000> : vector<8xf32>
    %211 = vector.multi_reduction <maximumf>, %210, %cst_108 [0] : vector<12x8xf32> to vector<8xf32>
    %212 = vector.shape_cast %211 : vector<8xf32> to vector<1x8xf32>
    %213 = vector.broadcast %212 : vector<1x8xf32> to vector<12x8xf32>
    %214 = arith.mulf %0, %213 : vector<12x8xf32>
    %cst_109 = arith.constant dense<0.000000e+00> : vector<12xf32>
    %215 = vector.multi_reduction <add>, %214, %cst_109 [1] : vector<12x8xf32> to vector<12xf32>
    %216 = vector.shape_cast %215 : vector<12xf32> to vector<12x1xf32>
    %217 = arith.subf %204, %216 : vector<12x1xf32>
    %218 = math.exp %217 : vector<12x1xf32>
    %219 = vector.broadcast %218 : vector<12x1xf32> to vector<12x8xf32>
    %220 = arith.mulf %0, %219 : vector<12x8xf32>
    %cst_110 = arith.constant dense<0.000000e+00> : vector<8xf32>
    %221 = vector.multi_reduction <add>, %220, %cst_110 [0] : vector<12x8xf32> to vector<8xf32>
    %222 = vector.shape_cast %221 : vector<8xf32> to vector<1x8xf32>
    %223 = vector.broadcast %222 : vector<1x8xf32> to vector<12x8xf32>
    %224 = arith.mulf %0, %223 : vector<12x8xf32>
    %cst_111 = arith.constant dense<0.000000e+00> : vector<12xf32>
    %225 = vector.multi_reduction <add>, %224, %cst_111 [1] : vector<12x8xf32> to vector<12xf32>
    %226 = vector.shape_cast %225 : vector<12xf32> to vector<12x1xf32>
    %cst_112 = arith.constant 1.000000e-16 : f32
    %227 = vector.broadcast %cst_112 : f32 to vector<12x1xf32>
    %228 = arith.addf %226, %227 : vector<12x1xf32>
    %229 = arith.divf %218, %228 : vector<12x1xf32>
    %230 = vector.broadcast %229 : vector<12x1xf32> to vector<12x32xf32>
    %231 = arith.mulf %230, %149 : vector<12x32xf32>
    %c0_113 = arith.constant 0 : index
    %c0_114 = arith.constant 0 : index
    %232 = vector.load %arg26[%c0_113, %c0_114] : memref<64x32xf32, #tpu.memory_space<vmem>>, vector<64x32xf32>
    %233 = vector.extract_strided_slice %232 {offsets = [0, 0], sizes = [32, 32], strides = [1, 1]} : vector<64x32xf32> to vector<32x32xf32>
    %cst_115 = arith.constant dense<0.000000e+00> : vector<12x32xf32>
    %234 = tpu.matmul %37, %233, %cst_115 {dimension_numbers = #tpu.dot_dimension_numbers<[1], [0], [0], [1], [0, 0, 1, 1], [], []>} : vector<12x32xf32>, vector<32x32xf32>, vector<12x32xf32> -> vector<12x32xf32>
    %235 = vector.extract_strided_slice %232 {offsets = [32, 0], sizes = [32, 32], strides = [1, 1]} : vector<64x32xf32> to vector<32x32xf32>
    %cst_116 = arith.constant dense<0.000000e+00> : vector<12x32xf32>
    %236 = tpu.matmul %140, %235, %cst_116 {dimension_numbers = #tpu.dot_dimension_numbers<[1], [0], [0], [1], [0, 0, 1, 1], [], []>} : vector<12x32xf32>, vector<32x32xf32>, vector<12x32xf32> -> vector<12x32xf32>
    %237 = arith.addf %234, %236 : vector<12x32xf32>
    %c0_117 = arith.constant 0 : index
    %c0_118 = arith.constant 0 : index
    %238 = vector.load %arg27[%c0_117, %c0_118] : memref<1x32xf32, #tpu.memory_space<vmem>>, vector<1x32xf32>
    %239 = vector.broadcast %238 : vector<1x32xf32> to vector<12x32xf32>
    %240 = arith.addf %237, %239 : vector<12x32xf32>
    %c0_119 = arith.constant 0 : index
    %c0_120 = arith.constant 0 : index
    %241 = vector.load %arg28[%c0_119, %c0_120] : memref<1x32xf32, #tpu.memory_space<vmem>>, vector<1x32xf32>
    %242 = vector.broadcast %241 : vector<1x32xf32> to vector<12x32xf32>
    %243 = arith.mulf %240, %242 : vector<12x32xf32>
    %cst_121 = arith.constant dense<0.000000e+00> : vector<12xf32>
    %244 = vector.multi_reduction <add>, %243, %cst_121 [1] : vector<12x32xf32> to vector<12xf32>
    %245 = vector.shape_cast %244 : vector<12xf32> to vector<12x1xf32>
    %c0_122 = arith.constant 0 : index
    %c0_123 = arith.constant 0 : index
    %246 = vector.load %arg29[%c0_122, %c0_123] : memref<1x1xf32, #tpu.memory_space<vmem>>, vector<1x1xf32>
    %247 = vector.broadcast %246 : vector<1x1xf32> to vector<12x1xf32>
    %248 = arith.addf %245, %247 : vector<12x1xf32>
    %cst_124 = arith.constant 0.000000e+00 : f32
    %249 = vector.broadcast %cst_124 : f32 to vector<12x1xf32>
    %250 = arith.cmpf ogt, %248, %249 : vector<12x1xf32>
    %cst_125 = arith.constant 2.000000e-01 : f32
    %251 = vector.broadcast %cst_125 : f32 to vector<12x1xf32>
    %252 = arith.mulf %251, %248 : vector<12x1xf32>
    %253 = arith.select %250, %248, %252 : vector<12x1xi1>, vector<12x1xf32>
    %254 = vector.broadcast %253 : vector<12x1xf32> to vector<12x8xf32>
    %255 = arith.mulf %254, %1 : vector<12x8xf32>
    %cst_126 = arith.constant dense<0.000000e+00> : vector<8x8xf32>
    %256 = tpu.matmul %0, %255, %cst_126 {dimension_numbers = #tpu.dot_dimension_numbers<[0], [0], [1], [1], [0, 1, 1, 1], [], []>} : vector<12x8xf32>, vector<12x8xf32>, vector<8x8xf32> -> vector<8x8xf32>
    %cst_127 = arith.constant 0.000000e+00 : f32
    %257 = vector.broadcast %cst_127 : f32 to vector<8x8xf32>
    %258 = arith.cmpf ogt, %4, %257 : vector<8x8xf32>
    %cst_128 = arith.constant -9.99999986E+14 : f32
    %259 = vector.broadcast %cst_128 : f32 to vector<8x8xf32>
    %260 = arith.select %258, %256, %259 : vector<8x8xi1>, vector<8x8xf32>
    %261 = tpu.iota {dimensions = array<i32: 0>} : vector<8x8xi32>
    %cst_129 = arith.constant dense<0xFF800000> : vector<8xf32>
    %262 = vector.multi_reduction <maximumf>, %260, %cst_129 [0] : vector<8x8xf32> to vector<8xf32>
    %263 = vector.shape_cast %262 : vector<8xf32> to vector<1x8xf32>
    %264 = vector.broadcast %263 : vector<1x8xf32> to vector<8x8xf32>
    %265 = arith.cmpf oeq, %260, %264 : vector<8x8xf32>
    %c8_i32_130 = arith.constant 8 : i32
    %266 = vector.broadcast %c8_i32_130 : i32 to vector<8x8xi32>
    %267 = arith.select %265, %261, %266 : vector<8x8xi1>, vector<8x8xi32>
    %cst_131 = arith.constant dense<2147483647> : vector<8xi32>
    %268 = vector.multi_reduction <minsi>, %267, %cst_131 [0] : vector<8x8xi32> to vector<8xi32>
    %269 = vector.shape_cast %268 : vector<8xi32> to vector<1x8xi32>
    %270 = vector.broadcast %269 : vector<1x8xi32> to vector<8x8xi32>
    %271 = arith.cmpi eq, %261, %270 : vector<8x8xi32>
    %cst_132 = arith.constant -9.99999986E+14 : f32
    %272 = vector.broadcast %cst_132 : f32 to vector<8x8xf32>
    %273 = arith.select %271, %272, %260 : vector<8x8xi1>, vector<8x8xf32>
    %cst_133 = arith.constant dense<0xFF800000> : vector<8xf32>
    %274 = vector.multi_reduction <maximumf>, %273, %cst_133 [0] : vector<8x8xf32> to vector<8xf32>
    %275 = vector.shape_cast %274 : vector<8xf32> to vector<1x8xf32>
    %276 = vector.broadcast %275 : vector<1x8xf32> to vector<8x8xf32>
    %277 = arith.cmpf oeq, %273, %276 : vector<8x8xf32>
    %c8_i32_134 = arith.constant 8 : i32
    %278 = vector.broadcast %c8_i32_134 : i32 to vector<8x8xi32>
    %279 = arith.select %277, %261, %278 : vector<8x8xi1>, vector<8x8xi32>
    %cst_135 = arith.constant dense<2147483647> : vector<8xi32>
    %280 = vector.multi_reduction <minsi>, %279, %cst_135 [0] : vector<8x8xi32> to vector<8xi32>
    %281 = vector.shape_cast %280 : vector<8xi32> to vector<1x8xi32>
    %282 = vector.broadcast %281 : vector<1x8xi32> to vector<8x8xi32>
    %283 = arith.cmpi eq, %261, %282 : vector<8x8xi32>
    %cst_136 = arith.constant -9.99999986E+14 : f32
    %284 = vector.broadcast %cst_136 : f32 to vector<8x8xf32>
    %285 = arith.select %283, %284, %273 : vector<8x8xi1>, vector<8x8xf32>
    %cst_137 = arith.constant dense<0xFF800000> : vector<8xf32>
    %286 = vector.multi_reduction <maximumf>, %285, %cst_137 [0] : vector<8x8xf32> to vector<8xf32>
    %287 = vector.shape_cast %286 : vector<8xf32> to vector<1x8xf32>
    %288 = vector.broadcast %287 : vector<1x8xf32> to vector<8x8xf32>
    %289 = arith.cmpf ole, %260, %288 : vector<8x8xf32>
    %cst_138 = arith.constant -9.99999986E+14 : f32
    %290 = vector.broadcast %cst_138 : f32 to vector<8x8xf32>
    %291 = arith.select %289, %290, %260 : vector<8x8xi1>, vector<8x8xf32>
    %cst_139 = arith.constant dense<0.000000e+00> : vector<12x8xf32>
    %292 = tpu.matmul %0, %291, %cst_139 {dimension_numbers = #tpu.dot_dimension_numbers<[1], [0], [0], [1], [0, 0, 1, 1], [], []>} : vector<12x8xf32>, vector<8x8xf32>, vector<12x8xf32> -> vector<12x8xf32>
    %293 = arith.mulf %292, %1 : vector<12x8xf32>
    %cst_140 = arith.constant dense<0.000000e+00> : vector<12xf32>
    %294 = vector.multi_reduction <add>, %293, %cst_140 [1] : vector<12x8xf32> to vector<12xf32>
    %295 = vector.shape_cast %294 : vector<12xf32> to vector<12x1xf32>
    %cst_141 = arith.constant 0.000000e+00 : f32
    %296 = vector.broadcast %cst_141 : f32 to vector<12x8xf32>
    %297 = arith.cmpf ogt, %1, %296 : vector<12x8xf32>
    %cst_142 = arith.constant -1.000000e+30 : f32
    %298 = vector.shape_cast %295 : vector<12x1xf32> to vector<12x1xf32>
    %299 = vector.broadcast %298 : vector<12x1xf32> to vector<12x8xf32>
    %300 = vector.broadcast %cst_142 : f32 to vector<12x8xf32>
    %301 = arith.select %297, %299, %300 : vector<12x8xi1>, vector<12x8xf32>
    %cst_143 = arith.constant dense<0xFF800000> : vector<8xf32>
    %302 = vector.multi_reduction <maximumf>, %301, %cst_143 [0] : vector<12x8xf32> to vector<8xf32>
    %303 = vector.shape_cast %302 : vector<8xf32> to vector<1x8xf32>
    %304 = vector.broadcast %303 : vector<1x8xf32> to vector<12x8xf32>
    %305 = arith.mulf %1, %304 : vector<12x8xf32>
    %cst_144 = arith.constant dense<0.000000e+00> : vector<12xf32>
    %306 = vector.multi_reduction <add>, %305, %cst_144 [1] : vector<12x8xf32> to vector<12xf32>
    %307 = vector.shape_cast %306 : vector<12xf32> to vector<12x1xf32>
    %308 = arith.subf %295, %307 : vector<12x1xf32>
    %309 = math.exp %308 : vector<12x1xf32>
    %310 = vector.broadcast %309 : vector<12x1xf32> to vector<12x8xf32>
    %311 = arith.mulf %1, %310 : vector<12x8xf32>
    %cst_145 = arith.constant dense<0.000000e+00> : vector<8xf32>
    %312 = vector.multi_reduction <add>, %311, %cst_145 [0] : vector<12x8xf32> to vector<8xf32>
    %313 = vector.shape_cast %312 : vector<8xf32> to vector<1x8xf32>
    %314 = vector.broadcast %313 : vector<1x8xf32> to vector<12x8xf32>
    %315 = arith.mulf %1, %314 : vector<12x8xf32>
    %cst_146 = arith.constant dense<0.000000e+00> : vector<12xf32>
    %316 = vector.multi_reduction <add>, %315, %cst_146 [1] : vector<12x8xf32> to vector<12xf32>
    %317 = vector.shape_cast %316 : vector<12xf32> to vector<12x1xf32>
    %cst_147 = arith.constant 1.000000e-16 : f32
    %318 = vector.broadcast %cst_147 : f32 to vector<12x1xf32>
    %319 = arith.addf %317, %318 : vector<12x1xf32>
    %320 = arith.divf %309, %319 : vector<12x1xf32>
    %321 = vector.broadcast %320 : vector<12x1xf32> to vector<12x32xf32>
    %322 = arith.mulf %321, %240 : vector<12x32xf32>
    %cst_148 = arith.constant dense<0.000000e+00> : vector<24x32xf32>
    %323 = tpu.matmul %2, %20, %cst_148 {dimension_numbers = #tpu.dot_dimension_numbers<[1], [0], [0], [1], [0, 0, 1, 1], [], []>} : vector<24x8xf32>, vector<8x32xf32>, vector<24x32xf32> -> vector<24x32xf32>
    %cst_149 = arith.constant dense<0.000000e+00> : vector<24x32xf32>
    %324 = tpu.matmul %3, %20, %cst_149 {dimension_numbers = #tpu.dot_dimension_numbers<[1], [0], [0], [1], [0, 0, 1, 1], [], []>} : vector<24x8xf32>, vector<8x32xf32>, vector<24x32xf32> -> vector<24x32xf32>
    %c0_150 = arith.constant 0 : index
    %c0_151 = arith.constant 0 : index
    %325 = vector.load %arg30[%c0_150, %c0_151] : memref<64x32xf32, #tpu.memory_space<vmem>>, vector<64x32xf32>
    %326 = vector.extract_strided_slice %325 {offsets = [0, 0], sizes = [32, 32], strides = [1, 1]} : vector<64x32xf32> to vector<32x32xf32>
    %cst_152 = arith.constant dense<0.000000e+00> : vector<24x32xf32>
    %327 = tpu.matmul %324, %326, %cst_152 {dimension_numbers = #tpu.dot_dimension_numbers<[1], [0], [0], [1], [0, 0, 1, 1], [], []>} : vector<24x32xf32>, vector<32x32xf32>, vector<24x32xf32> -> vector<24x32xf32>
    %328 = vector.extract_strided_slice %325 {offsets = [32, 0], sizes = [32, 32], strides = [1, 1]} : vector<64x32xf32> to vector<32x32xf32>
    %cst_153 = arith.constant dense<0.000000e+00> : vector<24x32xf32>
    %329 = tpu.matmul %323, %328, %cst_153 {dimension_numbers = #tpu.dot_dimension_numbers<[1], [0], [0], [1], [0, 0, 1, 1], [], []>} : vector<24x32xf32>, vector<32x32xf32>, vector<24x32xf32> -> vector<24x32xf32>
    %330 = arith.addf %327, %329 : vector<24x32xf32>
    %c0_154 = arith.constant 0 : index
    %c0_155 = arith.constant 0 : index
    %331 = vector.load %arg31[%c0_154, %c0_155] : memref<1x32xf32, #tpu.memory_space<vmem>>, vector<1x32xf32>
    %332 = vector.broadcast %331 : vector<1x32xf32> to vector<24x32xf32>
    %333 = arith.addf %330, %332 : vector<24x32xf32>
    %c0_156 = arith.constant 0 : index
    %c0_157 = arith.constant 0 : index
    %334 = vector.load %arg32[%c0_156, %c0_157] : memref<1x32xf32, #tpu.memory_space<vmem>>, vector<1x32xf32>
    %335 = vector.broadcast %334 : vector<1x32xf32> to vector<24x32xf32>
    %336 = arith.mulf %333, %335 : vector<24x32xf32>
    %cst_158 = arith.constant dense<0.000000e+00> : vector<24xf32>
    %337 = vector.multi_reduction <add>, %336, %cst_158 [1] : vector<24x32xf32> to vector<24xf32>
    %338 = vector.shape_cast %337 : vector<24xf32> to vector<24x1xf32>
    %c0_159 = arith.constant 0 : index
    %c0_160 = arith.constant 0 : index
    %339 = vector.load %arg33[%c0_159, %c0_160] : memref<1x1xf32, #tpu.memory_space<vmem>>, vector<1x1xf32>
    %340 = vector.broadcast %339 : vector<1x1xf32> to vector<24x1xf32>
    %341 = arith.addf %338, %340 : vector<24x1xf32>
    %cst_161 = arith.constant 0.000000e+00 : f32
    %342 = vector.broadcast %cst_161 : f32 to vector<24x1xf32>
    %343 = arith.cmpf ogt, %341, %342 : vector<24x1xf32>
    %cst_162 = arith.constant 2.000000e-01 : f32
    %344 = vector.broadcast %cst_162 : f32 to vector<24x1xf32>
    %345 = arith.mulf %344, %341 : vector<24x1xf32>
    %346 = arith.select %343, %341, %345 : vector<24x1xi1>, vector<24x1xf32>
    %347 = vector.broadcast %346 : vector<24x1xf32> to vector<24x8xf32>
    %348 = arith.mulf %347, %3 : vector<24x8xf32>
    %cst_163 = arith.constant dense<0.000000e+00> : vector<8x8xf32>
    %349 = tpu.matmul %2, %348, %cst_163 {dimension_numbers = #tpu.dot_dimension_numbers<[0], [0], [1], [1], [0, 1, 1, 1], [], []>} : vector<24x8xf32>, vector<24x8xf32>, vector<8x8xf32> -> vector<8x8xf32>
    %cst_164 = arith.constant 0.000000e+00 : f32
    %350 = vector.broadcast %cst_164 : f32 to vector<8x8xf32>
    %351 = arith.cmpf ogt, %5, %350 : vector<8x8xf32>
    %cst_165 = arith.constant -9.99999986E+14 : f32
    %352 = vector.broadcast %cst_165 : f32 to vector<8x8xf32>
    %353 = arith.select %351, %349, %352 : vector<8x8xi1>, vector<8x8xf32>
    %354 = tpu.iota {dimensions = array<i32: 0>} : vector<8x8xi32>
    %cst_166 = arith.constant dense<0xFF800000> : vector<8xf32>
    %355 = vector.multi_reduction <maximumf>, %353, %cst_166 [0] : vector<8x8xf32> to vector<8xf32>
    %356 = vector.shape_cast %355 : vector<8xf32> to vector<1x8xf32>
    %357 = vector.broadcast %356 : vector<1x8xf32> to vector<8x8xf32>
    %358 = arith.cmpf oeq, %353, %357 : vector<8x8xf32>
    %c8_i32_167 = arith.constant 8 : i32
    %359 = vector.broadcast %c8_i32_167 : i32 to vector<8x8xi32>
    %360 = arith.select %358, %354, %359 : vector<8x8xi1>, vector<8x8xi32>
    %cst_168 = arith.constant dense<2147483647> : vector<8xi32>
    %361 = vector.multi_reduction <minsi>, %360, %cst_168 [0] : vector<8x8xi32> to vector<8xi32>
    %362 = vector.shape_cast %361 : vector<8xi32> to vector<1x8xi32>
    %363 = vector.broadcast %362 : vector<1x8xi32> to vector<8x8xi32>
    %364 = arith.cmpi eq, %354, %363 : vector<8x8xi32>
    %cst_169 = arith.constant -9.99999986E+14 : f32
    %365 = vector.broadcast %cst_169 : f32 to vector<8x8xf32>
    %366 = arith.select %364, %365, %353 : vector<8x8xi1>, vector<8x8xf32>
    %cst_170 = arith.constant dense<0xFF800000> : vector<8xf32>
    %367 = vector.multi_reduction <maximumf>, %366, %cst_170 [0] : vector<8x8xf32> to vector<8xf32>
    %368 = vector.shape_cast %367 : vector<8xf32> to vector<1x8xf32>
    %369 = vector.broadcast %368 : vector<1x8xf32> to vector<8x8xf32>
    %370 = arith.cmpf oeq, %366, %369 : vector<8x8xf32>
    %c8_i32_171 = arith.constant 8 : i32
    %371 = vector.broadcast %c8_i32_171 : i32 to vector<8x8xi32>
    %372 = arith.select %370, %354, %371 : vector<8x8xi1>, vector<8x8xi32>
    %cst_172 = arith.constant dense<2147483647> : vector<8xi32>
    %373 = vector.multi_reduction <minsi>, %372, %cst_172 [0] : vector<8x8xi32> to vector<8xi32>
    %374 = vector.shape_cast %373 : vector<8xi32> to vector<1x8xi32>
    %375 = vector.broadcast %374 : vector<1x8xi32> to vector<8x8xi32>
    %376 = arith.cmpi eq, %354, %375 : vector<8x8xi32>
    %cst_173 = arith.constant -9.99999986E+14 : f32
    %377 = vector.broadcast %cst_173 : f32 to vector<8x8xf32>
    %378 = arith.select %376, %377, %366 : vector<8x8xi1>, vector<8x8xf32>
    %cst_174 = arith.constant dense<0xFF800000> : vector<8xf32>
    %379 = vector.multi_reduction <maximumf>, %378, %cst_174 [0] : vector<8x8xf32> to vector<8xf32>
    %380 = vector.shape_cast %379 : vector<8xf32> to vector<1x8xf32>
    %381 = vector.broadcast %380 : vector<1x8xf32> to vector<8x8xf32>
    %382 = arith.cmpf ole, %353, %381 : vector<8x8xf32>
    %cst_175 = arith.constant -9.99999986E+14 : f32
    %383 = vector.broadcast %cst_175 : f32 to vector<8x8xf32>
    %384 = arith.select %382, %383, %353 : vector<8x8xi1>, vector<8x8xf32>
    %cst_176 = arith.constant dense<0.000000e+00> : vector<24x8xf32>
    %385 = tpu.matmul %2, %384, %cst_176 {dimension_numbers = #tpu.dot_dimension_numbers<[1], [0], [0], [1], [0, 0, 1, 1], [], []>} : vector<24x8xf32>, vector<8x8xf32>, vector<24x8xf32> -> vector<24x8xf32>
    %386 = arith.mulf %385, %3 : vector<24x8xf32>
    %cst_177 = arith.constant dense<0.000000e+00> : vector<24xf32>
    %387 = vector.multi_reduction <add>, %386, %cst_177 [1] : vector<24x8xf32> to vector<24xf32>
    %388 = vector.shape_cast %387 : vector<24xf32> to vector<24x1xf32>
    %cst_178 = arith.constant 0.000000e+00 : f32
    %389 = vector.broadcast %cst_178 : f32 to vector<24x8xf32>
    %390 = arith.cmpf ogt, %3, %389 : vector<24x8xf32>
    %cst_179 = arith.constant -1.000000e+30 : f32
    %391 = vector.shape_cast %388 : vector<24x1xf32> to vector<24x1xf32>
    %392 = vector.broadcast %391 : vector<24x1xf32> to vector<24x8xf32>
    %393 = vector.broadcast %cst_179 : f32 to vector<24x8xf32>
    %394 = arith.select %390, %392, %393 : vector<24x8xi1>, vector<24x8xf32>
    %cst_180 = arith.constant dense<0xFF800000> : vector<8xf32>
    %395 = vector.multi_reduction <maximumf>, %394, %cst_180 [0] : vector<24x8xf32> to vector<8xf32>
    %396 = vector.shape_cast %395 : vector<8xf32> to vector<1x8xf32>
    %397 = vector.broadcast %396 : vector<1x8xf32> to vector<24x8xf32>
    %398 = arith.mulf %3, %397 : vector<24x8xf32>
    %cst_181 = arith.constant dense<0.000000e+00> : vector<24xf32>
    %399 = vector.multi_reduction <add>, %398, %cst_181 [1] : vector<24x8xf32> to vector<24xf32>
    %400 = vector.shape_cast %399 : vector<24xf32> to vector<24x1xf32>
    %401 = arith.subf %388, %400 : vector<24x1xf32>
    %402 = math.exp %401 : vector<24x1xf32>
    %403 = vector.broadcast %402 : vector<24x1xf32> to vector<24x8xf32>
    %404 = arith.mulf %3, %403 : vector<24x8xf32>
    %cst_182 = arith.constant dense<0.000000e+00> : vector<8xf32>
    %405 = vector.multi_reduction <add>, %404, %cst_182 [0] : vector<24x8xf32> to vector<8xf32>
    %406 = vector.shape_cast %405 : vector<8xf32> to vector<1x8xf32>
    %407 = vector.broadcast %406 : vector<1x8xf32> to vector<24x8xf32>
    %408 = arith.mulf %3, %407 : vector<24x8xf32>
    %cst_183 = arith.constant dense<0.000000e+00> : vector<24xf32>
    %409 = vector.multi_reduction <add>, %408, %cst_183 [1] : vector<24x8xf32> to vector<24xf32>
    %410 = vector.shape_cast %409 : vector<24xf32> to vector<24x1xf32>
    %cst_184 = arith.constant 1.000000e-16 : f32
    %411 = vector.broadcast %cst_184 : f32 to vector<24x1xf32>
    %412 = arith.addf %410, %411 : vector<24x1xf32>
    %413 = arith.divf %402, %412 : vector<24x1xf32>
    %414 = vector.broadcast %413 : vector<24x1xf32> to vector<24x32xf32>
    %415 = arith.mulf %414, %333 : vector<24x32xf32>
    %cst_185 = arith.constant dense<0.000000e+00> : vector<8x32xf32>
    %416 = tpu.matmul %0, %231, %cst_185 {dimension_numbers = #tpu.dot_dimension_numbers<[0], [0], [1], [1], [0, 1, 1, 1], [], []>} : vector<12x8xf32>, vector<12x32xf32>, vector<8x32xf32> -> vector<8x32xf32>
    %cst_186 = arith.constant dense<0.000000e+00> : vector<8x32xf32>
    %417 = tpu.matmul %1, %322, %cst_186 {dimension_numbers = #tpu.dot_dimension_numbers<[0], [0], [1], [1], [0, 1, 1, 1], [], []>} : vector<12x8xf32>, vector<12x32xf32>, vector<8x32xf32> -> vector<8x32xf32>
    %cst_187 = arith.constant dense<0.000000e+00> : vector<8x32xf32>
    %418 = tpu.matmul %3, %415, %cst_187 {dimension_numbers = #tpu.dot_dimension_numbers<[0], [0], [1], [1], [0, 1, 1, 1], [], []>} : vector<24x8xf32>, vector<24x32xf32>, vector<8x32xf32> -> vector<8x32xf32>
    %cst_188 = arith.constant 3.000000e+00 : f32
    %419 = vector.broadcast %cst_188 : f32 to vector<8x32xf32>
    %420 = arith.mulf %419, %20 : vector<8x32xf32>
    %421 = arith.addf %420, %416 : vector<8x32xf32>
    %422 = arith.addf %421, %417 : vector<8x32xf32>
    %423 = arith.addf %422, %418 : vector<8x32xf32>
    %cst_189 = arith.constant 3.000000e+00 : f32
    %424 = vector.broadcast %cst_189 : f32 to vector<8x32xf32>
    %425 = arith.divf %423, %424 : vector<8x32xf32>
    %cst_190 = arith.constant 0.000000e+00 : f32
    %426 = vector.broadcast %cst_190 : f32 to vector<8x32xf32>
    %427 = arith.cmpf ogt, %425, %426 : vector<8x32xf32>
    %cst_191 = arith.constant 0.000000e+00 : f32
    %428 = vector.broadcast %cst_191 : f32 to vector<8x32xf32>
    %429 = arith.minimumf %425, %428 : vector<8x32xf32>
    %430 = math.exp %429 : vector<8x32xf32>
    %cst_192 = arith.constant 1.000000e+00 : f32
    %431 = vector.broadcast %cst_192 : f32 to vector<8x32xf32>
    %432 = arith.subf %430, %431 : vector<8x32xf32>
    %433 = arith.select %427, %425, %432 : vector<8x32xi1>, vector<8x32xf32>
    %cst_193 = arith.constant 0.000000e+00 : f32
    %434 = vector.broadcast %cst_193 : f32 to vector<12x32xf32>
    %435 = arith.cmpf ogt, %140, %434 : vector<12x32xf32>
    %cst_194 = arith.constant 0.000000e+00 : f32
    %436 = vector.broadcast %cst_194 : f32 to vector<12x32xf32>
    %437 = arith.minimumf %140, %436 : vector<12x32xf32>
    %438 = math.exp %437 : vector<12x32xf32>
    %cst_195 = arith.constant 1.000000e+00 : f32
    %439 = vector.broadcast %cst_195 : f32 to vector<12x32xf32>
    %440 = arith.subf %438, %439 : vector<12x32xf32>
    %441 = arith.select %435, %140, %440 : vector<12x32xi1>, vector<12x32xf32>
    %c0_196 = arith.constant 0 : index
    %c0_197 = arith.constant 0 : index
    %442 = vector.load %arg34[%c0_196, %c0_197] : memref<32x9xf32, #tpu.memory_space<vmem>>, vector<32x9xf32>
    %cst_198 = arith.constant dense<0.000000e+00> : vector<8x9xf32>
    %443 = tpu.matmul %433, %442, %cst_198 {dimension_numbers = #tpu.dot_dimension_numbers<[1], [0], [0], [1], [0, 0, 1, 1], [], []>} : vector<8x32xf32>, vector<32x9xf32>, vector<8x9xf32> -> vector<8x9xf32>
    %c0_199 = arith.constant 0 : index
    %c0_200 = arith.constant 0 : index
    %444 = vector.load %arg35[%c0_199, %c0_200] : memref<1x9xf32, #tpu.memory_space<vmem>>, vector<1x9xf32>
    %445 = vector.broadcast %444 : vector<1x9xf32> to vector<8x9xf32>
    %446 = arith.addf %443, %445 : vector<8x9xf32>
    %c0_201 = arith.constant 0 : index
    %c0_202 = arith.constant 0 : index
    %447 = vector.load %arg36[%c0_201, %c0_202] : memref<32x11xf32, #tpu.memory_space<vmem>>, vector<32x11xf32>
    %cst_203 = arith.constant dense<0.000000e+00> : vector<12x11xf32>
    %448 = tpu.matmul %441, %447, %cst_203 {dimension_numbers = #tpu.dot_dimension_numbers<[1], [0], [0], [1], [0, 0, 1, 1], [], []>} : vector<12x32xf32>, vector<32x11xf32>, vector<12x11xf32> -> vector<12x11xf32>
    %c0_204 = arith.constant 0 : index
    %c0_205 = arith.constant 0 : index
    %449 = vector.load %arg37[%c0_204, %c0_205] : memref<1x11xf32, #tpu.memory_space<vmem>>, vector<1x11xf32>
    %450 = vector.broadcast %449 : vector<1x11xf32> to vector<12x11xf32>
    %451 = arith.addf %448, %450 : vector<12x11xf32>
    %cst_206 = arith.constant dense<0.000000e+00> : vector<12x9xf32>
    %452 = tpu.matmul %0, %446, %cst_206 {dimension_numbers = #tpu.dot_dimension_numbers<[1], [0], [0], [1], [0, 0, 1, 1], [], []>} : vector<12x8xf32>, vector<8x9xf32>, vector<12x9xf32> -> vector<12x9xf32>
    %cst_207 = arith.constant dense<0.000000e+00> : vector<12x9xf32>
    %453 = tpu.matmul %1, %446, %cst_207 {dimension_numbers = #tpu.dot_dimension_numbers<[1], [0], [0], [1], [0, 0, 1, 1], [], []>} : vector<12x8xf32>, vector<8x9xf32>, vector<12x9xf32> -> vector<12x9xf32>
    %c0_208 = arith.constant 0 : index
    %c0_209 = arith.constant 0 : index
    %454 = vector.load %arg38[%c0_208, %c0_209] : memref<18x11xf32, #tpu.memory_space<vmem>>, vector<18x11xf32>
    %455 = vector.extract_strided_slice %454 {offsets = [0, 0], sizes = [9, 11], strides = [1, 1]} : vector<18x11xf32> to vector<9x11xf32>
    %cst_210 = arith.constant dense<0.000000e+00> : vector<12x11xf32>
    %456 = tpu.matmul %453, %455, %cst_210 {dimension_numbers = #tpu.dot_dimension_numbers<[1], [0], [0], [1], [0, 0, 1, 1], [], []>} : vector<12x9xf32>, vector<9x11xf32>, vector<12x11xf32> -> vector<12x11xf32>
    %457 = vector.extract_strided_slice %454 {offsets = [9, 0], sizes = [9, 11], strides = [1, 1]} : vector<18x11xf32> to vector<9x11xf32>
    %cst_211 = arith.constant dense<0.000000e+00> : vector<12x11xf32>
    %458 = tpu.matmul %452, %457, %cst_211 {dimension_numbers = #tpu.dot_dimension_numbers<[1], [0], [0], [1], [0, 0, 1, 1], [], []>} : vector<12x9xf32>, vector<9x11xf32>, vector<12x11xf32> -> vector<12x11xf32>
    %459 = arith.addf %456, %458 : vector<12x11xf32>
    %c0_212 = arith.constant 0 : index
    %c0_213 = arith.constant 0 : index
    %460 = vector.load %arg39[%c0_212, %c0_213] : memref<1x11xf32, #tpu.memory_space<vmem>>, vector<1x11xf32>
    %461 = vector.broadcast %460 : vector<1x11xf32> to vector<12x11xf32>
    %462 = arith.addf %459, %461 : vector<12x11xf32>
    %c0_214 = arith.constant 0 : index
    %c0_215 = arith.constant 0 : index
    %463 = vector.load %arg40[%c0_214, %c0_215] : memref<1x11xf32, #tpu.memory_space<vmem>>, vector<1x11xf32>
    %464 = vector.broadcast %463 : vector<1x11xf32> to vector<12x11xf32>
    %465 = arith.mulf %462, %464 : vector<12x11xf32>
    %cst_216 = arith.constant dense<0.000000e+00> : vector<12xf32>
    %466 = vector.multi_reduction <add>, %465, %cst_216 [1] : vector<12x11xf32> to vector<12xf32>
    %467 = vector.shape_cast %466 : vector<12xf32> to vector<12x1xf32>
    %c0_217 = arith.constant 0 : index
    %c0_218 = arith.constant 0 : index
    %468 = vector.load %arg41[%c0_217, %c0_218] : memref<1x1xf32, #tpu.memory_space<vmem>>, vector<1x1xf32>
    %469 = vector.broadcast %468 : vector<1x1xf32> to vector<12x1xf32>
    %470 = arith.addf %467, %469 : vector<12x1xf32>
    %cst_219 = arith.constant 0.000000e+00 : f32
    %471 = vector.broadcast %cst_219 : f32 to vector<12x1xf32>
    %472 = arith.cmpf ogt, %470, %471 : vector<12x1xf32>
    %cst_220 = arith.constant 2.000000e-01 : f32
    %473 = vector.broadcast %cst_220 : f32 to vector<12x1xf32>
    %474 = arith.mulf %473, %470 : vector<12x1xf32>
    %475 = arith.select %472, %470, %474 : vector<12x1xi1>, vector<12x1xf32>
    %cst_221 = arith.constant 0.000000e+00 : f32
    %476 = vector.broadcast %cst_221 : f32 to vector<12x8xf32>
    %477 = arith.cmpf ogt, %1, %476 : vector<12x8xf32>
    %cst_222 = arith.constant -1.000000e+30 : f32
    %478 = vector.shape_cast %475 : vector<12x1xf32> to vector<12x1xf32>
    %479 = vector.broadcast %478 : vector<12x1xf32> to vector<12x8xf32>
    %480 = vector.broadcast %cst_222 : f32 to vector<12x8xf32>
    %481 = arith.select %477, %479, %480 : vector<12x8xi1>, vector<12x8xf32>
    %cst_223 = arith.constant dense<0xFF800000> : vector<8xf32>
    %482 = vector.multi_reduction <maximumf>, %481, %cst_223 [0] : vector<12x8xf32> to vector<8xf32>
    %483 = vector.shape_cast %482 : vector<8xf32> to vector<1x8xf32>
    %484 = vector.broadcast %483 : vector<1x8xf32> to vector<12x8xf32>
    %485 = arith.mulf %1, %484 : vector<12x8xf32>
    %cst_224 = arith.constant dense<0.000000e+00> : vector<12xf32>
    %486 = vector.multi_reduction <add>, %485, %cst_224 [1] : vector<12x8xf32> to vector<12xf32>
    %487 = vector.shape_cast %486 : vector<12xf32> to vector<12x1xf32>
    %488 = arith.subf %475, %487 : vector<12x1xf32>
    %489 = math.exp %488 : vector<12x1xf32>
    %490 = vector.broadcast %489 : vector<12x1xf32> to vector<12x8xf32>
    %491 = arith.mulf %1, %490 : vector<12x8xf32>
    %cst_225 = arith.constant dense<0.000000e+00> : vector<8xf32>
    %492 = vector.multi_reduction <add>, %491, %cst_225 [0] : vector<12x8xf32> to vector<8xf32>
    %493 = vector.shape_cast %492 : vector<8xf32> to vector<1x8xf32>
    %494 = vector.broadcast %493 : vector<1x8xf32> to vector<12x8xf32>
    %495 = arith.mulf %1, %494 : vector<12x8xf32>
    %cst_226 = arith.constant dense<0.000000e+00> : vector<12xf32>
    %496 = vector.multi_reduction <add>, %495, %cst_226 [1] : vector<12x8xf32> to vector<12xf32>
    %497 = vector.shape_cast %496 : vector<12xf32> to vector<12x1xf32>
    %cst_227 = arith.constant 1.000000e-16 : f32
    %498 = vector.broadcast %cst_227 : f32 to vector<12x1xf32>
    %499 = arith.addf %497, %498 : vector<12x1xf32>
    %500 = arith.divf %489, %499 : vector<12x1xf32>
    %501 = vector.broadcast %500 : vector<12x1xf32> to vector<12x11xf32>
    %502 = arith.mulf %501, %462 : vector<12x11xf32>
    %503 = arith.addf %451, %502 : vector<12x11xf32>
    %c0_228 = arith.constant 0 : index
    %c0_229 = arith.constant 0 : index
    %504 = vector.load %arg42[%c0_228, %c0_229] : memref<18x11xf32, #tpu.memory_space<vmem>>, vector<18x11xf32>
    %505 = vector.extract_strided_slice %504 {offsets = [0, 0], sizes = [9, 11], strides = [1, 1]} : vector<18x11xf32> to vector<9x11xf32>
    %cst_230 = arith.constant dense<0.000000e+00> : vector<12x11xf32>
    %506 = tpu.matmul %452, %505, %cst_230 {dimension_numbers = #tpu.dot_dimension_numbers<[1], [0], [0], [1], [0, 0, 1, 1], [], []>} : vector<12x9xf32>, vector<9x11xf32>, vector<12x11xf32> -> vector<12x11xf32>
    %507 = vector.extract_strided_slice %504 {offsets = [9, 0], sizes = [9, 11], strides = [1, 1]} : vector<18x11xf32> to vector<9x11xf32>
    %cst_231 = arith.constant dense<0.000000e+00> : vector<12x11xf32>
    %508 = tpu.matmul %453, %507, %cst_231 {dimension_numbers = #tpu.dot_dimension_numbers<[1], [0], [0], [1], [0, 0, 1, 1], [], []>} : vector<12x9xf32>, vector<9x11xf32>, vector<12x11xf32> -> vector<12x11xf32>
    %509 = arith.addf %506, %508 : vector<12x11xf32>
    %c0_232 = arith.constant 0 : index
    %c0_233 = arith.constant 0 : index
    %510 = vector.load %arg43[%c0_232, %c0_233] : memref<1x11xf32, #tpu.memory_space<vmem>>, vector<1x11xf32>
    %511 = vector.broadcast %510 : vector<1x11xf32> to vector<12x11xf32>
    %512 = arith.addf %509, %511 : vector<12x11xf32>
    %c0_234 = arith.constant 0 : index
    %c0_235 = arith.constant 0 : index
    %513 = vector.load %arg44[%c0_234, %c0_235] : memref<1x11xf32, #tpu.memory_space<vmem>>, vector<1x11xf32>
    %514 = vector.broadcast %513 : vector<1x11xf32> to vector<12x11xf32>
    %515 = arith.mulf %512, %514 : vector<12x11xf32>
    %cst_236 = arith.constant dense<0.000000e+00> : vector<12xf32>
    %516 = vector.multi_reduction <add>, %515, %cst_236 [1] : vector<12x11xf32> to vector<12xf32>
    %517 = vector.shape_cast %516 : vector<12xf32> to vector<12x1xf32>
    %c0_237 = arith.constant 0 : index
    %c0_238 = arith.constant 0 : index
    %518 = vector.load %arg45[%c0_237, %c0_238] : memref<1x1xf32, #tpu.memory_space<vmem>>, vector<1x1xf32>
    %519 = vector.broadcast %518 : vector<1x1xf32> to vector<12x1xf32>
    %520 = arith.addf %517, %519 : vector<12x1xf32>
    %cst_239 = arith.constant 0.000000e+00 : f32
    %521 = vector.broadcast %cst_239 : f32 to vector<12x1xf32>
    %522 = arith.cmpf ogt, %520, %521 : vector<12x1xf32>
    %cst_240 = arith.constant 2.000000e-01 : f32
    %523 = vector.broadcast %cst_240 : f32 to vector<12x1xf32>
    %524 = arith.mulf %523, %520 : vector<12x1xf32>
    %525 = arith.select %522, %520, %524 : vector<12x1xi1>, vector<12x1xf32>
    %cst_241 = arith.constant 0.000000e+00 : f32
    %526 = vector.broadcast %cst_241 : f32 to vector<12x8xf32>
    %527 = arith.cmpf ogt, %0, %526 : vector<12x8xf32>
    %cst_242 = arith.constant -1.000000e+30 : f32
    %528 = vector.shape_cast %525 : vector<12x1xf32> to vector<12x1xf32>
    %529 = vector.broadcast %528 : vector<12x1xf32> to vector<12x8xf32>
    %530 = vector.broadcast %cst_242 : f32 to vector<12x8xf32>
    %531 = arith.select %527, %529, %530 : vector<12x8xi1>, vector<12x8xf32>
    %cst_243 = arith.constant dense<0xFF800000> : vector<8xf32>
    %532 = vector.multi_reduction <maximumf>, %531, %cst_243 [0] : vector<12x8xf32> to vector<8xf32>
    %533 = vector.shape_cast %532 : vector<8xf32> to vector<1x8xf32>
    %534 = vector.broadcast %533 : vector<1x8xf32> to vector<12x8xf32>
    %535 = arith.mulf %0, %534 : vector<12x8xf32>
    %cst_244 = arith.constant dense<0.000000e+00> : vector<12xf32>
    %536 = vector.multi_reduction <add>, %535, %cst_244 [1] : vector<12x8xf32> to vector<12xf32>
    %537 = vector.shape_cast %536 : vector<12xf32> to vector<12x1xf32>
    %538 = arith.subf %525, %537 : vector<12x1xf32>
    %539 = math.exp %538 : vector<12x1xf32>
    %540 = vector.broadcast %539 : vector<12x1xf32> to vector<12x8xf32>
    %541 = arith.mulf %0, %540 : vector<12x8xf32>
    %cst_245 = arith.constant dense<0.000000e+00> : vector<8xf32>
    %542 = vector.multi_reduction <add>, %541, %cst_245 [0] : vector<12x8xf32> to vector<8xf32>
    %543 = vector.shape_cast %542 : vector<8xf32> to vector<1x8xf32>
    %544 = vector.broadcast %543 : vector<1x8xf32> to vector<12x8xf32>
    %545 = arith.mulf %0, %544 : vector<12x8xf32>
    %cst_246 = arith.constant dense<0.000000e+00> : vector<12xf32>
    %546 = vector.multi_reduction <add>, %545, %cst_246 [1] : vector<12x8xf32> to vector<12xf32>
    %547 = vector.shape_cast %546 : vector<12xf32> to vector<12x1xf32>
    %cst_247 = arith.constant 1.000000e-16 : f32
    %548 = vector.broadcast %cst_247 : f32 to vector<12x1xf32>
    %549 = arith.addf %547, %548 : vector<12x1xf32>
    %550 = arith.divf %539, %549 : vector<12x1xf32>
    %551 = vector.broadcast %550 : vector<12x1xf32> to vector<12x11xf32>
    %552 = arith.mulf %551, %512 : vector<12x11xf32>
    %553 = arith.addf %451, %552 : vector<12x11xf32>
    %554 = arith.addf %503, %553 : vector<12x11xf32>
    %cst_248 = arith.constant 5.000000e-01 : f32
    %555 = vector.broadcast %cst_248 : f32 to vector<12x11xf32>
    %556 = arith.mulf %554, %555 : vector<12x11xf32>
    %c0_249 = arith.constant 0 : index
    %c0_250 = arith.constant 0 : index
    %557 = vector.load %arg46[%c0_249, %c0_250] : memref<20x9xf32, #tpu.memory_space<vmem>>, vector<20x9xf32>
    %558 = vector.extract_strided_slice %557 {offsets = [0, 0], sizes = [9, 9], strides = [1, 1]} : vector<20x9xf32> to vector<9x9xf32>
    %cst_251 = arith.constant dense<0.000000e+00> : vector<12x9xf32>
    %559 = tpu.matmul %452, %558, %cst_251 {dimension_numbers = #tpu.dot_dimension_numbers<[1], [0], [0], [1], [0, 0, 1, 1], [], []>} : vector<12x9xf32>, vector<9x9xf32>, vector<12x9xf32> -> vector<12x9xf32>
    %560 = vector.extract_strided_slice %557 {offsets = [9, 0], sizes = [11, 9], strides = [1, 1]} : vector<20x9xf32> to vector<11x9xf32>
    %cst_252 = arith.constant dense<0.000000e+00> : vector<12x9xf32>
    %561 = tpu.matmul %556, %560, %cst_252 {dimension_numbers = #tpu.dot_dimension_numbers<[1], [0], [0], [1], [0, 0, 1, 1], [], []>} : vector<12x11xf32>, vector<11x9xf32>, vector<12x9xf32> -> vector<12x9xf32>
    %562 = arith.addf %559, %561 : vector<12x9xf32>
    %c0_253 = arith.constant 0 : index
    %c0_254 = arith.constant 0 : index
    %563 = vector.load %arg47[%c0_253, %c0_254] : memref<1x9xf32, #tpu.memory_space<vmem>>, vector<1x9xf32>
    %564 = vector.broadcast %563 : vector<1x9xf32> to vector<12x9xf32>
    %565 = arith.addf %562, %564 : vector<12x9xf32>
    %c0_255 = arith.constant 0 : index
    %c0_256 = arith.constant 0 : index
    %566 = vector.load %arg48[%c0_255, %c0_256] : memref<1x9xf32, #tpu.memory_space<vmem>>, vector<1x9xf32>
    %567 = vector.broadcast %566 : vector<1x9xf32> to vector<12x9xf32>
    %568 = arith.mulf %565, %567 : vector<12x9xf32>
    %cst_257 = arith.constant dense<0.000000e+00> : vector<12xf32>
    %569 = vector.multi_reduction <add>, %568, %cst_257 [1] : vector<12x9xf32> to vector<12xf32>
    %570 = vector.shape_cast %569 : vector<12xf32> to vector<12x1xf32>
    %c0_258 = arith.constant 0 : index
    %c0_259 = arith.constant 0 : index
    %571 = vector.load %arg49[%c0_258, %c0_259] : memref<1x1xf32, #tpu.memory_space<vmem>>, vector<1x1xf32>
    %572 = vector.broadcast %571 : vector<1x1xf32> to vector<12x1xf32>
    %573 = arith.addf %570, %572 : vector<12x1xf32>
    %cst_260 = arith.constant 0.000000e+00 : f32
    %574 = vector.broadcast %cst_260 : f32 to vector<12x1xf32>
    %575 = arith.cmpf ogt, %573, %574 : vector<12x1xf32>
    %cst_261 = arith.constant 2.000000e-01 : f32
    %576 = vector.broadcast %cst_261 : f32 to vector<12x1xf32>
    %577 = arith.mulf %576, %573 : vector<12x1xf32>
    %578 = arith.select %575, %573, %577 : vector<12x1xi1>, vector<12x1xf32>
    %579 = vector.broadcast %578 : vector<12x1xf32> to vector<12x8xf32>
    %580 = arith.mulf %579, %1 : vector<12x8xf32>
    %cst_262 = arith.constant dense<0.000000e+00> : vector<8x8xf32>
    %581 = tpu.matmul %0, %580, %cst_262 {dimension_numbers = #tpu.dot_dimension_numbers<[0], [0], [1], [1], [0, 1, 1, 1], [], []>} : vector<12x8xf32>, vector<12x8xf32>, vector<8x8xf32> -> vector<8x8xf32>
    %cst_263 = arith.constant 0.000000e+00 : f32
    %582 = vector.broadcast %cst_263 : f32 to vector<8x8xf32>
    %583 = arith.cmpf ogt, %4, %582 : vector<8x8xf32>
    %cst_264 = arith.constant -9.99999986E+14 : f32
    %584 = vector.broadcast %cst_264 : f32 to vector<8x8xf32>
    %585 = arith.select %583, %581, %584 : vector<8x8xi1>, vector<8x8xf32>
    %586 = tpu.iota {dimensions = array<i32: 1>} : vector<8x8xi32>
    %cst_265 = arith.constant dense<0xFF800000> : vector<8xf32>
    %587 = vector.multi_reduction <maximumf>, %585, %cst_265 [1] : vector<8x8xf32> to vector<8xf32>
    %588 = vector.shape_cast %587 : vector<8xf32> to vector<8x1xf32>
    %589 = vector.broadcast %588 : vector<8x1xf32> to vector<8x8xf32>
    %590 = arith.cmpf oeq, %585, %589 : vector<8x8xf32>
    %c8_i32_266 = arith.constant 8 : i32
    %591 = vector.broadcast %c8_i32_266 : i32 to vector<8x8xi32>
    %592 = arith.select %590, %586, %591 : vector<8x8xi1>, vector<8x8xi32>
    %cst_267 = arith.constant dense<2147483647> : vector<8xi32>
    %593 = vector.multi_reduction <minsi>, %592, %cst_267 [1] : vector<8x8xi32> to vector<8xi32>
    %594 = vector.shape_cast %593 : vector<8xi32> to vector<8x1xi32>
    %595 = vector.broadcast %594 : vector<8x1xi32> to vector<8x8xi32>
    %596 = arith.cmpi eq, %586, %595 : vector<8x8xi32>
    %cst_268 = arith.constant -9.99999986E+14 : f32
    %597 = vector.broadcast %cst_268 : f32 to vector<8x8xf32>
    %598 = arith.select %596, %597, %585 : vector<8x8xi1>, vector<8x8xf32>
    %cst_269 = arith.constant dense<0xFF800000> : vector<8xf32>
    %599 = vector.multi_reduction <maximumf>, %598, %cst_269 [1] : vector<8x8xf32> to vector<8xf32>
    %600 = vector.shape_cast %599 : vector<8xf32> to vector<8x1xf32>
    %601 = vector.broadcast %600 : vector<8x1xf32> to vector<8x8xf32>
    %602 = arith.cmpf oeq, %598, %601 : vector<8x8xf32>
    %c8_i32_270 = arith.constant 8 : i32
    %603 = vector.broadcast %c8_i32_270 : i32 to vector<8x8xi32>
    %604 = arith.select %602, %586, %603 : vector<8x8xi1>, vector<8x8xi32>
    %cst_271 = arith.constant dense<2147483647> : vector<8xi32>
    %605 = vector.multi_reduction <minsi>, %604, %cst_271 [1] : vector<8x8xi32> to vector<8xi32>
    %606 = vector.shape_cast %605 : vector<8xi32> to vector<8x1xi32>
    %607 = vector.broadcast %606 : vector<8x1xi32> to vector<8x8xi32>
    %608 = arith.cmpi eq, %586, %607 : vector<8x8xi32>
    %cst_272 = arith.constant -9.99999986E+14 : f32
    %609 = vector.broadcast %cst_272 : f32 to vector<8x8xf32>
    %610 = arith.select %608, %609, %598 : vector<8x8xi1>, vector<8x8xf32>
    %cst_273 = arith.constant dense<0xFF800000> : vector<8xf32>
    %611 = vector.multi_reduction <maximumf>, %610, %cst_273 [1] : vector<8x8xf32> to vector<8xf32>
    %612 = vector.shape_cast %611 : vector<8xf32> to vector<8x1xf32>
    %613 = vector.broadcast %612 : vector<8x1xf32> to vector<8x8xf32>
    %614 = arith.cmpf ole, %585, %613 : vector<8x8xf32>
    %cst_274 = arith.constant -9.99999986E+14 : f32
    %615 = vector.broadcast %cst_274 : f32 to vector<8x8xf32>
    %616 = arith.select %614, %615, %585 : vector<8x8xi1>, vector<8x8xf32>
    %cst_275 = arith.constant dense<0.000000e+00> : vector<12x8xf32>
    %617 = tpu.matmul %0, %616, %cst_275 {dimension_numbers = #tpu.dot_dimension_numbers<[1], [0], [0], [1], [0, 0, 1, 1], [], []>} : vector<12x8xf32>, vector<8x8xf32>, vector<12x8xf32> -> vector<12x8xf32>
    %618 = arith.mulf %617, %1 : vector<12x8xf32>
    %cst_276 = arith.constant dense<0.000000e+00> : vector<12xf32>
    %619 = vector.multi_reduction <add>, %618, %cst_276 [1] : vector<12x8xf32> to vector<12xf32>
    %620 = vector.shape_cast %619 : vector<12xf32> to vector<12x1xf32>
    %cst_277 = arith.constant 0.000000e+00 : f32
    %621 = vector.broadcast %cst_277 : f32 to vector<12x8xf32>
    %622 = arith.cmpf ogt, %0, %621 : vector<12x8xf32>
    %cst_278 = arith.constant -1.000000e+30 : f32
    %623 = vector.shape_cast %620 : vector<12x1xf32> to vector<12x1xf32>
    %624 = vector.broadcast %623 : vector<12x1xf32> to vector<12x8xf32>
    %625 = vector.broadcast %cst_278 : f32 to vector<12x8xf32>
    %626 = arith.select %622, %624, %625 : vector<12x8xi1>, vector<12x8xf32>
    %cst_279 = arith.constant dense<0xFF800000> : vector<8xf32>
    %627 = vector.multi_reduction <maximumf>, %626, %cst_279 [0] : vector<12x8xf32> to vector<8xf32>
    %628 = vector.shape_cast %627 : vector<8xf32> to vector<1x8xf32>
    %629 = vector.broadcast %628 : vector<1x8xf32> to vector<12x8xf32>
    %630 = arith.mulf %0, %629 : vector<12x8xf32>
    %cst_280 = arith.constant dense<0.000000e+00> : vector<12xf32>
    %631 = vector.multi_reduction <add>, %630, %cst_280 [1] : vector<12x8xf32> to vector<12xf32>
    %632 = vector.shape_cast %631 : vector<12xf32> to vector<12x1xf32>
    %633 = arith.subf %620, %632 : vector<12x1xf32>
    %634 = math.exp %633 : vector<12x1xf32>
    %635 = vector.broadcast %634 : vector<12x1xf32> to vector<12x8xf32>
    %636 = arith.mulf %0, %635 : vector<12x8xf32>
    %cst_281 = arith.constant dense<0.000000e+00> : vector<8xf32>
    %637 = vector.multi_reduction <add>, %636, %cst_281 [0] : vector<12x8xf32> to vector<8xf32>
    %638 = vector.shape_cast %637 : vector<8xf32> to vector<1x8xf32>
    %639 = vector.broadcast %638 : vector<1x8xf32> to vector<12x8xf32>
    %640 = arith.mulf %0, %639 : vector<12x8xf32>
    %cst_282 = arith.constant dense<0.000000e+00> : vector<12xf32>
    %641 = vector.multi_reduction <add>, %640, %cst_282 [1] : vector<12x8xf32> to vector<12xf32>
    %642 = vector.shape_cast %641 : vector<12xf32> to vector<12x1xf32>
    %cst_283 = arith.constant 1.000000e-16 : f32
    %643 = vector.broadcast %cst_283 : f32 to vector<12x1xf32>
    %644 = arith.addf %642, %643 : vector<12x1xf32>
    %645 = arith.divf %634, %644 : vector<12x1xf32>
    %646 = vector.broadcast %645 : vector<12x1xf32> to vector<12x9xf32>
    %647 = arith.mulf %646, %565 : vector<12x9xf32>
    %c0_284 = arith.constant 0 : index
    %c0_285 = arith.constant 0 : index
    %648 = vector.load %arg50[%c0_284, %c0_285] : memref<20x9xf32, #tpu.memory_space<vmem>>, vector<20x9xf32>
    %649 = vector.extract_strided_slice %648 {offsets = [0, 0], sizes = [9, 9], strides = [1, 1]} : vector<20x9xf32> to vector<9x9xf32>
    %cst_286 = arith.constant dense<0.000000e+00> : vector<12x9xf32>
    %650 = tpu.matmul %453, %649, %cst_286 {dimension_numbers = #tpu.dot_dimension_numbers<[1], [0], [0], [1], [0, 0, 1, 1], [], []>} : vector<12x9xf32>, vector<9x9xf32>, vector<12x9xf32> -> vector<12x9xf32>
    %651 = vector.extract_strided_slice %648 {offsets = [9, 0], sizes = [11, 9], strides = [1, 1]} : vector<20x9xf32> to vector<11x9xf32>
    %cst_287 = arith.constant dense<0.000000e+00> : vector<12x9xf32>
    %652 = tpu.matmul %556, %651, %cst_287 {dimension_numbers = #tpu.dot_dimension_numbers<[1], [0], [0], [1], [0, 0, 1, 1], [], []>} : vector<12x11xf32>, vector<11x9xf32>, vector<12x9xf32> -> vector<12x9xf32>
    %653 = arith.addf %650, %652 : vector<12x9xf32>
    %c0_288 = arith.constant 0 : index
    %c0_289 = arith.constant 0 : index
    %654 = vector.load %arg51[%c0_288, %c0_289] : memref<1x9xf32, #tpu.memory_space<vmem>>, vector<1x9xf32>
    %655 = vector.broadcast %654 : vector<1x9xf32> to vector<12x9xf32>
    %656 = arith.addf %653, %655 : vector<12x9xf32>
    %c0_290 = arith.constant 0 : index
    %c0_291 = arith.constant 0 : index
    %657 = vector.load %arg52[%c0_290, %c0_291] : memref<1x9xf32, #tpu.memory_space<vmem>>, vector<1x9xf32>
    %658 = vector.broadcast %657 : vector<1x9xf32> to vector<12x9xf32>
    %659 = arith.mulf %656, %658 : vector<12x9xf32>
    %cst_292 = arith.constant dense<0.000000e+00> : vector<12xf32>
    %660 = vector.multi_reduction <add>, %659, %cst_292 [1] : vector<12x9xf32> to vector<12xf32>
    %661 = vector.shape_cast %660 : vector<12xf32> to vector<12x1xf32>
    %c0_293 = arith.constant 0 : index
    %c0_294 = arith.constant 0 : index
    %662 = vector.load %arg53[%c0_293, %c0_294] : memref<1x1xf32, #tpu.memory_space<vmem>>, vector<1x1xf32>
    %663 = vector.broadcast %662 : vector<1x1xf32> to vector<12x1xf32>
    %664 = arith.addf %661, %663 : vector<12x1xf32>
    %cst_295 = arith.constant 0.000000e+00 : f32
    %665 = vector.broadcast %cst_295 : f32 to vector<12x1xf32>
    %666 = arith.cmpf ogt, %664, %665 : vector<12x1xf32>
    %cst_296 = arith.constant 2.000000e-01 : f32
    %667 = vector.broadcast %cst_296 : f32 to vector<12x1xf32>
    %668 = arith.mulf %667, %664 : vector<12x1xf32>
    %669 = arith.select %666, %664, %668 : vector<12x1xi1>, vector<12x1xf32>
    %670 = vector.broadcast %669 : vector<12x1xf32> to vector<12x8xf32>
    %671 = arith.mulf %670, %1 : vector<12x8xf32>
    %cst_297 = arith.constant dense<0.000000e+00> : vector<8x8xf32>
    %672 = tpu.matmul %0, %671, %cst_297 {dimension_numbers = #tpu.dot_dimension_numbers<[0], [0], [1], [1], [0, 1, 1, 1], [], []>} : vector<12x8xf32>, vector<12x8xf32>, vector<8x8xf32> -> vector<8x8xf32>
    %cst_298 = arith.constant 0.000000e+00 : f32
    %673 = vector.broadcast %cst_298 : f32 to vector<8x8xf32>
    %674 = arith.cmpf ogt, %4, %673 : vector<8x8xf32>
    %cst_299 = arith.constant -9.99999986E+14 : f32
    %675 = vector.broadcast %cst_299 : f32 to vector<8x8xf32>
    %676 = arith.select %674, %672, %675 : vector<8x8xi1>, vector<8x8xf32>
    %677 = tpu.iota {dimensions = array<i32: 0>} : vector<8x8xi32>
    %cst_300 = arith.constant dense<0xFF800000> : vector<8xf32>
    %678 = vector.multi_reduction <maximumf>, %676, %cst_300 [0] : vector<8x8xf32> to vector<8xf32>
    %679 = vector.shape_cast %678 : vector<8xf32> to vector<1x8xf32>
    %680 = vector.broadcast %679 : vector<1x8xf32> to vector<8x8xf32>
    %681 = arith.cmpf oeq, %676, %680 : vector<8x8xf32>
    %c8_i32_301 = arith.constant 8 : i32
    %682 = vector.broadcast %c8_i32_301 : i32 to vector<8x8xi32>
    %683 = arith.select %681, %677, %682 : vector<8x8xi1>, vector<8x8xi32>
    %cst_302 = arith.constant dense<2147483647> : vector<8xi32>
    %684 = vector.multi_reduction <minsi>, %683, %cst_302 [0] : vector<8x8xi32> to vector<8xi32>
    %685 = vector.shape_cast %684 : vector<8xi32> to vector<1x8xi32>
    %686 = vector.broadcast %685 : vector<1x8xi32> to vector<8x8xi32>
    %687 = arith.cmpi eq, %677, %686 : vector<8x8xi32>
    %cst_303 = arith.constant -9.99999986E+14 : f32
    %688 = vector.broadcast %cst_303 : f32 to vector<8x8xf32>
    %689 = arith.select %687, %688, %676 : vector<8x8xi1>, vector<8x8xf32>
    %cst_304 = arith.constant dense<0xFF800000> : vector<8xf32>
    %690 = vector.multi_reduction <maximumf>, %689, %cst_304 [0] : vector<8x8xf32> to vector<8xf32>
    %691 = vector.shape_cast %690 : vector<8xf32> to vector<1x8xf32>
    %692 = vector.broadcast %691 : vector<1x8xf32> to vector<8x8xf32>
    %693 = arith.cmpf oeq, %689, %692 : vector<8x8xf32>
    %c8_i32_305 = arith.constant 8 : i32
    %694 = vector.broadcast %c8_i32_305 : i32 to vector<8x8xi32>
    %695 = arith.select %693, %677, %694 : vector<8x8xi1>, vector<8x8xi32>
    %cst_306 = arith.constant dense<2147483647> : vector<8xi32>
    %696 = vector.multi_reduction <minsi>, %695, %cst_306 [0] : vector<8x8xi32> to vector<8xi32>
    %697 = vector.shape_cast %696 : vector<8xi32> to vector<1x8xi32>
    %698 = vector.broadcast %697 : vector<1x8xi32> to vector<8x8xi32>
    %699 = arith.cmpi eq, %677, %698 : vector<8x8xi32>
    %cst_307 = arith.constant -9.99999986E+14 : f32
    %700 = vector.broadcast %cst_307 : f32 to vector<8x8xf32>
    %701 = arith.select %699, %700, %689 : vector<8x8xi1>, vector<8x8xf32>
    %cst_308 = arith.constant dense<0xFF800000> : vector<8xf32>
    %702 = vector.multi_reduction <maximumf>, %701, %cst_308 [0] : vector<8x8xf32> to vector<8xf32>
    %703 = vector.shape_cast %702 : vector<8xf32> to vector<1x8xf32>
    %704 = vector.broadcast %703 : vector<1x8xf32> to vector<8x8xf32>
    %705 = arith.cmpf ole, %676, %704 : vector<8x8xf32>
    %cst_309 = arith.constant -9.99999986E+14 : f32
    %706 = vector.broadcast %cst_309 : f32 to vector<8x8xf32>
    %707 = arith.select %705, %706, %676 : vector<8x8xi1>, vector<8x8xf32>
    %cst_310 = arith.constant dense<0.000000e+00> : vector<12x8xf32>
    %708 = tpu.matmul %0, %707, %cst_310 {dimension_numbers = #tpu.dot_dimension_numbers<[1], [0], [0], [1], [0, 0, 1, 1], [], []>} : vector<12x8xf32>, vector<8x8xf32>, vector<12x8xf32> -> vector<12x8xf32>
    %709 = arith.mulf %708, %1 : vector<12x8xf32>
    %cst_311 = arith.constant dense<0.000000e+00> : vector<12xf32>
    %710 = vector.multi_reduction <add>, %709, %cst_311 [1] : vector<12x8xf32> to vector<12xf32>
    %711 = vector.shape_cast %710 : vector<12xf32> to vector<12x1xf32>
    %cst_312 = arith.constant 0.000000e+00 : f32
    %712 = vector.broadcast %cst_312 : f32 to vector<12x8xf32>
    %713 = arith.cmpf ogt, %1, %712 : vector<12x8xf32>
    %cst_313 = arith.constant -1.000000e+30 : f32
    %714 = vector.shape_cast %711 : vector<12x1xf32> to vector<12x1xf32>
    %715 = vector.broadcast %714 : vector<12x1xf32> to vector<12x8xf32>
    %716 = vector.broadcast %cst_313 : f32 to vector<12x8xf32>
    %717 = arith.select %713, %715, %716 : vector<12x8xi1>, vector<12x8xf32>
    %cst_314 = arith.constant dense<0xFF800000> : vector<8xf32>
    %718 = vector.multi_reduction <maximumf>, %717, %cst_314 [0] : vector<12x8xf32> to vector<8xf32>
    %719 = vector.shape_cast %718 : vector<8xf32> to vector<1x8xf32>
    %720 = vector.broadcast %719 : vector<1x8xf32> to vector<12x8xf32>
    %721 = arith.mulf %1, %720 : vector<12x8xf32>
    %cst_315 = arith.constant dense<0.000000e+00> : vector<12xf32>
    %722 = vector.multi_reduction <add>, %721, %cst_315 [1] : vector<12x8xf32> to vector<12xf32>
    %723 = vector.shape_cast %722 : vector<12xf32> to vector<12x1xf32>
    %724 = arith.subf %711, %723 : vector<12x1xf32>
    %725 = math.exp %724 : vector<12x1xf32>
    %726 = vector.broadcast %725 : vector<12x1xf32> to vector<12x8xf32>
    %727 = arith.mulf %1, %726 : vector<12x8xf32>
    %cst_316 = arith.constant dense<0.000000e+00> : vector<8xf32>
    %728 = vector.multi_reduction <add>, %727, %cst_316 [0] : vector<12x8xf32> to vector<8xf32>
    %729 = vector.shape_cast %728 : vector<8xf32> to vector<1x8xf32>
    %730 = vector.broadcast %729 : vector<1x8xf32> to vector<12x8xf32>
    %731 = arith.mulf %1, %730 : vector<12x8xf32>
    %cst_317 = arith.constant dense<0.000000e+00> : vector<12xf32>
    %732 = vector.multi_reduction <add>, %731, %cst_317 [1] : vector<12x8xf32> to vector<12xf32>
    %733 = vector.shape_cast %732 : vector<12xf32> to vector<12x1xf32>
    %cst_318 = arith.constant 1.000000e-16 : f32
    %734 = vector.broadcast %cst_318 : f32 to vector<12x1xf32>
    %735 = arith.addf %733, %734 : vector<12x1xf32>
    %736 = arith.divf %725, %735 : vector<12x1xf32>
    %737 = vector.broadcast %736 : vector<12x1xf32> to vector<12x9xf32>
    %738 = arith.mulf %737, %656 : vector<12x9xf32>
    %cst_319 = arith.constant dense<0.000000e+00> : vector<24x9xf32>
    %739 = tpu.matmul %2, %446, %cst_319 {dimension_numbers = #tpu.dot_dimension_numbers<[1], [0], [0], [1], [0, 0, 1, 1], [], []>} : vector<24x8xf32>, vector<8x9xf32>, vector<24x9xf32> -> vector<24x9xf32>
    %cst_320 = arith.constant dense<0.000000e+00> : vector<24x9xf32>
    %740 = tpu.matmul %3, %446, %cst_320 {dimension_numbers = #tpu.dot_dimension_numbers<[1], [0], [0], [1], [0, 0, 1, 1], [], []>} : vector<24x8xf32>, vector<8x9xf32>, vector<24x9xf32> -> vector<24x9xf32>
    %c0_321 = arith.constant 0 : index
    %c0_322 = arith.constant 0 : index
    %741 = vector.load %arg54[%c0_321, %c0_322] : memref<18x9xf32, #tpu.memory_space<vmem>>, vector<18x9xf32>
    %742 = vector.extract_strided_slice %741 {offsets = [0, 0], sizes = [9, 9], strides = [1, 1]} : vector<18x9xf32> to vector<9x9xf32>
    %cst_323 = arith.constant dense<0.000000e+00> : vector<24x9xf32>
    %743 = tpu.matmul %740, %742, %cst_323 {dimension_numbers = #tpu.dot_dimension_numbers<[1], [0], [0], [1], [0, 0, 1, 1], [], []>} : vector<24x9xf32>, vector<9x9xf32>, vector<24x9xf32> -> vector<24x9xf32>
    %744 = vector.extract_strided_slice %741 {offsets = [9, 0], sizes = [9, 9], strides = [1, 1]} : vector<18x9xf32> to vector<9x9xf32>
    %cst_324 = arith.constant dense<0.000000e+00> : vector<24x9xf32>
    %745 = tpu.matmul %739, %744, %cst_324 {dimension_numbers = #tpu.dot_dimension_numbers<[1], [0], [0], [1], [0, 0, 1, 1], [], []>} : vector<24x9xf32>, vector<9x9xf32>, vector<24x9xf32> -> vector<24x9xf32>
    %746 = arith.addf %743, %745 : vector<24x9xf32>
    %c0_325 = arith.constant 0 : index
    %c0_326 = arith.constant 0 : index
    %747 = vector.load %arg55[%c0_325, %c0_326] : memref<1x9xf32, #tpu.memory_space<vmem>>, vector<1x9xf32>
    %748 = vector.broadcast %747 : vector<1x9xf32> to vector<24x9xf32>
    %749 = arith.addf %746, %748 : vector<24x9xf32>
    %c0_327 = arith.constant 0 : index
    %c0_328 = arith.constant 0 : index
    %750 = vector.load %arg56[%c0_327, %c0_328] : memref<1x9xf32, #tpu.memory_space<vmem>>, vector<1x9xf32>
    %751 = vector.broadcast %750 : vector<1x9xf32> to vector<24x9xf32>
    %752 = arith.mulf %749, %751 : vector<24x9xf32>
    %cst_329 = arith.constant dense<0.000000e+00> : vector<24xf32>
    %753 = vector.multi_reduction <add>, %752, %cst_329 [1] : vector<24x9xf32> to vector<24xf32>
    %754 = vector.shape_cast %753 : vector<24xf32> to vector<24x1xf32>
    %c0_330 = arith.constant 0 : index
    %c0_331 = arith.constant 0 : index
    %755 = vector.load %arg57[%c0_330, %c0_331] : memref<1x1xf32, #tpu.memory_space<vmem>>, vector<1x1xf32>
    %756 = vector.broadcast %755 : vector<1x1xf32> to vector<24x1xf32>
    %757 = arith.addf %754, %756 : vector<24x1xf32>
    %cst_332 = arith.constant 0.000000e+00 : f32
    %758 = vector.broadcast %cst_332 : f32 to vector<24x1xf32>
    %759 = arith.cmpf ogt, %757, %758 : vector<24x1xf32>
    %cst_333 = arith.constant 2.000000e-01 : f32
    %760 = vector.broadcast %cst_333 : f32 to vector<24x1xf32>
    %761 = arith.mulf %760, %757 : vector<24x1xf32>
    %762 = arith.select %759, %757, %761 : vector<24x1xi1>, vector<24x1xf32>
    %763 = vector.broadcast %762 : vector<24x1xf32> to vector<24x8xf32>
    %764 = arith.mulf %763, %3 : vector<24x8xf32>
    %cst_334 = arith.constant dense<0.000000e+00> : vector<8x8xf32>
    %765 = tpu.matmul %2, %764, %cst_334 {dimension_numbers = #tpu.dot_dimension_numbers<[0], [0], [1], [1], [0, 1, 1, 1], [], []>} : vector<24x8xf32>, vector<24x8xf32>, vector<8x8xf32> -> vector<8x8xf32>
    %cst_335 = arith.constant 0.000000e+00 : f32
    %766 = vector.broadcast %cst_335 : f32 to vector<8x8xf32>
    %767 = arith.cmpf ogt, %5, %766 : vector<8x8xf32>
    %cst_336 = arith.constant -9.99999986E+14 : f32
    %768 = vector.broadcast %cst_336 : f32 to vector<8x8xf32>
    %769 = arith.select %767, %765, %768 : vector<8x8xi1>, vector<8x8xf32>
    %770 = tpu.iota {dimensions = array<i32: 0>} : vector<8x8xi32>
    %cst_337 = arith.constant dense<0xFF800000> : vector<8xf32>
    %771 = vector.multi_reduction <maximumf>, %769, %cst_337 [0] : vector<8x8xf32> to vector<8xf32>
    %772 = vector.shape_cast %771 : vector<8xf32> to vector<1x8xf32>
    %773 = vector.broadcast %772 : vector<1x8xf32> to vector<8x8xf32>
    %774 = arith.cmpf oeq, %769, %773 : vector<8x8xf32>
    %c8_i32_338 = arith.constant 8 : i32
    %775 = vector.broadcast %c8_i32_338 : i32 to vector<8x8xi32>
    %776 = arith.select %774, %770, %775 : vector<8x8xi1>, vector<8x8xi32>
    %cst_339 = arith.constant dense<2147483647> : vector<8xi32>
    %777 = vector.multi_reduction <minsi>, %776, %cst_339 [0] : vector<8x8xi32> to vector<8xi32>
    %778 = vector.shape_cast %777 : vector<8xi32> to vector<1x8xi32>
    %779 = vector.broadcast %778 : vector<1x8xi32> to vector<8x8xi32>
    %780 = arith.cmpi eq, %770, %779 : vector<8x8xi32>
    %cst_340 = arith.constant -9.99999986E+14 : f32
    %781 = vector.broadcast %cst_340 : f32 to vector<8x8xf32>
    %782 = arith.select %780, %781, %769 : vector<8x8xi1>, vector<8x8xf32>
    %cst_341 = arith.constant dense<0xFF800000> : vector<8xf32>
    %783 = vector.multi_reduction <maximumf>, %782, %cst_341 [0] : vector<8x8xf32> to vector<8xf32>
    %784 = vector.shape_cast %783 : vector<8xf32> to vector<1x8xf32>
    %785 = vector.broadcast %784 : vector<1x8xf32> to vector<8x8xf32>
    %786 = arith.cmpf oeq, %782, %785 : vector<8x8xf32>
    %c8_i32_342 = arith.constant 8 : i32
    %787 = vector.broadcast %c8_i32_342 : i32 to vector<8x8xi32>
    %788 = arith.select %786, %770, %787 : vector<8x8xi1>, vector<8x8xi32>
    %cst_343 = arith.constant dense<2147483647> : vector<8xi32>
    %789 = vector.multi_reduction <minsi>, %788, %cst_343 [0] : vector<8x8xi32> to vector<8xi32>
    %790 = vector.shape_cast %789 : vector<8xi32> to vector<1x8xi32>
    %791 = vector.broadcast %790 : vector<1x8xi32> to vector<8x8xi32>
    %792 = arith.cmpi eq, %770, %791 : vector<8x8xi32>
    %cst_344 = arith.constant -9.99999986E+14 : f32
    %793 = vector.broadcast %cst_344 : f32 to vector<8x8xf32>
    %794 = arith.select %792, %793, %782 : vector<8x8xi1>, vector<8x8xf32>
    %cst_345 = arith.constant dense<0xFF800000> : vector<8xf32>
    %795 = vector.multi_reduction <maximumf>, %794, %cst_345 [0] : vector<8x8xf32> to vector<8xf32>
    %796 = vector.shape_cast %795 : vector<8xf32> to vector<1x8xf32>
    %797 = vector.broadcast %796 : vector<1x8xf32> to vector<8x8xf32>
    %798 = arith.cmpf ole, %769, %797 : vector<8x8xf32>
    %cst_346 = arith.constant -9.99999986E+14 : f32
    %799 = vector.broadcast %cst_346 : f32 to vector<8x8xf32>
    %800 = arith.select %798, %799, %769 : vector<8x8xi1>, vector<8x8xf32>
    %cst_347 = arith.constant dense<0.000000e+00> : vector<24x8xf32>
    %801 = tpu.matmul %2, %800, %cst_347 {dimension_numbers = #tpu.dot_dimension_numbers<[1], [0], [0], [1], [0, 0, 1, 1], [], []>} : vector<24x8xf32>, vector<8x8xf32>, vector<24x8xf32> -> vector<24x8xf32>
    %802 = arith.mulf %801, %3 : vector<24x8xf32>
    %cst_348 = arith.constant dense<0.000000e+00> : vector<24xf32>
    %803 = vector.multi_reduction <add>, %802, %cst_348 [1] : vector<24x8xf32> to vector<24xf32>
    %804 = vector.shape_cast %803 : vector<24xf32> to vector<24x1xf32>
    %cst_349 = arith.constant 0.000000e+00 : f32
    %805 = vector.broadcast %cst_349 : f32 to vector<24x8xf32>
    %806 = arith.cmpf ogt, %3, %805 : vector<24x8xf32>
    %cst_350 = arith.constant -1.000000e+30 : f32
    %807 = vector.shape_cast %804 : vector<24x1xf32> to vector<24x1xf32>
    %808 = vector.broadcast %807 : vector<24x1xf32> to vector<24x8xf32>
    %809 = vector.broadcast %cst_350 : f32 to vector<24x8xf32>
    %810 = arith.select %806, %808, %809 : vector<24x8xi1>, vector<24x8xf32>
    %cst_351 = arith.constant dense<0xFF800000> : vector<8xf32>
    %811 = vector.multi_reduction <maximumf>, %810, %cst_351 [0] : vector<24x8xf32> to vector<8xf32>
    %812 = vector.shape_cast %811 : vector<8xf32> to vector<1x8xf32>
    %813 = vector.broadcast %812 : vector<1x8xf32> to vector<24x8xf32>
    %814 = arith.mulf %3, %813 : vector<24x8xf32>
    %cst_352 = arith.constant dense<0.000000e+00> : vector<24xf32>
    %815 = vector.multi_reduction <add>, %814, %cst_352 [1] : vector<24x8xf32> to vector<24xf32>
    %816 = vector.shape_cast %815 : vector<24xf32> to vector<24x1xf32>
    %817 = arith.subf %804, %816 : vector<24x1xf32>
    %818 = math.exp %817 : vector<24x1xf32>
    %819 = vector.broadcast %818 : vector<24x1xf32> to vector<24x8xf32>
    %820 = arith.mulf %3, %819 : vector<24x8xf32>
    %cst_353 = arith.constant dense<0.000000e+00> : vector<8xf32>
    %821 = vector.multi_reduction <add>, %820, %cst_353 [0] : vector<24x8xf32> to vector<8xf32>
    %822 = vector.shape_cast %821 : vector<8xf32> to vector<1x8xf32>
    %823 = vector.broadcast %822 : vector<1x8xf32> to vector<24x8xf32>
    %824 = arith.mulf %3, %823 : vector<24x8xf32>
    %cst_354 = arith.constant dense<0.000000e+00> : vector<24xf32>
    %825 = vector.multi_reduction <add>, %824, %cst_354 [1] : vector<24x8xf32> to vector<24xf32>
    %826 = vector.shape_cast %825 : vector<24xf32> to vector<24x1xf32>
    %cst_355 = arith.constant 1.000000e-16 : f32
    %827 = vector.broadcast %cst_355 : f32 to vector<24x1xf32>
    %828 = arith.addf %826, %827 : vector<24x1xf32>
    %829 = arith.divf %818, %828 : vector<24x1xf32>
    %830 = vector.broadcast %829 : vector<24x1xf32> to vector<24x9xf32>
    %831 = arith.mulf %830, %749 : vector<24x9xf32>
    %cst_356 = arith.constant dense<0.000000e+00> : vector<8x9xf32>
    %832 = tpu.matmul %0, %647, %cst_356 {dimension_numbers = #tpu.dot_dimension_numbers<[0], [0], [1], [1], [0, 1, 1, 1], [], []>} : vector<12x8xf32>, vector<12x9xf32>, vector<8x9xf32> -> vector<8x9xf32>
    %cst_357 = arith.constant dense<0.000000e+00> : vector<8x9xf32>
    %833 = tpu.matmul %1, %738, %cst_357 {dimension_numbers = #tpu.dot_dimension_numbers<[0], [0], [1], [1], [0, 1, 1, 1], [], []>} : vector<12x8xf32>, vector<12x9xf32>, vector<8x9xf32> -> vector<8x9xf32>
    %cst_358 = arith.constant dense<0.000000e+00> : vector<8x9xf32>
    %834 = tpu.matmul %3, %831, %cst_358 {dimension_numbers = #tpu.dot_dimension_numbers<[0], [0], [1], [1], [0, 1, 1, 1], [], []>} : vector<24x8xf32>, vector<24x9xf32>, vector<8x9xf32> -> vector<8x9xf32>
    %cst_359 = arith.constant 3.000000e+00 : f32
    %835 = vector.broadcast %cst_359 : f32 to vector<8x9xf32>
    %836 = arith.mulf %835, %446 : vector<8x9xf32>
    %837 = arith.addf %836, %832 : vector<8x9xf32>
    %838 = arith.addf %837, %833 : vector<8x9xf32>
    %839 = arith.addf %838, %834 : vector<8x9xf32>
    %cst_360 = arith.constant 3.000000e+00 : f32
    %840 = vector.broadcast %cst_360 : f32 to vector<8x9xf32>
    %841 = arith.divf %839, %840 : vector<8x9xf32>
    %cst_361 = arith.constant 0.000000e+00 : f32
    %842 = vector.broadcast %cst_361 : f32 to vector<8x9xf32>
    %843 = arith.cmpf ogt, %841, %842 : vector<8x9xf32>
    %cst_362 = arith.constant 0.000000e+00 : f32
    %844 = vector.broadcast %cst_362 : f32 to vector<8x9xf32>
    %845 = arith.minimumf %841, %844 : vector<8x9xf32>
    %846 = math.exp %845 : vector<8x9xf32>
    %cst_363 = arith.constant 1.000000e+00 : f32
    %847 = vector.broadcast %cst_363 : f32 to vector<8x9xf32>
    %848 = arith.subf %846, %847 : vector<8x9xf32>
    %849 = arith.select %843, %841, %848 : vector<8x9xi1>, vector<8x9xf32>
    %cst_364 = arith.constant 0.000000e+00 : f32
    %850 = vector.broadcast %cst_364 : f32 to vector<12x11xf32>
    %851 = arith.cmpf ogt, %556, %850 : vector<12x11xf32>
    %cst_365 = arith.constant 0.000000e+00 : f32
    %852 = vector.broadcast %cst_365 : f32 to vector<12x11xf32>
    %853 = arith.minimumf %556, %852 : vector<12x11xf32>
    %854 = math.exp %853 : vector<12x11xf32>
    %cst_366 = arith.constant 1.000000e+00 : f32
    %855 = vector.broadcast %cst_366 : f32 to vector<12x11xf32>
    %856 = arith.subf %854, %855 : vector<12x11xf32>
    %857 = arith.select %851, %556, %856 : vector<12x11xi1>, vector<12x11xf32>
    %c0_367 = arith.constant 0 : index
    %c0_368 = arith.constant 0 : index
    %858 = vector.load %arg58[%c0_367, %c0_368] : memref<8x9xf32, #tpu.memory_space<vmem>>, vector<8x9xf32>
    tpu.vector_store %arg58[%c0_367, %c0_368], %849 {strides = array<i32>} : memref<8x9xf32, #tpu.memory_space<vmem>>, vector<8x9xf32>,
    %c0_369 = arith.constant 0 : index
    %c0_370 = arith.constant 0 : index
    %859 = vector.load %arg59[%c0_369, %c0_370] : memref<12x11xf32, #tpu.memory_space<vmem>>, vector<12x11xf32>
    tpu.vector_store %arg59[%c0_369, %c0_370], %857 {strides = array<i32>} : memref<12x11xf32, #tpu.memory_space<vmem>>, vector<12x11xf32>,
    return
  }
}

</mosaic_0001>

<bundles_post_ra>
// kernel: tpu_custom_call.1
= control target key start
LH: loop header
LB: loop body
LE: loop exit
PB: predicated region body
PF: predicated region fallthrough
CT: control target
= control target key end

     0   :  { %s7662_s6 = smov 1   ;;  %s7663_s10 = smov 2   ;;  %s9267_s0 = inlined_call_operand.smem [shape: u32[60], index: -1, kind: input, shape index: {}] }
   0x1   :  { %s7736_s5 = sld [smem:[%s9267_s0]]   ;;  %s7664_s14 = smov 3  }
   0x2   :  { %s7741_s9 = sld [smem:[%s9267_s0 + %s7662_s6]]   ;;  %s7665_s18 = smov 4  }
   0x3   :  { %s7746_s13 = sld [smem:[%s9267_s0 + %s7663_s10]]   ;;  %s7666_s22 = smov 5  }
   0x4   :  { %s7751_s17 = sld [smem:[%s9267_s0 + %s7664_s14]]   ;;  %s7667_s26 = smov 6  }
   0x5   :  { %s7756_s21 = sld [smem:[%s9267_s0 + %s7665_s18]]   ;;  %s7668_s30 = smov 7  }
   0x6   :  { %s7761_s25 = sld [smem:[%s9267_s0 + %s7666_s22]]   ;;  %s7669_s4 = smov 8  }
   0x7   :  { %s7766_s29 = sld [smem:[%s9267_s0 + %s7667_s26]]   ;;  %s7670_s10 = smov 9  }
   0x8   :  { %s7771_s3 = sld [smem:[%s9267_s0 + %s7668_s30]]   ;;  %s7671_s15 = smov 10  }
   0x9   :  { %s7776_s8 = sld [smem:[%s9267_s0 + %s7669_s4]]   ;;  %s7672_s20 = smov 11  }
   0xa   :  { %s7781_s14 = sld [smem:[%s9267_s0 + %s7670_s10]]   ;;  %s7673_s26 = smov 12  }
   0xb   :  { %s7786_s19 = sld [smem:[%s9267_s0 + %s7671_s15]]   ;;  %s7674_s1 = smov 13  }
   0xc   :  { %s7791_s24 = sld [smem:[%s9267_s0 + %s7672_s20]]   ;;  %s7675_s7 = smov 14  }
   0xd   :  { %s7796_s30 = sld [smem:[%s9267_s0 + %s7673_s26]]   ;;  %s7676_s15 = smov 15  }
   0xe   :  { %9288 = sst [smem:[#allocation18_spill]] %s7771_s3  ;;  %s7677_s22 = smov 16  }
   0xf   :  { %s7801_s6 = sld [smem:[%s9267_s0 + %s7674_s1]]   ;;  %s7678_s28 = smov 17  }
  0x10   :  { %9289 = sst [smem:[#allocation19_spill]] %s7781_s14  ;;  %s7679_s10 = smov 18  }
  0x11   :  { %s7806_s12 = sld [smem:[%s9267_s0 + %s7675_s7]]   ;;  %s7680_s16 = smov 19  }
  0x12   :  { %9290 = sst [smem:[#allocation20_spill]] %s7791_s24  ;;  %s7681_s23 = smov 20  }
  0x13   :  { %s7811_s20 = sld [smem:[%s9267_s0 + %s7676_s15]]   ;;  %s7682_s1 = smov 22  }
  0x14   :  { %s7816_s27 = sld [smem:[%s9267_s0 + %s7677_s22]]   ;;  %s7687_s7 = smov 28  }
  0x15   :  { %9291 = sst [smem:[#allocation21_spill]] %s7801_s6  ;;  %s7716_s11 = smov 41  }
  0x16   :  { %s6457_s4 = sld [smem:[%s9267_s0 + %s7678_s28]]   ;;  %s7717_s15 = smov 45  }
  0x17   :  { %9292 = sst [smem:[#allocation22_spill]] %s7806_s12  ;;  %s7719_s14 = smov 53  }
  0x18   :  { %s7824_s6 = sld [smem:[%s9267_s0 + %s7679_s10]]   ;;  %s7683_s10 = smov 23  }
  0x19   :  { %9293 = sst [smem:[#allocation23_spill]] %s7811_s20  ;;  %s7720_s24 = smov 57  }
  0x1a   :  { %9294 = sst [smem:[#allocation24_spill]] %s7816_s27 }
  0x1b   :  { %s7829_s20 = sld [smem:[%s9267_s0 + %s7680_s16]]   ;;  %s7684_s16 = smov 24  }
  0x1c   :  { %s7834_s27 = sld [smem:[%s9267_s0 + %s7681_s23]]   ;;  %v125_v0 = vstv %s6457_s4  ;;  %s7685_s23 = smov 26  }
  0x1d   :  { %s7839_s12 = sld [smem:[%s9267_s0 + %s7682_s1]]   ;;  %126 = vst [vmem:[#allocation2] sm:$0x1] %v125_v0  ;;  %s7686_s1 = smov 27  }
  0x1e   :  { %9295 = sst [smem:[#allocation25_spill]] %s7824_s6  ;;  %s7688_s4 = smov 30  }
  0x1f   :  { %s7844_s6 = sld [smem:[%s9267_s0 + %s7683_s10]]  }
  0x20   :  { %s7854_s28 = sld [smem:[%s9267_s0 + %s7685_s23]]   ;;  %s7689_s23 = smov 31  }
  0x21   :  { %9296 = sst [smem:[#allocation26_spill]] %s7829_s20 }
  0x22   :  { %9297 = sst [smem:[#allocation27_spill]] %s7834_s27  ;;  %s7690_s27 = smov 32  }
  0x23   :  { %9298 = sst [smem:[#allocation28_spill]] %s7839_s12  ;;  %s7714_s12 = smov 29  }
  0x24   :  { %s7849_s20 = sld [smem:[%s9267_s0 + %s7684_s16]]  }
  0x25   :  { %9299 = sst [smem:[#allocation29_spill]] %s7844_s6  ;;  %s7691_s6 = smov 34  }
  0x26   :  { %9301 = sst [smem:[#allocation31_spill]] %s7854_s28  ;;  %s7693_s28 = smov 36  }
  0x27   :  { %s7859_s10 = sld [smem:[%s9267_s0 + %s7686_s1]]  }
  0x28   :  { %s7864_s16 = sld [smem:[%s9267_s0 + %s7687_s7]]  }
  0x29   :  { %s7869_s22 = sld [smem:[%s9267_s0 + %s7688_s4]]   ;;  %s7692_s4 = smov 35  }
  0x2a   :  { %9300 = sst [smem:[#allocation30_spill]] %s7849_s20 }
  0x2b   :  { %s7874_s20 = sld [smem:[%s9267_s0 + %s7689_s23]]   ;;  %s7713_s23 = smov 25  }
  0x2c   :  { %s6469_s2 = sld [smem:[%s9267_s0 + %s7714_s12]]  }
  0x2d   :  { %9302 = sst [smem:[#allocation32_spill]] %s7859_s10 }
  0x2e   :  { %9303 = sst [smem:[#allocation33_spill]] %s7864_s16 }
  0x2f   :  { %9304 = sst [smem:[#allocation34_spill]] %s7869_s22 }
  0x30   :  { %s7879_s10 = sld [smem:[%s9267_s0 + %s7690_s27]]   ;;  %s7694_s27 = smov 37  }
  0x31   :  { %9305 = sst [smem:[#allocation35_spill]] %s7874_s20 }
  0x32   :  { %s7884_s16 = sld [smem:[%s9267_s0 + %s7691_s6]]   ;;  %s7695_s6 = smov 38   ;;  %v131_v3 = vstv %s6469_s2 }
  0x33   :  { %s7889_s22 = sld [smem:[%s9267_s0 + %s7692_s4]]   ;;  %s7696_s4 = smov 39   ;;  %132 = vst [vmem:[#allocation5] sm:$0x1] %v131_v3 }
  0x34   :  { %s7894_s20 = sld [smem:[%s9267_s0 + %s7693_s28]]   ;;  %s7697_s28 = smov 40  }
  0x35   :  { %s6493_s7 = sld [smem:[%s9267_s0 + %s7719_s14]]  }
  0x36   :  { %9306 = sst [smem:[#allocation36_spill]] %s7879_s10 }
  0x37   :  { %s7899_s10 = sld [smem:[%s9267_s0 + %s7694_s27]]   ;;  %s7698_s27 = smov 42  }
  0x38   :  { %9307 = sst [smem:[#allocation37_spill]] %s7884_s16 }
  0x39   :  { %9308 = sst [smem:[#allocation38_spill]] %s7889_s22 }
  0x3a   :  { %9309 = sst [smem:[#allocation39_spill]] %s7894_s20 }
  0x3b   :  { %s7904_s16 = sld [smem:[%s9267_s0 + %s7695_s6]]   ;;  %s7699_s6 = smov 43   ;;  %v141_v8 = vstv %s6493_s7 }
  0x3c   :  { %s7909_s22 = sld [smem:[%s9267_s0 + %s7696_s4]]   ;;  %s7700_s4 = smov 44   ;;  %142 = vst [vmem:[#allocation10] sm:$0x1] %v141_v8 }
  0x3d   :  { %9310 = sst [smem:[#allocation40_spill]] %s7899_s10 }
  0x3e   :  { %s7914_s20 = sld [smem:[%s9267_s0 + %s7697_s28]]   ;;  %s7701_s28 = smov 46  }
  0x3f   :  { %s7919_s10 = sld [smem:[%s9267_s0 + %s7698_s27]]   ;;  %s7702_s27 = smov 47  }
  0x40   :  { %s6497_s3 = sld [smem:[%s9267_s0 + %s7720_s24]]  }
  0x41   :  { %9311 = sst [smem:[#allocation41_spill]] %s7904_s16 }
  0x42   :  { %9312 = sst [smem:[#allocation42_spill]] %s7909_s22 }
  0x43   :  { %s7924_s16 = sld [smem:[%s9267_s0 + %s7699_s6]]   ;;  %s7703_s6 = smov 48  }
  0x44   :  { %9313 = sst [smem:[#allocation43_spill]] %s7914_s20 }
  0x45   :  { %9314 = sst [smem:[#allocation44_spill]] %s7919_s10 }
  0x46   :  { %s7929_s22 = sld [smem:[%s9267_s0 + %s7700_s4]]   ;;  %s7704_s4 = smov 50   ;;  %v143_v9 = vstv %s6497_s3 }
  0x47   :  { %s7934_s20 = sld [smem:[%s9267_s0 + %s7701_s28]]   ;;  %s7705_s28 = smov 51   ;;  %144 = vst [vmem:[#allocation11] sm:$0x1] %v143_v9 }
  0x48   :  { %s7939_s10 = sld [smem:[%s9267_s0 + %s7702_s27]]   ;;  %s7706_s27 = smov 52  }
  0x49   :  { %9315 = sst [smem:[#allocation45_spill]] %s7924_s16 }
  0x4a   :  { %s7944_s16 = sld [smem:[%s9267_s0 + %s7703_s6]]   ;;  %s7707_s6 = smov 54  }
  0x4c   :  { %9316 = sst [smem:[#allocation46_spill]] %s7929_s22 }
  0x4d   :  { %9317 = sst [smem:[#allocation47_spill]] %s7934_s20 }
  0x4e   :  { %9318 = sst [smem:[#allocation48_spill]] %s7939_s10 }
  0x4f   :  { %s7949_s22 = sld [smem:[%s9267_s0 + %s7704_s4]]   ;;  %s7708_s4 = smov 55  }
  0x50   :  { %9319 = sst [smem:[#allocation49_spill]] %s7944_s16 }
  0x51   :  { %s7954_s20 = sld [smem:[%s9267_s0 + %s7705_s28]]   ;;  %s7709_s28 = smov 56  }
  0x52   :  { %s7959_s10 = sld [smem:[%s9267_s0 + %s7706_s27]]   ;;  %s7710_s27 = smov 58  }
  0x53   :  { %s7964_s16 = sld [smem:[%s9267_s0 + %s7707_s6]]   ;;  %s7711_s6 = smov 59  }
  0x55   :  { %9320 = sst [smem:[#allocation50_spill]] %s7949_s22 }
  0x56   :  { %s7969_s22 = sld [smem:[%s9267_s0 + %s7708_s4]]   ;;  %s7712_s4 = smov 21  }
  0x57   :  { %9321 = sst [smem:[#allocation51_spill]] %s7954_s20 }
  0x58   :  { %9322 = sst [smem:[#allocation52_spill]] %s7959_s10 }
  0x59   :  { %9323 = sst [smem:[#allocation53_spill]] %s7964_s16 }
  0x5a   :  { %s7974_s20 = sld [smem:[%s9267_s0 + %s7709_s28]]   ;;  %s7718_s28 = smov 49  }
  0x5b   :  { %s7979_s10 = sld [smem:[%s9267_s0 + %s7710_s27]]  }
  0x5c   :  { %9324 = sst [smem:[#allocation54_spill]] %s7969_s22 }
  0x5d   :  { %s7984_s16 = sld [smem:[%s9267_s0 + %s7711_s6]]  }
  0x5e   :  { %s6461_s22 = sld [smem:[%s9267_s0 + %s7712_s4]]  }
  0x5f   :  { %s6481_s4 = sld [smem:[%s9267_s0 + %s7716_s11]]  }
  0x60   :  { %9325 = sst [smem:[#allocation55_spill]] %s7974_s20 }
  0x61   :  { %9326 = sst [smem:[#allocation56_spill]] %s7979_s10  ;;  %s7715_s10 = smov 33  }
  0x62   :  { %s6465_s20 = sld [smem:[%s9267_s0 + %s7713_s23]]  }
  0x63   :  { %9327 = sst [smem:[#allocation57_spill]] %s7984_s16 }
  0x64   :  { %s6473_s6 = sld [smem:[%s9267_s0 + %s7715_s10]]   ;;  %v127_v1 = vstv %s6461_s22 }
  0x65   :  { %s6485_s23 = sld [smem:[%s9267_s0 + %s7717_s15]]   ;;  %128 = vst [vmem:[#allocation3] sm:$0x1] %v127_v1  ;;  %v135_v5 = vstv %s6481_s4 }
  0x66   :  { %s6489_s12 = sld [smem:[%s9267_s0 + %s7718_s28]]   ;;  %136 = vst [vmem:[#allocation7] sm:$0x1] %v135_v5 }
  0x68   :  { %v129_v2 = vstv %s6465_s20 }
  0x69   :  { %130 = vst [vmem:[#allocation4] sm:$0x1] %v129_v2 }
  0x6a   :  { %v133_v4 = vstv %s6473_s6 }
  0x6b   :  { %134 = vst [vmem:[#allocation6] sm:$0x1] %v133_v4  ;;  %v137_v6 = vstv %s6485_s23 }
  0x6c   :  { %138 = vst [vmem:[#allocation8] sm:$0x1] %v137_v6  ;;  %v139_v7 = vstv %s6489_s12 }
  0x6d   :  { %140 = vst [vmem:[#allocation9] sm:$0x1] %v139_v7 }
  0x6e   :  { %145 = vsyncpa [#allocation13], 0  ;;  %v8014_v10 = vld [vmem:[%s7746_s13] sm:$0xff]  ;;  %v8017_v11 = vld [vmem:[%s7751_s17 + $0x8] sm:$0xf]  ;;  %v7721_v12 = vmov 0.0  }
  0x6f   :  { %273 = vxpose.xlu0.b32.start [1/2] (short) (narrow) %v8014_v10, 8  ;;  %6910 = vmatprep.subr.mxu0 %v7721_v12  ;;  %vm309_vm0 = vcmask 1043456   ;;  %v8022_v13 = vld [vmem:[%s7751_s17] sm:$0xff]  ;;  %v8025_v14 = vld [vmem:[%s7746_s13 + $0x8] sm:$0xf]  ;;  %vm7722_vm1 = vmmov 0  }
  0x70   :  { %6911 = vmatpush3.msk.msra.mxu0 %vm309_vm0, %v8017_v11  ;;  %6914 = vmatprep.mubr.msk.f32.mxu0 %vm7722_vm1, %v7721_v12 }
  0x71   :  { %146 = vsyncpa [#allocation15], 0  ;;  %6912 = vmatprep.subr.mxu0 %v7721_v12  ;;  %6917 = vmatprep.subr.mxu1 %v7721_v12  ;;  %v267_v15 = vld [vmem:[%s7756_s21] sm:$0xff]  ;;  %v268_v16 = vld [vmem:[%s7756_s21 + $0x8] sm:$0xff]  ;;  %vm9287_vm2 = vcmask 97280   ;;  %vm505_vm3 = vcmask 523264  }
  0x72   :  { %6913 = vmatpush3.msra.mxu0 %v8022_v13  ;;  %6923 = vmatprep.mubr.msk.f32.mxu1 %vm7722_vm1, %v7721_v12  ;;  %v272_v17 = vld [vmem:[%s7761_s25 + $0x10] sm:$0xff]  ;;  %v497_v19 = vld [vmem:[%s7766_s29 + $0x38] sm:$0xff]  ;;  %v495_v22 = vld [vmem:[%s7766_s29 + $0x28] sm:$0xff]  ;;  %vm9285_vm4 = vcmask 195584   ;;  %s9328_s0 = sld [smem:[#allocation18_spill]]  ;;  %vm867_vm5 = vcmask 64512  }
  0x73   :  { %274 = vxpose.xlu0.b32.end [2/2] (short) (narrow) %v8025_v14, 8  ;;  %6926 = vmatprep.subr.mxu0 %v7721_v12  ;;  %v269_v18 = vld [vmem:[%s7756_s21 + $0x10] sm:$0xff]  ;;  %v494_v23 = vld [vmem:[%s7766_s29 + $0x20] sm:$0xff]  ;;  %v493_v24 = vld [vmem:[%s7766_s29 + $0x18] sm:$0xff]  ;;  %vm1037_vm6 = vcmask 261120   ;;  %s9335_s20 = sld [smem:[#allocation24_spill]] }
  0x74   :  { %383 = vxpose.xlu1.b32.start [1/3] (short) (narrow) %v267_v15, 8  ;;  %6918 = vmatpush3.msra.mxu1 %v272_v17  ;;  %v496_v21 = vld [vmem:[%s7766_s29 + $0x30] sm:$0xff]  ;;  %v491_v26 = vld [vmem:[%s7766_s29 + $0x8] sm:$0xff]  ;;  %v490_v27 = vld [vmem:[%s7766_s29] sm:$0xff]  ;;  %s9336_s22 = sld [smem:[#allocation26_spill]]  ;;  %vm1221_vm7 = vcmask 257024  }
  0x75   :  { %6919 = vmatprep.subr.mxu1 %v7721_v12  ;;  %v492_v25 = vld [vmem:[%s7766_s29 + $0x10] sm:$0xff]  ;;  %v489_v28 = vld [vmem:[%s7736_s5] sm:$0xff]  ;;  %v678_v29 = vld [vmem:[%s7786_s19 + $0x38] sm:$0xff]  ;;  %s9329_s5 = sld [smem:[#allocation20_spill]]  ;;  %vm1241_vm12 = vcmp.gt.f32.partialorder %v8017_v11, 0.0  ;;  %vm1240_vm13 = vcmp.gt.f32.partialorder %v8022_v13, 0.0 }
  0x76   :  { %v677_v30 = vld [vmem:[%s7786_s19 + $0x30] sm:$0xff]  ;;  %v676_v31 = vld [vmem:[%s7786_s19 + $0x28] sm:$0xff]  ;;  %v675_v33 = vld [vmem:[%s7786_s19 + $0x20] sm:$0xff]  ;;  %s9331_s29 = sld [smem:[#allocation22_spill]]  ;;  %vm1255_vm14 = vcmask 60416   ;;  %vm1524_vm15 = vcmp.gt.f32.partialorder %v8014_v10, 0.0 }
  0x77   :  { %v271_v32 = vld [vmem:[%s7761_s25 + $0x8] sm:$0xff]  ;;  %v270_v34 = vld [vmem:[%s7761_s25] sm:$0xff]  ;;  %v674_v36 = vld [vmem:[%s7786_s19 + $0x18] sm:$0xff]  ;;  %s9337_s2 = sld [smem:[#allocation27_spill]] }
  0x78   :  { %384 = vxpose.xlu1.b32.cont [2/3] (short) (narrow) %v268_v16, 8  ;;  %6920 = vmatpush3.msra.mxu1 %v271_v32  ;;  %v673_v37 = vld [vmem:[%s7786_s19 + $0x10] sm:$0xff]  ;;  %v587_v38 = vld [vmem:[%s7776_s8 + $0x38] sm:$0xff]  ;;  %v672_v39 = vld [vmem:[%s7786_s19 + $0x8] sm:$0xff]  ;;  %s9338_s6 = sld [smem:[#allocation21_spill]] }
  0x79   :  { %6921 = vmatprep.subr.mxu1 %v7721_v12  ;;  %v586_v40 = vld [vmem:[%s7776_s8 + $0x30] sm:$0xff]  ;;  %v671_v41 = vld [vmem:[%s7786_s19] sm:$0xff]  ;;  %v585_v42 = vld [vmem:[%s7776_s8 + $0x28] sm:$0xff]  ;;  %s9333_s19 = sld [smem:[#allocation28_spill]] }
  0x7a   :  { %6922 = vmatpush3.msra.mxu1 %v270_v34  ;;  %v669_v43 = vld [vmem:[%s7741_s9] sm:$0xff]  ;;  %v670_v44 = vld [vmem:[%s7741_s9 + $0x8] sm:$0xf]  ;;  %v583_v46 = vld [vmem:[%s7776_s8 + $0x18] sm:$0xff]  ;;  %s9330_s9 = sld [smem:[#allocation19_spill]] }
  0x7b   :  { %6945 = vmatprep.subr.mxu1 %v7721_v12  ;;  %v584_v45 = vld [vmem:[%s7776_s8 + $0x20] sm:$0xff]  ;;  %v582_v47 = vld [vmem:[%s7776_s8 + $0x10] sm:$0xff]  ;;  %v581_v48 = vld [vmem:[%s7776_s8 + $0x8] sm:$0xff]  ;;  %s9339_s4 = sld [smem:[#allocation29_spill]] }
  0x7c   :  { %385 = vxpose.xlu1.b32.end [3/3] (short) (narrow) %v269_v18, 8  ;;  %v580_v49 = vld [vmem:[%s7776_s8] sm:$0xff]  ;;  %v776_v50 = vld [vmem:[%s7796_s30 + $0x38] sm:$0xff]  ;;  %v775_v58 = vld [vmem:[%s7796_s30 + $0x30] sm:$0xff]  ;;  %s9332_s8 = sld [smem:[#allocation25_spill]] }
  0x7d   :  { %v6503_v53 = vld [vmem:[%s9328_s0] ss:$0 sm:$0xff]  ;;  %v774_v59 = vld [vmem:[%s7796_s30 + $0x28] sm:$0xff]  ;;  %v772_v61 = vld [vmem:[%s7796_s30 + $0x18] sm:$0xff]  ;;  %s9340_s15 = sld [smem:[#allocation30_spill]] }
  0x7e   :  { %v773_v60 = vld [vmem:[%s7796_s30 + $0x20] sm:$0xff]  ;;  %v771_v62 = vld [vmem:[%s7796_s30 + $0x10] sm:$0xff]  ;;  %v770_v63 = vld [vmem:[%s7796_s30 + $0x8] sm:$0xff]  ;;  %s9341_s18 = sld [smem:[#allocation31_spill]] }
  0x7f   :  { %v769_v0 = vld [vmem:[%s7796_s30] sm:$0xff]  ;;  %s9334_s30 = sld [smem:[#allocation23_spill]] }
  0x80   :  { %v6507_v3 = vld [vmem:[%s9329_s5] ss:$0 sm:$0xff]  ;;  %s9342_s23 = sld [smem:[#allocation32_spill]] }
  0x81   :  { %v6505_v15 = vld [vmem:[%s9330_s9] ss:$0 sm:$0xff]  ;;  %s9343_s28 = sld [smem:[#allocation33_spill]] }
  0x82   :  { %s9344_s26 = sld [smem:[#allocation34_spill]] }
  0x83   :  { %s9345_s1 = sld [smem:[#allocation35_spill]] }
  0x84   :  { %s9346_s12 = sld [smem:[#allocation36_spill]] }
  0x85   :  { %s9347_s14 = sld [smem:[#allocation39_spill]] }
  0x86   :  { %s9348_s10 = sld [smem:[#allocation37_spill]] }
  0x87   :  { %s9349_s27 = sld [smem:[#allocation38_spill]] }
  0x88   :  { %s9350_s7 = sld [smem:[#allocation41_spill]] }
  0x89   :  { %s9351_s24 = sld [smem:[#allocation44_spill]] }
  0x8a   :  { %s9352_s16 = sld [smem:[#allocation47_spill]] }
  0x8b   :  { %s9353_s11 = sld [smem:[#allocation42_spill]] }
  0x8c   :  { %s9354_s3 = sld [smem:[#allocation43_spill]] }
  0x8d   :  { %s9355_s0 = sld [smem:[#allocation45_spill]] }
  0x8e   :  { %s9356_s5 = sld [smem:[#allocation46_spill]] }
  0x8f   :  { %s9357_s9 = sld [smem:[#allocation40_spill]] }
  0xeb   :  { %v8044_v20 = vpop.trf.xlu0 }
  0xec   :  { %6915 = vmatmul.mubr.msk.f32.vlgmr.msra.gmra.mxu0 %vm9287_vm2, %v8044_v20 }
  0xed   :  { %6927 = vmatpush3.msra.mxu0 %v497_v19  ;;  %6942 = vmatprep.mubr.msk.f32.mxu0 %vm7722_vm1, %v7721_v12 }
  0xee   :  { %6928 = vmatprep.subr.mxu0 %v7721_v12 }
  0xef   :  { %6929 = vmatpush3.msra.mxu0 %v496_v21  ;;  %v1036_v21 = vld [vmem:[%s9331_s29 + $0x38] sm:$0xff] }
  0xf0   :  { %6930 = vmatprep.subr.mxu0 %v7721_v12  ;;  %v8072_v35 = vpop.trf.xlu1 }
  0xf1   :  { %6931 = vmatpush3.msra.mxu0 %v495_v22  ;;  %6924 = vmatmul.mubr.msk.f32.vlgmr.msra.gmra.mxu1 %vm9285_vm4, %v8072_v35  ;;  %v1032_v22 = vld [vmem:[%s9331_s29 + $0x18] sm:$0xff] }
  0xf2   :  { %6932 = vmatprep.subr.mxu0 %v7721_v12  ;;  %6946 = vmatpush3.msra.mxu1 %v587_v38  ;;  %v1333_v38 = vld [vmem:[%s9332_s8 + $0x30] sm:$0xff] }
  0xf3   :  { %6933 = vmatpush3.msra.mxu0 %v494_v23  ;;  %6947 = vmatprep.subr.mxu1 %v7721_v12  ;;  %v1035_v23 = vld [vmem:[%s9331_s29 + $0x30] sm:$0xff] }
  0xf4   :  { %6934 = vmatprep.subr.mxu0 %v7721_v12  ;;  %6948 = vmatpush3.msra.mxu1 %v586_v40  ;;  %v1332_v40 = vld [vmem:[%s9332_s8 + $0x28] sm:$0xff] }
  0xf5   :  { %6935 = vmatpush3.msra.mxu0 %v493_v24  ;;  %6949 = vmatprep.subr.mxu1 %v7721_v12  ;;  %v1031_v24 = vld [vmem:[%s9331_s29 + $0x10] sm:$0xff] }
  0xf6   :  { %6936 = vmatprep.subr.mxu0 %v7721_v12  ;;  %6950 = vmatpush3.msra.mxu1 %v585_v42  ;;  %v1331_v42 = vld [vmem:[%s9332_s8 + $0x20] sm:$0xff] }
  0xf7   :  { %6937 = vmatpush3.msra.mxu0 %v492_v25  ;;  %6951 = vmatprep.subr.mxu1 %v7721_v12  ;;  %v1034_v25 = vld [vmem:[%s9331_s29 + $0x28] sm:$0xff] }
  0xf8   :  { %6938 = vmatprep.subr.mxu0 %v7721_v12  ;;  %6952 = vmatpush3.msra.mxu1 %v584_v45  ;;  %v1616_v45 = vld [vmem:[%s9333_s19 + $0x10] sm:$0xff] }
  0xf9   :  { %6939 = vmatpush3.msra.mxu0 %v491_v26  ;;  %6953 = vmatprep.subr.mxu1 %v7721_v12  ;;  %v1030_v26 = vld [vmem:[%s9331_s29 + $0x8] sm:$0xff] }
  0xfa   :  { %6940 = vmatprep.subr.mxu0 %v7721_v12  ;;  %6961 = vmatprep.mubr.msk.f32.mxu1 %vm7722_vm1, %v7721_v12 }
  0xfb   :  { %6941 = vmatpush3.msra.mxu0 %v490_v27  ;;  %6954 = vmatpush3.msra.mxu1 %v583_v46  ;;  %v1033_v27 = vld [vmem:[%s9331_s29 + $0x20] sm:$0xff]  ;;  %v1615_v46 = vld [vmem:[%s9333_s19 + $0x8] sm:$0xff] }
  0xfc   :  { %6943 = vmatmul.mubr.msk.f32.vlgmr.msra.gmra.mxu0 %vm505_vm3, %v489_v28  ;;  %6964 = vmatprep.subr.mxu0 %v678_v29  ;;  %v1029_v28 = vld [vmem:[%s9331_s29] sm:$0xff]  ;;  %s9358_s29 = sld [smem:[#allocation48_spill]] }
  0xfd   :  { %6965 = vmatpush3.msra.mxu0 %v678_v29  ;;  %6980 = vmatprep.mubr.msk.f32.mxu0 %vm505_vm3, %v669_v43  ;;  %v1334_v29 = vld [vmem:[%s9332_s8 + $0x38] sm:$0xff]  ;;  %v1327_v43 = vld [vmem:[%s9332_s8] sm:$0xff] }
  0xfe   :  { %6966 = vmatprep.subr.mxu0 %v677_v30  ;;  %6955 = vmatprep.subr.mxu1 %v7721_v12 }
  0xff   :  { %6967 = vmatpush3.msra.mxu0 %v677_v30  ;;  %6956 = vmatpush3.msra.mxu1 %v582_v47  ;;  %v1330_v30 = vld [vmem:[%s9332_s8 + $0x18] sm:$0xff]  ;;  %v1614_v47 = vld [vmem:[%s9333_s19] sm:$0xff] }
 0x100   :  { %6968 = vmatprep.subr.mxu0 %v676_v31  ;;  %6957 = vmatprep.subr.mxu1 %v7721_v12 }
 0x101   :  { %6969 = vmatpush3.msra.mxu0 %v676_v31  ;;  %6958 = vmatpush3.msra.mxu1 %v581_v48 }
 0x102   :  { %6970 = vmatprep.subr.mxu0 %v675_v33  ;;  %6959 = vmatprep.subr.mxu1 %v7721_v12 }
 0x103   :  { %6971 = vmatpush3.msra.mxu0 %v675_v33  ;;  %6960 = vmatpush3.msra.mxu1 %v580_v49 }
 0x104   :  { %6972 = vmatprep.subr.mxu0 %v674_v36  ;;  %6983 = vmatprep.subr.mxu1 %v776_v50 }
 0x105   :  { %6973 = vmatpush3.msra.mxu0 %v674_v36 }
 0x106   :  { %6974 = vmatprep.subr.mxu0 %v673_v37 }
 0x107   :  { %6975 = vmatpush3.msra.mxu0 %v673_v37 }
 0x108   :  { %6976 = vmatprep.subr.mxu0 %v672_v39 }
 0x109   :  { %6977 = vmatpush3.msra.mxu0 %v672_v39  ;;  %v1329_v39 = vld [vmem:[%s9332_s8 + $0x10] sm:$0xff] }
 0x10a   :  { %6978 = vmatprep.subr.mxu0 %v671_v41 }
 0x10b   :  { %6979 = vmatpush3.msra.mxu0 %v671_v41  ;;  %v1328_v41 = vld [vmem:[%s9332_s8 + $0x8] sm:$0xff]  ;;  %s9359_s8 = sld [smem:[#allocation49_spill]] }
 0x10c   :  { %6981 = vmatmul.mubr.msk.f32.vlgmr.msra.gmra.mxu0 %vm505_vm3, %v670_v44  ;;  %v1617_v44 = vld [vmem:[%s9333_s19 + $0x18] sm:$0xff] }
 0x10d   :  { %7004 = vmatprep.mubr.msk.f32.mxu0 %vm867_vm5, %v8014_v10 }
 0x1ac   :  { %v8104_v51 = vpop.f32.mrf.mxu0 }
 0x1ae   :  { %v6916_v52 = vpop.f32.mrf.mxu0 }
 0x1b1   :  { %v8115_v1 = vpop.f32.mrf.mxu1 }
 0x1b3   :  { %v6925_v2 = vpop.f32.mrf.mxu1 }
 0x1bc   :  { %v575_v54 = vpop.f32.mrf.mxu0 }
 0x1bd   :  { %v576_v55 = vadd.f32 %v6503_v53, %v575_v54 }
 0x1be   :  { %v6944_v56 = vpop.f32.mrf.mxu0 }
 0x1bf   :  { %v579_v57 = vmax.f32 %v576_v55, 0.0  ;;  %v6522_v55 = vld [vmem:[%s9335_s20] ss:$0 sm:$0xff]  ;;  %s9365_s20 = sld [smem:[#allocation52_spill]] }
 0x1c1   :  { %6962 = vmatmul.mubr.msk.f32.vlgmr.msra.gmra.mxu1 %vm505_vm3, %v579_v57 }
 0x1c2   :  { %6984 = vmatpush3.msra.mxu1 %v776_v50  ;;  %v6521_v50 = vld [vmem:[%s9334_s30] ss:$0 sm:$0xff]  ;;  %s9363_s30 = sld [smem:[#allocation51_spill]] }
 0x1c3   :  { %6985 = vmatprep.subr.mxu1 %v775_v58 }
 0x1c4   :  { %6986 = vmatpush3.msra.mxu1 %v775_v58 }
 0x1c5   :  { %6987 = vmatprep.subr.mxu1 %v774_v59 }
 0x1c6   :  { %6988 = vmatpush3.msra.mxu1 %v774_v59 }
 0x1c7   :  { %6989 = vmatprep.subr.mxu1 %v773_v60 }
 0x1c8   :  { %6990 = vmatpush3.msra.mxu1 %v773_v60 }
 0x1c9   :  { %6991 = vmatprep.subr.mxu1 %v772_v61 }
 0x1ca   :  { %6992 = vmatpush3.msra.mxu1 %v772_v61 }
 0x1cb   :  { %6993 = vmatprep.subr.mxu1 %v771_v62 }
 0x1cc   :  { %6994 = vmatpush3.msra.mxu1 %v771_v62  ;;  %v6982_v4 = vpop.f32.mrf.mxu0 }
 0x1cd   :  { %6995 = vmatprep.subr.mxu1 %v770_v63  ;;  %v764_v5 = vadd.f32 %v6982_v4, %v6507_v3 }
 0x1ce   :  { %6996 = vmatpush3.msra.mxu1 %v770_v63  ;;  %v758_v6 = vpop.f32.mrf.mxu0 }
 0x1cf   :  { %6997 = vmatprep.subr.mxu1 %v769_v0  ;;  %v759_v7 = vadd.f32 %v6507_v3, %v758_v6  ;;  %v768_v8 = vmax.f32 %v764_v5, 0.0  ;;  %v6529_v6 = vld [vmem:[%s9337_s2] ss:$0 sm:$0xff] }
 0x1d0   :  { %6998 = vmatpush3.msra.mxu1 %v769_v0  ;;  %v6528_v0 = vld [vmem:[%s9336_s22] ss:$0 sm:$0xff]  ;;  %s9373_s22 = sld [smem:[#allocation55_spill]] }
 0x1d1   :  { %v767_v9 = vmax.f32 %v759_v7, 0.0 }
 0x1d3   :  { %6999 = vmatprep.mubr.msk.f32.mxu1 %vm505_vm3, %v767_v9 }
 0x1d4   :  { %7000 = vmatmul.mubr.msk.f32.vlgmr.msra.gmra.mxu1 %vm505_vm3, %v768_v8  ;;  %vm1525_vm3 = vcmp.gt.f32.partialorder %v8025_v14, 0.0 }
 0x1d5   :  { %7009 = vmatprep.mubr.msk.f32.mxu1 %vm867_vm5, %v8022_v13 }
 0x281   :  { %v664_v16 = vpop.f32.mrf.mxu1 }
 0x282   :  { %v665_v17 = vadd.f32 %v6505_v15, %v664_v16 }
 0x283   :  { %v6963_v18 = vpop.f32.mrf.mxu1 }
 0x284   :  { %v8125_v19 = vmax.f32 %v665_v17, 0.0 }
 0x286   :  { %7002 = vmatprep.subr.mxu0 %v8125_v19  ;;  %7007 = vmatprep.subr.mxu1 %v8125_v19 }
 0x287   :  { %7003 = vmatpush3.msra.mxu0 %v8125_v19  ;;  %7008 = vmatpush3.msra.mxu1 %v8125_v19 }
 0x288   :  { %7005 = vmatmul.mubr.msk.f32.vlgmr.msra.gmra.mxu0 %vm867_vm5, %v8025_v14  ;;  %7010 = vmatmul.mubr.msk.f32.vlgmr.msra.gmra.mxu1 %vm867_vm5, %v8017_v11 }
 0x289   :  { %7012 = vmatprep.subr.mxu0 %v1036_v21  ;;  %7023 = vmatprep.subr.mxu1 %v1032_v22 }
 0x28a   :  { %7013 = vmatpush3.msra.mxu0 %v1036_v21  ;;  %7024 = vmatpush3.msra.mxu1 %v1032_v22  ;;  %v7723_v21 = vmov 0   ;;  %v6523_v22 = vld [vmem:[#allocation2] ss:$0 sm:$0xff] }
 0x28b   :  { %7014 = vmatprep.subr.mxu0 %v1035_v23  ;;  %7025 = vmatprep.subr.mxu1 %v1031_v24 }
 0x28c   :  { %7015 = vmatpush3.msra.mxu0 %v1035_v23  ;;  %7026 = vmatpush3.msra.mxu1 %v1031_v24 }
 0x28d   :  { %7016 = vmatprep.subr.mxu0 %v1034_v25  ;;  %7027 = vmatprep.subr.mxu1 %v1030_v26 }
 0x28e   :  { %7017 = vmatpush3.msra.mxu0 %v1034_v25  ;;  %7028 = vmatpush3.msra.mxu1 %v1030_v26 }
 0x28f   :  { %7018 = vmatprep.subr.mxu0 %v1033_v27  ;;  %7029 = vmatprep.subr.mxu1 %v1029_v28 }
 0x290   :  { %7019 = vmatpush3.msra.mxu0 %v1033_v27  ;;  %7030 = vmatpush3.msra.mxu1 %v1029_v28 }
 0x291   :  { %7034 = vmatprep.subr.mxu0 %v1334_v29  ;;  %7045 = vmatprep.subr.mxu1 %v1330_v30 }
 0x292   :  { %7492 = vset.pattern.permute.xlu0 %v7723_v21  ;;  %7493 = vset.pattern.permute.xlu1 %v7723_v21 }
 0x294   :  { %v8145_v31 = vpop.f32.mrf.mxu1 }
 0x296   :  { %v8147_v32 = vpop.f32.mrf.mxu1 }
 0x348   :  { %v7006_v33 = vpop.f32.mrf.mxu0  ;;  %v8149_v34 = vpop.f32.mrf.mxu1 }
 0x34a   :  { %v940_v36 = vpop.f32.mrf.mxu0  ;;  %v8151_v37 = vpop.f32.mrf.mxu1 }
 0x34b   :  { %7020 = vmatprep.mubr.msk.f32.mxu0 %vm1037_vm6, %v940_v36  ;;  %7031 = vmatprep.mubr.msk.f32.mxu1 %vm1037_vm6, %v8151_v37 }
 0x34c   :  { %7021 = vmatmul.mubr.msk.f32.vlgmr.msra.gmra.mxu0 %vm1037_vm6, %v7006_v33  ;;  %7032 = vmatmul.mubr.msk.f32.vlgmr.msra.gmra.mxu1 %vm1037_vm6, %v8149_v34 }
 0x34d   :  { %7035 = vmatpush3.msra.mxu0 %v1334_v29  ;;  %7046 = vmatpush3.msra.mxu1 %v1330_v30 }
 0x34e   :  { %7036 = vmatprep.subr.mxu0 %v1333_v38  ;;  %7042 = vmatprep.mubr.msk.f32.mxu0 %vm1037_vm6, %v8151_v37 }
 0x34f   :  { %7047 = vmatprep.subr.mxu1 %v1329_v39  ;;  %7053 = vmatprep.mubr.msk.f32.mxu1 %vm1037_vm6, %v940_v36 }
 0x350   :  { %7037 = vmatpush3.msra.mxu0 %v1333_v38  ;;  %7048 = vmatpush3.msra.mxu1 %v1329_v39 }
 0x351   :  { %7038 = vmatprep.subr.mxu0 %v1332_v40  ;;  %7049 = vmatprep.subr.mxu1 %v1328_v41 }
 0x352   :  { %7039 = vmatpush3.msra.mxu0 %v1332_v40  ;;  %7050 = vmatpush3.msra.mxu1 %v1328_v41 }
 0x353   :  { %7040 = vmatprep.subr.mxu0 %v1331_v42  ;;  %7051 = vmatprep.subr.mxu1 %v1327_v43 }
 0x354   :  { %7041 = vmatpush3.msra.mxu0 %v1331_v42  ;;  %7052 = vmatpush3.msra.mxu1 %v1327_v43 }
 0x355   :  { %7043 = vmatmul.mubr.msk.f32.vlgmr.msra.gmra.mxu0 %vm1037_vm6, %v8149_v34  ;;  %7054 = vmatmul.mubr.msk.f32.vlgmr.msra.gmra.mxu1 %vm1037_vm6, %v7006_v33 }
 0x356   :  { %7067 = vmatprep.subr.mxu1 %v1617_v44  ;;  %7075 = vmatprep.mubr.msk.f32.mxu1 %vm1037_vm6, %v940_v36 }
 0x357   :  { %7068 = vmatpush3.msra.mxu1 %v1617_v44 }
 0x358   :  { %7069 = vmatprep.subr.mxu1 %v1616_v45 }
 0x359   :  { %7070 = vmatpush3.msra.mxu1 %v1616_v45 }
 0x35a   :  { %7071 = vmatprep.subr.mxu1 %v1615_v46 }
 0x35b   :  { %7072 = vmatpush3.msra.mxu1 %v1615_v46 }
 0x35c   :  { %7073 = vmatprep.subr.mxu1 %v1614_v47 }
 0x35d   :  { %7074 = vmatpush3.msra.mxu1 %v1614_v47 }
 0x35e   :  { %7076 = vmatmul.mubr.msk.f32.vlgmr.msra.gmra.mxu1 %vm1037_vm6, %v7006_v33  ;;  %v6530_v33 = vld [vmem:[#allocation3] ss:$0 sm:$0xff] }
 0x35f   :  { %7087 = vmatprep.mubr.msk.f32.mxu1 %vm867_vm5, %v8014_v10 }
 0x40c   :  { %v7022_v48 = vpop.f32.mrf.mxu0  ;;  %v7033_v49 = vpop.f32.mrf.mxu1 }
 0x40d   :  { %v1197_v52 = vadd.f32 %v7033_v49, %v7022_v48 }
 0x40e   :  { %v1110_v53 = vpop.f32.mrf.mxu0  ;;  %v1191_v54 = vpop.f32.mrf.mxu1 }
 0x40f   :  { %v8181_v56 = vadd.f32 %v6521_v50, %v1197_v52  ;;  %v1192_v57 = vadd.f32 %v1191_v54, %v1110_v53 }
 0x411   :  { %v8183_v58 = vadd.f32 %v6521_v50, %v1192_v57  ;;  %v1217_v59 = vmul.f32 %v6522_v55, %v8181_v56 }
 0x413   :  { %v1222_v60 = vsel %vm1221_vm7, %v1217_v59, 0.0  ;;  %v1216_v61 = vmul.f32 %v6522_v55, %v8183_v58 }
 0x414   :  { %1223 = vadd.xlane.f32.xlu1 %v1222_v60 }
 0x415   :  { %v7044_v62 = vpop.f32.mrf.mxu0  ;;  %v7055_v63 = vpop.f32.mrf.mxu1  ;;  %v1218_v2 = vsel %vm1037_vm6, %v1216_v61, 0.0 }
 0x416   :  { %v1482_v3 = vadd.f32 %v7055_v63, %v7044_v62  ;;  %1219 = vadd.xlane.f32.xlu0 %v1218_v2 }
 0x417   :  { %v1401_v4 = vpop.f32.mrf.mxu0  ;;  %v1476_v5 = vpop.f32.mrf.mxu1 }
 0x418   :  { %v8191_v7 = vadd.f32 %v6528_v0, %v1482_v3  ;;  %v1477_v8 = vadd.f32 %v1476_v5, %v1401_v4 }
 0x41a   :  { %v8193_v9 = vadd.f32 %v6528_v0, %v1477_v8  ;;  %v1502_v15 = vmul.f32 %v6529_v6, %v8191_v7 }
 0x41c   :  { %v1506_v16 = vsel %vm1221_vm7, %v1502_v15, 0.0  ;;  %v1501_v17 = vmul.f32 %v6529_v6, %v8193_v9 }
 0x41d   :  { %1507 = vadd.xlane.f32.xlu0 %v1506_v16 }
 0x41e   :  { %v1503_v18 = vsel %vm1037_vm6, %v1501_v17, 0.0 }
 0x41f   :  { %1504 = vadd.xlane.f32.xlu1 %v1503_v18 }
 0x49d   :  { %v1224_v23 = vpop.xlane.xlu1 %1223 }
 0x49e   :  { %v1233_v24 = vadd.f32 %v6523_v22, %v1224_v23 }
 0x49f   :  { %v1220_v25 = vpop.xlane.xlu0 %1219 }
 0x4a0   :  { %v1232_v26 = vadd.f32 %v6523_v22, %v1220_v25  ;;  %vm1235_vm8 = vcmp.gt.f32.partialorder %v1233_v24, 0.0  ;;  %v1237_v27 = vmul.f32 0.2, %v1233_v24 }
 0x4a2   :  { %v8199_v28 = vsel %vm1235_vm8, %v1233_v24, %v1237_v27  ;;  %vm1234_vm9 = vcmp.gt.f32.partialorder %v1232_v26, 0.0  ;;  %v1236_v29 = vmul.f32 0.2, %v1232_v26 }
 0x4a3   :  { %1249 = vperm.xlu0 %7492, %v8199_v28  }
 0x4a4   :  { %v8202_v30 = vsel %vm1234_vm9, %v1232_v26, %v1236_v29 }
 0x4a5   :  { %1244 = vperm.xlu1 %7493, %v8202_v30  }
 0x4a6   :  { %v1508_v36 = vpop.xlane.xlu0 %1507 }
 0x4a7   :  { %v1517_v39 = vadd.f32 %v6530_v33, %v1508_v36 }
 0x4a8   :  { %v1505_v38 = vpop.xlane.xlu1 %1504 }
 0x4a9   :  { %v1516_v40 = vadd.f32 %v6530_v33, %v1505_v38  ;;  %v1521_v43 = vmul.f32 0.2, %v1517_v39  ;;  %vm1519_vm11 = vcmp.gt.f32.partialorder %v1517_v39, 0.0 }
 0x4ab   :  { %vm1518_vm10 = vcmp.gt.f32.partialorder %v1516_v40, 0.0  ;;  %v1520_v41 = vmul.f32 0.2, %v1516_v40  ;;  %v1523_v44 = vsel %vm1519_vm11, %v1517_v39, %v1521_v43 }
 0x4ad   :  { %v1522_v42 = vsel %vm1518_vm10, %v1516_v40, %v1520_v41  ;;  %vm9280_vm10 = vcmp.gt.f32.partialorder %v8104_v51, 0.0 }
 0x4ae   :  { %1528 = vperm.xlu1 %7493, %v1522_v42  }
 0x4b2   :  { %1533 = vperm.xlu1 %7493, %v1523_v44  }
 0x51e   :  { %v1250_v45 = vpop.permute.xlu0 %1249 }
 0x51f   :  { %v1253_v46 = vsel %vm1241_vm12, %v1250_v45, -1e+30 }
 0x520   :  { %v1245_v47 = vpop.permute.xlu1 %1244  ;;  %v1256_v49 = vsel %vm1255_vm14, %v1253_v46, -inf }
 0x521   :  { %v1252_v48 = vsel %vm1240_vm13, %v1245_v47, -1e+30 }
 0x522   :  { %v1254_v50 = vsel %vm867_vm5, %v1252_v48, -inf }
 0x523   :  { %v1257_v52 = vmax.f32 %v1254_v50, %v1256_v49 }
 0x525   :  { %v1258_v53 = vrot.slane %v1257_v52, 4 }
 0x527   :  { %v1259_v54 = vmax.f32 %v1257_v52, %v1258_v53 }
 0x529   :  { %v1260_v55 = vrot.slane %v1259_v54, 2  ;;  %v1529_v57 = vpop.permute.xlu1 %1528 }
 0x52a   :  { %v1536_v60 = vsel %vm1524_vm15, %v1529_v57, -1e+30 }
 0x52b   :  { %v1261_v59 = vmax.f32 %v1259_v54, %v1260_v55  ;;  %v1538_v0 = vsel %vm867_vm5, %v1536_v60, -inf }
 0x52d   :  { %v1534_v61 = vpop.permute.xlu1 %1533  ;;  %v1262_v62 = vrot.slane %v1261_v59, 1 }
 0x52e   :  { %v1537_v63 = vsel %vm1525_vm3, %v1534_v61, -1e+30 }
 0x52f   :  { %v1539_v2 = vsel %vm1255_vm14, %v1537_v63, -inf  ;;  %v1263_v3 = vmax.f32 %v1261_v59, %v1262_v62 }
 0x530   :  { %v1540_v4 = vmax.f32 %v1538_v0, %v1539_v2 }
 0x531   :  { %v1265_v5 = vmul.f32 %v1263_v3, %v8017_v11  ;;  %v1264_v6 = vmul.f32 %v1263_v3, %v8022_v13 }
 0x532   :  { %v1541_v8 = vrot.slane %v1540_v4, 4 }
 0x533   :  { %v1269_v15 = vsel %vm1255_vm14, %v1265_v5, 0.0  ;;  %v1266_v16 = vsel %vm867_vm5, %v1264_v6, 0.0 }
 0x534   :  { %v1542_v17 = vmax.f32 %v1540_v4, %v1541_v8  ;;  %1270 = vadd.xlane.f32.xlu0 %v1269_v15  ;;  %1267 = vadd.xlane.f32.xlu1 %v1266_v16 }
 0x536   :  { %v1543_v18 = vrot.slane %v1542_v17, 2 }
 0x538   :  { %v1544_v21 = vmax.f32 %v1542_v17, %v1543_v18 }
 0x53a   :  { %v1545_v22 = vrot.slane %v1544_v21, 1 }
 0x53c   :  { %v1546_v23 = vmax.f32 %v1544_v21, %v1545_v22 }
 0x53e   :  { %v1547_v24 = vmul.f32 %v1546_v23, %v8014_v10  ;;  %v1548_v26 = vmul.f32 %v1546_v23, %v8025_v14 }
 0x540   :  { %v1549_v25 = vsel %vm867_vm5, %v1547_v24, 0.0  ;;  %v1552_v27 = vsel %vm1255_vm14, %v1548_v26, 0.0 }
 0x541   :  { %1550 = vadd.xlane.f32.xlu1 %v1549_v25 }
 0x545   :  { %1553 = vadd.xlane.f32.xlu1 %v1552_v27 }
 0x5bd   :  { %v1271_v29 = vpop.xlane.xlu0 %1270  ;;  %v1268_v33 = vpop.xlane.xlu1 %1267 }
 0x5be   :  { %v1273_v36 = vsub.f32 %v8199_v28, %v1271_v29  ;;  %v1272_v38 = vsub.f32 %v8202_v30, %v1268_v33 }
 0x5c0   :  { %v1276_v39 = vmul.f32 1.442695, %v1273_v36  ;;  %v1274_v40 = vmul.f32 1.442695, %v1272_v38 }
 0x5c2   :  { %7494 = vpow2.f32 %v1276_v39 }
 0x5c3   :  { %7496 = vpow2.f32 %v1274_v40 }
 0x5ca   :  { %v1551_v41 = vpop.xlane.xlu1 %1550 }
 0x5cb   :  { %v1555_v43 = vsub.f32 %v1522_v42, %v1551_v41 }
 0x5cd   :  { %v1557_v45 = vmul.f32 1.442695, %v1555_v43 }
 0x5ce   :  { %v1554_v46 = vpop.xlane.xlu1 %1553 }
 0x5cf   :  { %v8231_v47 = vpop.eup %7494  ;;  %7498 = vpow2.f32 %v1557_v45  ;;  %v1556_v48 = vsub.f32 %v1523_v44, %v1554_v46 }
 0x5d0   :  { %v7497_v49 = vpop.eup %7496  ;;  %1285 = vperm.xlu0 %7492, %v8231_v47  }
 0x5d1   :  { %v1559_v50 = vmul.f32 1.442695, %v1556_v48  ;;  %1280 = vperm.xlu1 %7493, %v7497_v49  }
 0x5d3   :  { %7500 = vpow2.f32 %v1559_v50 }
 0x5dc   :  { %v7499_v28 = vpop.eup %7498 }
 0x5dd   :  { %1563 = vperm.xlu1 %7493, %v7499_v28  }
 0x5e0   :  { %v8234_v30 = vpop.eup %7500 }
 0x5e1   :  { %1568 = vperm.xlu1 %7493, %v8234_v30  }
 0x64b   :  { %v1286_v52 = vpop.permute.xlu0 %1285 }
 0x64c   :  { %v1289_v42 = vmul.f32 %v1286_v52, %v8017_v11  ;;  %v1281_v53 = vpop.permute.xlu1 %1280 }
 0x64d   :  { %v1288_v54 = vmul.f32 %v1281_v53, %v8022_v13 }
 0x64e   :  { %v1291_v44 = vsel %vm1255_vm14, %v1289_v42, 0.0 }
 0x64f   :  { %v1290_v55 = vsel %vm867_vm5, %v1288_v54, 0.0 }
 0x650   :  { %v1292_v57 = vadd.f32 %v1291_v44, %v1290_v55 }
 0x652   :  { %v1293_v59 = vrot.slane %v1292_v57, 4 }
 0x654   :  { %v1294_v60 = vadd.f32 %v1293_v59, %v1292_v57  ;;  %v1621_v57 = vld [vmem:[%s9333_s19 + $0x38] sm:$0xff] }
 0x655   :  { %7056 = vmatprep.subr.mxu0 %v1621_v57 }
 0x656   :  { %v1295_v61 = vrot.slane %v1294_v60, 2  ;;  %7057 = vmatpush3.msra.mxu0 %v1621_v57 }
 0x658   :  { %v1564_v62 = vpop.permute.xlu1 %1563  ;;  %v1296_v63 = vadd.f32 %v1295_v61, %v1294_v60  ;;  %v1620_v60 = vld [vmem:[%s9333_s19 + $0x30] sm:$0xff]  ;;  %v1619_v61 = vld [vmem:[%s9333_s19 + $0x28] sm:$0xff] }
 0x659   :  { %v1571_v2 = vmul.f32 %v1564_v62, %v8014_v10  ;;  %7058 = vmatprep.subr.mxu0 %v1620_v60 }
 0x65a   :  { %v1297_v0 = vrot.slane %v1296_v63, 1  ;;  %7059 = vmatpush3.msra.mxu0 %v1620_v60  ;;  %v2096_v60 = vld [vmem:[%s9341_s18 + $0x30] sm:$0xff] }
 0x65b   :  { %v1573_v8 = vsel %vm867_vm5, %v1571_v2, 0.0  ;;  %7060 = vmatprep.subr.mxu0 %v1619_v61 }
 0x65c   :  { %v1569_v3 = vpop.permute.xlu1 %1568  ;;  %v1298_v4 = vadd.f32 %v1297_v0, %v1296_v63  ;;  %7061 = vmatpush3.msra.mxu0 %v1619_v61  ;;  %v2095_v61 = vld [vmem:[%s9341_s18 + $0x28] sm:$0xff] }
 0x65d   :  { %v1572_v5 = vmul.f32 %v1569_v3, %v8025_v14 }
 0x65e   :  { %v1299_v6 = vmul.f32 %v1298_v4, %v8022_v13  ;;  %v1300_v36 = vmul.f32 %v1298_v4, %v8017_v11 }
 0x65f   :  { %v1574_v15 = vsel %vm1255_vm14, %v1572_v5, 0.0 }
 0x660   :  { %v1575_v16 = vadd.f32 %v1574_v15, %v1573_v8  ;;  %v1301_v17 = vsel %vm867_vm5, %v1299_v6, 0.0  ;;  %v1304_v38 = vsel %vm1255_vm14, %v1300_v36, 0.0 }
 0x661   :  { %1302 = vadd.xlane.f32.xlu1 %v1301_v17 }
 0x662   :  { %v1576_v18 = vrot.slane %v1575_v16, 4 }
 0x664   :  { %v1577_v21 = vadd.f32 %v1576_v18, %v1575_v16 }
 0x666   :  { %v1578_v22 = vrot.slane %v1577_v21, 2 }
 0x668   :  { %v1579_v23 = vadd.f32 %v1578_v22, %v1577_v21 }
 0x66a   :  { %v1580_v24 = vrot.slane %v1579_v23, 1 }
 0x66c   :  { %v1581_v25 = vadd.f32 %v1580_v24, %v1579_v23  ;;  %v6535_v24 = vld [vmem:[%s9339_s4] ss:$0 sm:$0xff] }
 0x66e   :  { %v1583_v26 = vmul.f32 %v1581_v25, %v8025_v14  ;;  %v1582_v27 = vmul.f32 %v1581_v25, %v8014_v10 }
 0x670   :  { %v1587_v29 = vsel %vm1255_vm14, %v1583_v26, 0.0  ;;  %v1584_v33 = vsel %vm867_vm5, %v1582_v27, 0.0  ;;  %v6536_v27 = vld [vmem:[%s9340_s15] ss:$0 sm:$0xff] }
 0x671   :  { %1588 = vadd.xlane.f32.xlu1 %v1587_v29  ;;  %1585 = vadd.xlane.f32.xlu0 %v1584_v33 }
 0x675   :  { %1305 = vadd.xlane.f32.xlu0 %v1304_v38 }
 0x6ea   :  { %v1303_v39 = vpop.xlane.xlu1 %1302 }
 0x6eb   :  { %v1307_v40 = vadd.f32 1e-16, %v1303_v39 }
 0x6ed   :  { %7502 = vrcp.f32 %v1307_v40 }
 0x6fa   :  { %v7503_v41 = vpop.eup %7502  ;;  %v1586_v43 = vpop.xlane.xlu0 %1585 }
 0x6fb   :  { %v1310_v45 = vmul.f32 %v7503_v41, %v7497_v49  ;;  %v1590_v48 = vadd.f32 1e-16, %v1586_v43  ;;  %v1589_v52 = vpop.xlane.xlu1 %1588  ;;  %v6537_v43 = vld [vmem:[#allocation4] ss:$0 sm:$0xff] }
 0x6fc   :  { %v1591_v42 = vadd.f32 1e-16, %v1589_v52 }
 0x6fd   :  { %1315 = vperm.xlu0 %7492, %v1310_v45  }
 0x6fe   :  { %v1306_v46 = vpop.xlane.xlu0 %1305 }
 0x6ff   :  { %v1308_v50 = vadd.f32 1e-16, %v1306_v46 }
 0x701   :  { %7504 = vrcp.f32 %v1308_v50 }
 0x702   :  { %7506 = vrcp.f32 %v1590_v48 }
 0x703   :  { %7508 = vrcp.f32 %v1591_v42 }
 0x70e   :  { %v7505_v53 = vpop.eup %7504 }
 0x70f   :  { %v1312_v54 = vmul.f32 %v7505_v53, %v8231_v47  ;;  %v7507_v44 = vpop.eup %7506  ;;  %v1618_v47 = vld [vmem:[%s9333_s19 + $0x20] sm:$0xff]  ;;  %s9360_s19 = sld [smem:[#allocation50_spill]] }
 0x710   :  { %v1593_v55 = vmul.f32 %v7507_v44, %v7499_v28  ;;  %v7509_v49 = vpop.eup %7508  ;;  %7062 = vmatprep.subr.mxu0 %v1618_v47  ;;  %v6510_v28 = vld [vmem:[%s9338_s6] ss:$0 sm:$0xff] }
 0x711   :  { %1320 = vperm.xlu1 %7493, %v1312_v54   ;;  %v1595_v59 = vmul.f32 %v7509_v49, %v8234_v30  ;;  %7063 = vmatpush3.msra.mxu0 %v1618_v47  ;;  %v857_v0 = vadd.f32 %v6510_v28, %v8147_v32  ;;  %v862_v3 = vadd.f32 %v8145_v31, %v6510_v28  ;;  %v2094_v47 = vld [vmem:[%s9341_s18 + $0x20] sm:$0xff] }
 0x712   :  { %7078 = vmatprep.subr.mxu0 %v7721_v12 }
 0x713   :  { %v865_v4 = vmax.f32 %v857_v0, 0.0  ;;  %v866_v17 = vmax.f32 %v862_v3, 0.0 }
 0x715   :  { %1598 = vperm.xlu1 %7493, %v1593_v55  }
 0x719   :  { %1603 = vperm.xlu1 %7493, %v1595_v59   ;;  %v2097_v59 = vld [vmem:[%s9341_s18 + $0x38] sm:$0xff] }
 0x778   :  { %v1316_v62 = vpop.permute.xlu0 %1315 }
 0x779   :  { %v1323_v30 = vmul.f32 %v1316_v62, %v8183_v58 }
 0x77b   :  { %v1325_v6 = vadd.f32 %v1323_v30, %v865_v4  ;;  %v1904_v30 = vlaneseq }
 0x78c   :  { %v1321_v63 = vpop.permute.xlu1 %1320 }
 0x78d   :  { %v1324_v8 = vmul.f32 %v1321_v63, %v8181_v56  ;;  %v7077_v56 = vpop.f32.mrf.mxu1 }
 0x78f   :  { %v1326_v32 = vadd.f32 %v1324_v8, %v866_v17  ;;  %v1769_v25 = vpop.f32.mrf.mxu1 }
 0x790   :  { %v1599_v2 = vpop.permute.xlu1 %1598 }
 0x791   :  { %v1606_v5 = vmul.f32 %v1599_v2, %v8193_v9  ;;  %v8309_v2 = vand.u32 127, %v1904_v30 }
 0x793   :  { %v1608_v15 = vadd.f32 %v1606_v5, %v865_v4 }
 0x794   :  { %v1604_v16 = vpop.permute.xlu1 %1603 }
 0x795   :  { %v1610_v18 = vadd.f32 %v1608_v15, %v1325_v6  ;;  %v1607_v21 = vmul.f32 %v1604_v16, %v8191_v7 }
 0x797   :  { %v8267_v22 = vmul.f32 0.5, %v1610_v18  ;;  %v1609_v58 = vadd.f32 %v1607_v21, %v866_v17 }
 0x799   :  { %v1611_v23 = vadd.f32 %v1609_v58, %v1326_v32  ;;  %7064 = vmatprep.mubr.msk.f32.mxu0 %vm1037_vm6, %v8267_v22 }
 0x79b   :  { %v8271_v31 = vmul.f32 0.5, %v1611_v23 }
 0x79d   :  { %7065 = vmatmul.mubr.msk.f32.vlgmr.msra.gmra.mxu0 %vm1037_vm6, %v8271_v31 }
 0x79e   :  { %7082 = vmatprep.mubr.msk.f32.mxu0 %vm7722_vm1, %v7721_v12 }
 0x85d   :  { %v7066_v9 = vpop.f32.mrf.mxu0 }
 0x85e   :  { %v1775_v7 = vadd.f32 %v7077_v56, %v7066_v9 }
 0x85f   :  { %v1694_v26 = vpop.f32.mrf.mxu0 }
 0x860   :  { %v8279_v29 = vadd.f32 %v6535_v24, %v1775_v7  ;;  %v1770_v33 = vadd.f32 %v1769_v25, %v1694_v26 }
 0x862   :  { %v8281_v36 = vadd.f32 %v6535_v24, %v1770_v33  ;;  %v1795_v38 = vmul.f32 %v6536_v27, %v8279_v29 }
 0x864   :  { %v1799_v39 = vsel %vm1221_vm7, %v1795_v38, 0.0  ;;  %v1794_v40 = vmul.f32 %v6536_v27, %v8281_v36 }
 0x865   :  { %1800 = vadd.xlane.f32.xlu0 %v1799_v39 }
 0x866   :  { %v1796_v41 = vsel %vm1037_vm6, %v1794_v40, 0.0 }
 0x867   :  { %1797 = vadd.xlane.f32.xlu1 %v1796_v41 }
 0x8ee   :  { %v1801_v45 = vpop.xlane.xlu0 %1800 }
 0x8ef   :  { %v1810_v46 = vadd.f32 %v6537_v43, %v1801_v45 }
 0x8f0   :  { %v1798_v48 = vpop.xlane.xlu1 %1797 }
 0x8f1   :  { %v1809_v50 = vadd.f32 %v6537_v43, %v1798_v48  ;;  %vm1812_vm8 = vcmp.gt.f32.partialorder %v1810_v46, 0.0  ;;  %v1814_v52 = vmul.f32 0.2, %v1810_v46 }
 0x8f3   :  { %v1816_v42 = vsel %vm1812_vm8, %v1810_v46, %v1814_v52  ;;  %vm1811_vm9 = vcmp.gt.f32.partialorder %v1809_v50, 0.0  ;;  %v1813_v53 = vmul.f32 0.2, %v1809_v50 }
 0x8f4   :  { %1824 = vperm.xlu0 %7492, %v1816_v42  }
 0x8f5   :  { %v1815_v54 = vsel %vm1811_vm9, %v1809_v50, %v1813_v53 }
 0x8f6   :  { %1819 = vperm.xlu1 %7493, %v1815_v54  }
 0x96f   :  { %v1825_v44 = vpop.permute.xlu0 %1824 }
 0x970   :  { %v1828_v55 = vmul.f32 %v1825_v44, %v8017_v11  ;;  %v2093_v44 = vld [vmem:[%s9341_s18 + $0x18] sm:$0xff] }
 0x971   :  { %v1820_v49 = vpop.permute.xlu1 %1819 }
 0x972   :  { %v1827_v57 = vmul.f32 %v1820_v49, %v8022_v13  ;;  %7079 = vmatpush3.msk.msra.mxu0 %vm309_vm0, %v1828_v55  ;;  %v2092_v55 = vld [vmem:[%s9341_s18 + $0x10] sm:$0xff]  ;;  %v8322_v49 = vld [vmem:[%s7746_s13 + $0x8] sm:$0xf] }
 0x973   :  { %7080 = vmatprep.subr.mxu0 %v7721_v12 }
 0x974   :  { %7081 = vmatpush3.msra.mxu0 %v1827_v57  ;;  %v2091_v57 = vld [vmem:[%s9341_s18 + $0x8] sm:$0xff] }
 0x975   :  { %7083 = vmatmul.mubr.msk.f32.vlgmr.msra.gmra.mxu0 %vm9287_vm2, %v8044_v20  ;;  %7090 = vmatprep.subr.mxu0 %v2097_v59 }
 0x976   :  { %7091 = vmatpush3.msra.mxu0 %v2097_v59  ;;  %7098 = vmatprep.mubr.msk.f32.mxu0 %vm1037_vm6, %v8267_v22  ;;  %v2090_v59 = vld [vmem:[%s9341_s18] sm:$0xff] }
 0x977   :  { %7092 = vmatprep.subr.mxu0 %v2096_v60 }
 0x978   :  { %7093 = vmatpush3.msra.mxu0 %v2096_v60  ;;  %v8333_v60 = vld [vmem:[%s7746_s13] sm:$0xff] }
 0x979   :  { %7094 = vmatprep.subr.mxu0 %v2095_v61 }
 0x97a   :  { %7095 = vmatpush3.msra.mxu0 %v2095_v61 }
 0x97b   :  { %7096 = vmatprep.subr.mxu0 %v2094_v47 }
 0x97c   :  { %7097 = vmatpush3.msra.mxu0 %v2094_v47 }
 0x97d   :  { %7099 = vmatmul.mubr.msk.f32.vlgmr.msra.gmra.mxu0 %vm1037_vm6, %v8271_v31  ;;  %7112 = vmatprep.subr.mxu0 %v7721_v12 }
 0x97e   :  { %7116 = vmatprep.mubr.msk.f32.mxu0 %vm7722_vm1, %v7721_v12 }
 0xa35   :  { %v1898_v28 = vpop.f32.mrf.mxu0 }
 0xa36   :  { %v1903_v62 = vsel %vm9280_vm10, %v1898_v28, -1e+15 }
 0xa37   :  { %v7084_v63 = vpop.f32.mrf.mxu0  ;;  %v1906_v0 = vsel %vm867_vm5, %v1903_v62, -inf }
 0xa38   :  { %1907 = vmax.xlane.f32.xlu0 %v1906_v0 }
 0xac1   :  { %v1908_v3 = vpop.xlane.xlu0 %1907 }
 0xac2   :  { %vm1909_vm11 = vcmp.eq.f32.partialorder %v1903_v62, %v1908_v3 }
 0xac3   :  { %v1910_v4 = vsel %vm1909_vm11, %v8309_v2, 8 }
 0xac4   :  { %v1911_v5 = vsel %vm867_vm5, %v1910_v4, 2147483647  ;;  %v6547_v4 = vld [vmem:[%s9343_s28] ss:$0 sm:$0xff] }
 0xac5   :  { %v1913_v6 = vshra.s32 %v1911_v5, 16  ;;  %v1912_v15 = vand.u32 65535, %v1911_v5 }
 0xac7   :  { %v1915_v8 = vcvt.s32.f32 %v1913_v6  ;;  %v1914_v17 = vcvt.s32.f32 %v1912_v15 }
 0xac9   :  { %1916 = vmin.xlane.f32.xlu1 %v1915_v8 }
 0xb52   :  { %v1917_v16 = vpop.xlane.xlu1 %1916 }
 0xb53   :  { %vm1918_vm8 = vcmp.eq.f32.partialorder %v1915_v8, %v1917_v16  ;;  %v1923_v21 = vcvt.f32.s32 %v1917_v16 }
 0xb54   :  { %v1919_v18 = vsel %vm1918_vm8, %v1914_v17, inf }
 0xb55   :  { %1920 = vmin.xlane.f32.xlu0 %v1919_v18  ;;  %v1924_v58 = vshll.u32 %v1923_v21, 16  ;;  %v6548_v18 = vld [vmem:[#allocation5] ss:$0 sm:$0xff] }
 0xbde   :  { %v1921_v32 = vpop.xlane.xlu0 %1920 }
 0xbdf   :  { %v1922_v23 = vcvt.f32.s32 %v1921_v32 }
 0xbe1   :  { %v1925_v56 = vadd.s32 %v1924_v58, %v1922_v23 }
 0xbe3   :  { %vm1926_vm9 = vcmp.eq.s32.totalorder %v8309_v2, %v1925_v56 }
 0xbe4   :  { %v1927_v9 = vsel %vm1926_vm9, -1e+15, %v1903_v62 }
 0xbe5   :  { %v1928_v24 = vsel %vm867_vm5, %v1927_v9, -inf }
 0xbe6   :  { %1929 = vmax.xlane.f32.xlu0 %v1928_v24 }
 0xc6f   :  { %v1930_v7 = vpop.xlane.xlu0 %1929 }
 0xc70   :  { %vm1931_vm11 = vcmp.eq.f32.partialorder %v1927_v9, %v1930_v7 }
 0xc71   :  { %v1932_v25 = vsel %vm1931_vm11, %v8309_v2, 8 }
 0xc72   :  { %v1933_v26 = vsel %vm867_vm5, %v1932_v25, 2147483647 }
 0xc73   :  { %v1935_v27 = vshra.s32 %v1933_v26, 16  ;;  %v1934_v38 = vand.u32 65535, %v1933_v26  ;;  %v8352_v26 = vld [vmem:[%s7751_s17 + $0x8] sm:$0xf] }
 0xc75   :  { %v1937_v33 = vcvt.s32.f32 %v1935_v27  ;;  %v1936_v40 = vcvt.s32.f32 %v1934_v38  ;;  %v8356_v38 = vld [vmem:[%s7751_s17] sm:$0xff] }
 0xc77   :  { %1938 = vmin.xlane.f32.xlu0 %v1937_v33 }
 0xd00   :  { %v1939_v39 = vpop.xlane.xlu0 %1938 }
 0xd01   :  { %vm1940_vm8 = vcmp.eq.f32.partialorder %v1937_v33, %v1939_v39  ;;  %v1945_v43 = vcvt.f32.s32 %v1939_v39 }
 0xd02   :  { %v1941_v41 = vsel %vm1940_vm8, %v1936_v40, inf  ;;  %v8369_v40 = vld [vmem:[%s7756_s21] sm:$0xff] }
 0xd03   :  { %1942 = vmin.xlane.f32.xlu1 %v1941_v41  ;;  %v1946_v46 = vshll.u32 %v1945_v43, 16  ;;  %v8376_v41 = vld [vmem:[%s7756_s21 + $0x8] sm:$0xff]  ;;  %v8383_v43 = vld [vmem:[%s7756_s21 + $0x10] sm:$0xff] }
 0xd8c   :  { %v1943_v45 = vpop.xlane.xlu1 %1942 }
 0xd8d   :  { %v1944_v48 = vcvt.f32.s32 %v1943_v45  ;;  %v2746_v45 = vld [vmem:[%s9344_s26 + $0x38] sm:$0xff] }
 0xd8f   :  { %v1947_v50 = vadd.s32 %v1946_v46, %v1944_v48  ;;  %v2745_v46 = vld [vmem:[%s9344_s26 + $0x30] sm:$0xff] }
 0xd91   :  { %vm1948_vm9 = vcmp.eq.s32.totalorder %v8309_v2, %v1947_v50 }
 0xd92   :  { %v1949_v52 = vsel %vm1948_vm9, -1e+15, %v1927_v9 }
 0xd93   :  { %v1950_v42 = vsel %vm867_vm5, %v1949_v52, -inf }
 0xd94   :  { %1951 = vmax.xlane.f32.xlu0 %v1950_v42 }
 0xe1d   :  { %v1952_v53 = vpop.xlane.xlu0 %1951 }
 0xe1e   :  { %vm1953_vm11 = vcmp.le.f32.partialorder %v1903_v62, %v1952_v53 }
 0xe1f   :  { %v1954_v54 = vsel %vm1953_vm11, -1e+15, %v1903_v62  ;;  %v6546_v62 = vld [vmem:[%s9342_s23] ss:$0 sm:$0xff] }
 0xe20   :  { %7085 = vmatprep.subr.mxu1 %v1954_v54 }
 0xe21   :  { %7086 = vmatpush3.msra.mxu1 %v1954_v54 }
 0xe22   :  { %7088 = vmatmul.mubr.msk.f32.vlgmr.msra.gmra.mxu1 %vm867_vm5, %v8322_v49  ;;  %7101 = vmatprep.subr.mxu1 %v2093_v44 }
 0xe23   :  { %7102 = vmatpush3.msra.mxu1 %v2093_v44  ;;  %7109 = vmatprep.mubr.msk.f32.mxu1 %vm1037_vm6, %v8151_v37  ;;  %v7100_v37 = vpop.f32.mrf.mxu0 }
 0xe24   :  { %7103 = vmatprep.subr.mxu1 %v2092_v55 }
 0xe25   :  { %7104 = vmatpush3.msra.mxu1 %v2092_v55  ;;  %v2164_v0 = vpop.f32.mrf.mxu0 }
 0xe26   :  { %7105 = vmatprep.subr.mxu1 %v2091_v57 }
 0xe27   :  { %7106 = vmatpush3.msra.mxu1 %v2091_v57 }
 0xe28   :  { %7107 = vmatprep.subr.mxu1 %v2090_v59 }
 0xe29   :  { %7108 = vmatpush3.msra.mxu1 %v2090_v59  ;;  %v8397_v59 = vshrl.u32 %v1904_v30, 7 }
 0xe2a   :  { %7110 = vmatmul.mubr.msk.f32.vlgmr.msra.gmra.mxu1 %vm1037_vm6, %v8149_v34 }
 0xe2b   :  { %7121 = vmatprep.mubr.msk.f32.mxu1 %vm867_vm5, %v8333_v60 }
 0xee2   :  { %v8337_v61 = vpop.f32.mrf.mxu1 }
 0xee4   :  { %v8339_v47 = vpop.f32.mrf.mxu1 }
 0xeea   :  { %v7111_v28 = vpop.f32.mrf.mxu1 }
 0xeeb   :  { %v2245_v63 = vadd.f32 %v7111_v28, %v7100_v37 }
 0xeec   :  { %v2239_v3 = vpop.f32.mrf.mxu1 }
 0xeed   :  { %v8343_v5 = vadd.f32 %v6546_v62, %v2245_v63  ;;  %v2240_v6 = vadd.f32 %v2239_v3, %v2164_v0 }
 0xeef   :  { %v8345_v34 = vadd.f32 %v6546_v62, %v2240_v6  ;;  %v2265_v8 = vmul.f32 %v6547_v4, %v8343_v5 }
 0xef1   :  { %v2269_v15 = vsel %vm1221_vm7, %v2265_v8, 0.0  ;;  %v2264_v16 = vmul.f32 %v6547_v4, %v8345_v34 }
 0xef2   :  { %2270 = vadd.xlane.f32.xlu1 %v2269_v15 }
 0xef3   :  { %v2266_v17 = vsel %vm1037_vm6, %v2264_v16, 0.0 }
 0xef4   :  { %2267 = vadd.xlane.f32.xlu0 %v2266_v17 }
 0xf7b   :  { %v2271_v21 = vpop.xlane.xlu1 %2270 }
 0xf7c   :  { %v2280_v32 = vadd.f32 %v6548_v18, %v2271_v21 }
 0xf7d   :  { %v2268_v58 = vpop.xlane.xlu0 %2267 }
 0xf7e   :  { %v2284_v23 = vmul.f32 0.2, %v2280_v32  ;;  %v2279_v56 = vadd.f32 %v6548_v18, %v2268_v58  ;;  %vm2282_vm8 = vcmp.gt.f32.partialorder %v2280_v32, 0.0 }
 0xf80   :  { %v2286_v9 = vsel %vm2282_vm8, %v2280_v32, %v2284_v23  ;;  %vm2281_vm9 = vcmp.gt.f32.partialorder %v2279_v56, 0.0  ;;  %v2283_v24 = vmul.f32 0.2, %v2279_v56 }
 0xf81   :  { %2294 = vperm.xlu1 %7493, %v2286_v9  }
 0xf82   :  { %v2285_v7 = vsel %vm2281_vm9, %v2279_v56, %v2283_v24 }
 0xf83   :  { %2289 = vperm.xlu0 %7492, %v2285_v7  }
 0xffc   :  { %v2295_v25 = vpop.permute.xlu1 %2294 }
 0xffd   :  { %v2298_v27 = vmul.f32 %v8352_v26, %v2295_v25 }
 0xffe   :  { %v2290_v33 = vpop.permute.xlu0 %2289 }
 0xfff   :  { %v2297_v39 = vmul.f32 %v8356_v38, %v2290_v33  ;;  %7113 = vmatpush3.msk.msra.mxu0 %vm309_vm0, %v2298_v27 }
0x1000   :  { %7114 = vmatprep.subr.mxu0 %v7721_v12 }
0x1001   :  { %7115 = vmatpush3.msra.mxu0 %v2297_v39 }
0x1002   :  { %7117 = vmatmul.mubr.msk.f32.vlgmr.msra.gmra.mxu0 %vm9287_vm2, %v8044_v20  ;;  %7124 = vmatprep.subr.mxu0 %v7721_v12 }
0x1003   :  { %7125 = vmatpush3.msra.mxu0 %v8125_v19  ;;  %7126 = vmatprep.mubr.msk.f32.mxu0 %vm7722_vm1, %v7721_v12 }
0x1004   :  { %7146 = vmatprep.subr.mxu0 %v7721_v12 }
0x1006   :  { %7127 = vmatmul.mubr.msk.f32.vlgmr.msra.gmra.mxu0 %vm867_vm5, %v8369_v40 }
0x1007   :  { %7129 = vmatprep.mubr.msk.f32.mxu0 %vm7722_vm1, %v7721_v12  ;;  %7147 = vmatpush3.msra.mxu0 %v2746_v45 }
0x1008   :  { %7148 = vmatprep.subr.mxu0 %v7721_v12 }
0x1009   :  { %7149 = vmatpush3.msra.mxu0 %v2745_v46 }
0x100a   :  { %7130 = vmatmul.mubr.msk.f32.gmra.mxu0 %vm867_vm5, %v8376_v41  ;;  %7150 = vmatprep.subr.mxu0 %v7721_v12 }
0x100b   :  { %7132 = vmatprep.mubr.msk.f32.mxu0 %vm7722_vm1, %v7721_v12 }
0x100e   :  { %7133 = vmatmul.mubr.msk.f32.gmra.mxu0 %vm867_vm5, %v8383_v43 }
0x100f   :  { %7154 = vmatprep.mubr.msk.f32.mxu0 %vm7722_vm1, %v7721_v12 }
0x10c2   :  { %v2368_v48 = vpop.f32.mrf.mxu0 }
0x10c3   :  { %v2372_v50 = vsel %vm9280_vm10, %v2368_v48, -1e+15 }
0x10c4   :  { %v2375_v52 = vsel %vm867_vm5, %v2372_v50, -inf  ;;  %v7118_v42 = vpop.f32.mrf.mxu0 }
0x10c5   :  { %v2376_v53 = vrot.slane %v2375_v52, 4 }
0x10c7   :  { %v2377_v54 = vmax.f32 %v2375_v52, %v2376_v53 }
0x10c9   :  { %v2378_v44 = vrot.slane %v2377_v54, 2 }
0x10cb   :  { %v2379_v55 = vmax.f32 %v2377_v54, %v2378_v44 }
0x10cd   :  { %v2380_v57 = vrot.slane %v2379_v55, 1 }
0x10cf   :  { %v2381_v37 = vmax.f32 %v2379_v55, %v2380_v57  ;;  %v2742_v55 = vld [vmem:[%s9344_s26 + $0x18] sm:$0xff]  ;;  %v8416_v57 = vld [vmem:[%s7761_s25] sm:$0xff] }
0x10d1   :  { %vm2382_vm7 = vcmp.eq.f32.partialorder %v2372_v50, %v2381_v37  ;;  %v8431_v37 = vld [vmem:[%s7761_s25 + $0x10] sm:$0xff] }
0x10d2   :  { %v2383_v28 = vsel %vm2382_vm7, %v8397_v59, 8 }
0x10d3   :  { %v2384_v62 = vsel %vm867_vm5, %v2383_v28, 2147483647  ;;  %v2744_v28 = vld [vmem:[%s9344_s26 + $0x28] sm:$0xff] }
0x10d4   :  { %v2385_v63 = vrot.slane %v2384_v62, 4  ;;  %7151 = vmatpush3.msra.mxu0 %v2744_v28  ;;  %v6566_v28 = vld [vmem:[%s9346_s12] ss:$0 sm:$0xff] }
0x10d5   :  { %7152 = vmatprep.subr.mxu0 %v7721_v12 }
0x10d6   :  { %vm2386_vm11 = vcmp.lt.s32.totalorder %v2384_v62, %v2385_v63 }
0x10d7   :  { %v2387_v0 = vsel %vm2386_vm11, %v2384_v62, %v2385_v63  ;;  %v2741_v62 = vld [vmem:[%s9344_s26 + $0x10] sm:$0xff]  ;;  %v2743_v63 = vld [vmem:[%s9344_s26 + $0x20] sm:$0xff] }
0x10d8   :  { %v2388_v3 = vrot.slane %v2387_v0, 2  ;;  %7153 = vmatpush3.msra.mxu0 %v2743_v63 }
0x10d9   :  { %7180 = vmatprep.subr.mxu0 %v7721_v12 }
0x10da   :  { %vm2389_vm8 = vcmp.lt.s32.totalorder %v2387_v0, %v2388_v3 }
0x10db   :  { %v2390_v4 = vsel %vm2389_vm8, %v2387_v0, %v2388_v3  ;;  %v2740_v0 = vld [vmem:[%s9344_s26 + $0x8] sm:$0xff]  ;;  %v2636_v3 = vpop.f32.mrf.mxu0 }
0x10dc   :  { %v2391_v6 = vrot.slane %v2390_v4, 1  ;;  %7155 = vmatmul.mubr.msk.f32.vlgmr.msra.gmra.mxu0 %vm1037_vm6, %v2636_v3 }
0x10dd   :  { %7157 = vmatprep.mubr.msk.f32.mxu0 %vm7722_vm1, %v7721_v12 }
0x10de   :  { %vm2392_vm9 = vcmp.lt.s32.totalorder %v2390_v4, %v2391_v6 }
0x10df   :  { %v2393_v8 = vsel %vm2392_vm9, %v2390_v4, %v2391_v6  ;;  %v2739_v4 = vld [vmem:[%s9344_s26] sm:$0xff]  ;;  %v7128_v6 = vpop.f32.mrf.mxu0 }
0x10e0   :  { %vm2394_vm10 = vcmp.eq.s32.totalorder %v8397_v59, %v2393_v8 }
0x10e1   :  { %v2395_v15 = vsel %vm2394_vm10, -1e+15, %v2372_v50  ;;  %v2641_v8 = vpop.f32.mrf.mxu0 }
0x10e2   :  { %v2396_v30 = vsel %vm867_vm5, %v2395_v15, -inf  ;;  %7158 = vmatmul.mubr.msk.f32.gmra.mxu0 %vm1037_vm6, %v2641_v8 }
0x10e3   :  { %v2397_v16 = vrot.slane %v2396_v30, 4  ;;  %7160 = vmatprep.mubr.msk.f32.mxu0 %vm7722_vm1, %v7721_v12 }
0x10e5   :  { %v2398_v17 = vmax.f32 %v2396_v30, %v2397_v16 }
0x10e7   :  { %v2399_v18 = vrot.slane %v2398_v17, 2 }
0x10e9   :  { %v2400_v21 = vmax.f32 %v2398_v17, %v2399_v18 }
0x10eb   :  { %v2401_v32 = vrot.slane %v2400_v21, 1 }
0x10ed   :  { %v2402_v58 = vmax.f32 %v2400_v21, %v2401_v32 }
0x10ef   :  { %vm2403_vm7 = vcmp.eq.f32.partialorder %v2395_v15, %v2402_v58 }
0x10f0   :  { %v2404_v23 = vsel %vm2403_vm7, %v8397_v59, 8 }
0x10f1   :  { %v2405_v56 = vsel %vm867_vm5, %v2404_v23, 2147483647 }
0x10f2   :  { %v2406_v9 = vrot.slane %v2405_v56, 4 }
0x10f4   :  { %vm2407_vm11 = vcmp.lt.s32.totalorder %v2405_v56, %v2406_v9 }
0x10f5   :  { %v2408_v24 = vsel %vm2407_vm11, %v2405_v56, %v2406_v9 }
0x10f6   :  { %v2409_v7 = vrot.slane %v2408_v24, 2 }
0x10f8   :  { %vm2410_vm8 = vcmp.lt.s32.totalorder %v2408_v24, %v2409_v7 }
0x10f9   :  { %v2411_v25 = vsel %vm2410_vm8, %v2408_v24, %v2409_v7 }
0x10fa   :  { %v2412_v27 = vrot.slane %v2411_v25, 1 }
0x10fc   :  { %vm2413_vm10 = vcmp.lt.s32.totalorder %v2411_v25, %v2412_v27 }
0x10fd   :  { %v2414_v33 = vsel %vm2413_vm10, %v2411_v25, %v2412_v27 }
0x10fe   :  { %vm2415_vm9 = vcmp.eq.s32.totalorder %v8397_v59, %v2414_v33 }
0x10ff   :  { %v2416_v39 = vsel %vm2415_vm9, -1e+15, %v2395_v15  ;;  %v7131_v15 = vpop.f32.mrf.mxu0  ;;  %vm9281_vm9 = vcmp.gt.f32.partialorder %v8115_v1, 0.0 }
0x1100   :  { %v2417_v45 = vsel %vm867_vm5, %v2416_v39, -inf }
0x1101   :  { %v2418_v46 = vrot.slane %v2417_v45, 4  ;;  %v2646_v30 = vpop.f32.mrf.mxu0 }
0x1102   :  { %7161 = vmatmul.mubr.msk.f32.gmra.mxu0 %vm1037_vm6, %v2646_v30 }
0x1103   :  { %v2419_v48 = vmax.f32 %v2417_v45, %v2418_v46  ;;  %v7134_v16 = vpop.f32.mrf.mxu0  ;;  %7186 = vmatprep.mubr.msk.f32.mxu0 %vm7722_vm1, %v7721_v12 }
0x1105   :  { %v2420_v52 = vrot.slane %v2419_v48, 2 }
0x1107   :  { %v2421_v42 = vmax.f32 %v2419_v48, %v2420_v52 }
0x1109   :  { %v2422_v53 = vrot.slane %v2421_v42, 1 }
0x110b   :  { %v2423_v54 = vmax.f32 %v2421_v42, %v2422_v53  ;;  %v6565_v42 = vld [vmem:[%s9345_s1] ss:$0 sm:$0xff] }
0x110d   :  { %vm2424_vm7 = vcmp.le.f32.partialorder %v2372_v50, %v2423_v54 }
0x110e   :  { %v2425_v44 = vsel %vm2424_vm7, -1e+15, %v2372_v50  ;;  %v8424_v50 = vld [vmem:[%s7761_s25 + $0x8] sm:$0xff] }
0x110f   :  { %7119 = vmatprep.subr.mxu1 %v2425_v44 }
0x1110   :  { %7120 = vmatpush3.msra.mxu1 %v2425_v44 }
0x1111   :  { %7122 = vmatmul.mubr.msk.f32.vlgmr.msra.gmra.mxu1 %vm867_vm5, %v8322_v49  ;;  %7135 = vmatprep.subr.mxu1 %v7721_v12 }
0x1112   :  { %7136 = vmatpush3.msra.mxu1 %v8125_v19  ;;  %7137 = vmatprep.mubr.msk.f32.mxu1 %vm7722_vm1, %v7721_v12 }
0x1113   :  { %7163 = vmatprep.subr.mxu1 %v7721_v12 }
0x1115   :  { %7138 = vmatmul.mubr.msk.f32.vlgmr.msra.gmra.mxu1 %vm867_vm5, %v8416_v57 }
0x1116   :  { %7140 = vmatprep.mubr.msk.f32.mxu1 %vm7722_vm1, %v7721_v12  ;;  %7164 = vmatpush3.msra.mxu1 %v2742_v55 }
0x1117   :  { %7165 = vmatprep.subr.mxu1 %v7721_v12 }
0x1118   :  { %7166 = vmatpush3.msra.mxu1 %v2741_v62 }
0x1119   :  { %7141 = vmatmul.mubr.msk.f32.gmra.mxu1 %vm867_vm5, %v8424_v50  ;;  %7167 = vmatprep.subr.mxu1 %v7721_v12 }
0x111a   :  { %7143 = vmatprep.mubr.msk.f32.mxu1 %vm7722_vm1, %v7721_v12  ;;  %7168 = vmatpush3.msra.mxu1 %v2740_v0 }
0x111b   :  { %7169 = vmatprep.subr.mxu1 %v7721_v12 }
0x111c   :  { %7170 = vmatpush3.msra.mxu1 %v2739_v4 }
0x111d   :  { %7144 = vmatmul.mubr.msk.f32.gmra.mxu1 %vm867_vm5, %v8431_v37  ;;  %7189 = vmatprep.subr.mxu1 %v7721_v12 }
0x111e   :  { %7171 = vmatprep.mubr.msk.f32.mxu1 %vm7722_vm1, %v7721_v12 }
0x119c   :  { %v2822_v24 = vpop.f32.mrf.mxu0 }
0x119e   :  { %v7156_v7 = vpop.f32.mrf.mxu0 }
0x11a2   :  { %v2827_v25 = vpop.f32.mrf.mxu0 }
0x11a4   :  { %v7159_v27 = vpop.f32.mrf.mxu0 }
0x11c2   :  { %v2832_v33 = vpop.f32.mrf.mxu0 }
0x11c4   :  { %v7162_v39 = vpop.f32.mrf.mxu0 }
0x11d1   :  { %v8456_v17 = vpop.f32.mrf.mxu1 }
0x11d3   :  { %v2492_v18 = vpop.f32.mrf.mxu1 }
0x11d5   :  { %v2725_v21 = vpop.f32.mrf.mxu1 }
0x11d6   :  { %7172 = vmatmul.mubr.msk.f32.vlgmr.msra.gmra.mxu1 %vm1037_vm6, %v2725_v21  ;;  %v6567_v21 = vld [vmem:[#allocation6] ss:$0 sm:$0xff] }
0x11d7   :  { %v7139_v32 = vpop.f32.mrf.mxu1  ;;  %7174 = vmatprep.mubr.msk.f32.mxu1 %vm7722_vm1, %v7721_v12 }
0x11d9   :  { %v2730_v58 = vpop.f32.mrf.mxu1 }
0x11da   :  { %7175 = vmatmul.mubr.msk.f32.gmra.mxu1 %vm1037_vm6, %v2730_v58 }
0x11db   :  { %v7142_v23 = vpop.f32.mrf.mxu1  ;;  %7177 = vmatprep.mubr.msk.f32.mxu1 %vm7722_vm1, %v7721_v12 }
0x11dd   :  { %v2735_v56 = vpop.f32.mrf.mxu1 }
0x11de   :  { %7178 = vmatmul.mubr.msk.f32.gmra.mxu1 %vm1037_vm6, %v2735_v56 }
0x11df   :  { %v7145_v9 = vpop.f32.mrf.mxu1  ;;  %7191 = vmatprep.mubr.msk.f32.mxu1 %vm7722_vm1, %v7721_v12 }
0x1296   :  { %v2911_v45 = vpop.f32.mrf.mxu1 }
0x1297   :  { %v2912_v54 = vadd.f32 %v2911_v45, %v2822_v24 }
0x1298   :  { %v7173_v46 = vpop.f32.mrf.mxu1 }
0x1299   :  { %v8472_v3 = vadd.f32 %v6565_v42, %v2912_v54  ;;  %v2031_v46 = vmul.f32 %v8352_v26, %v8337_v61  ;;  %v2030_v54 = vmul.f32 %v8356_v38, %v8339_v47 }
0x129a   :  { %v2916_v48 = vpop.f32.mrf.mxu1 }
0x129b   :  { %v2917_v52 = vadd.f32 %v2916_v48, %v2827_v25  ;;  %v2942_v30 = vmul.f32 %v6566_v28, %v8472_v3  ;;  %v2501_v48 = vmul.f32 %v8356_v38, %v2492_v18 }
0x129c   :  { %v7176_v53 = vpop.f32.mrf.mxu1 }
0x129d   :  { %v8468_v44 = vadd.f32 %v6565_v42, %v2917_v52  ;;  %v2945_v16 = vsel %vm1037_vm6, %v2942_v30, 0.0  ;;  %v2035_v52 = vsel %vm1255_vm14, %v2031_v46, 0.0  ;;  %v2503_v53 = vsel %vm867_vm5, %v2501_v48, 0.0 }
0x129e   :  { %v2921_v55 = vpop.f32.mrf.mxu1 }
0x129f   :  { %v2922_v62 = vadd.f32 %v2921_v55, %v2832_v33  ;;  %v2943_v63 = vmul.f32 %v6566_v28, %v8468_v44 }
0x12a0   :  { %v7179_v0 = vpop.f32.mrf.mxu1 }
0x12a1   :  { %v8474_v4 = vadd.f32 %v6565_v42, %v2922_v62  ;;  %v2948_v6 = vsel %vm1037_vm6, %v2943_v63, 0.0  ;;  %v2502_v42 = vmul.f32 %v8352_v26, %v8456_v17 }
0x12a2   :  { %2949 = vadd.xlane.f32.xlu0 %v2948_v6 }
0x12a3   :  { %v2944_v8 = vmul.f32 %v6566_v28, %v8474_v4  ;;  %v2506_v55 = vsel %vm1255_vm14, %v2502_v42, 0.0  ;;  %v2032_v28 = vsel %vm867_vm5, %v2030_v54, 0.0 }
0x12a5   :  { %v2951_v15 = vsel %vm1037_vm6, %v2944_v8, 0.0 }
0x12a6   :  { %2952 = vadd.xlane.f32.xlu1 %v2951_v15 }
0x12aa   :  { %2946 = vadd.xlane.f32.xlu1 %v2945_v16 }
0x132b   :  { %v2950_v32 = vpop.xlane.xlu0 %2949 }
0x132c   :  { %v2962_v58 = vadd.f32 %v6567_v21, %v2950_v32 }
0x132e   :  { %v2968_v23 = vmul.f32 0.2, %v2962_v58  ;;  %vm2965_vm11 = vcmp.gt.f32.partialorder %v2962_v58, 0.0 }
0x132f   :  { %v2953_v56 = vpop.xlane.xlu1 %2952 }
0x1330   :  { %v2963_v9 = vadd.f32 %v6567_v21, %v2953_v56  ;;  %v2971_v24 = vsel %vm2965_vm11, %v2962_v58, %v2968_v23 }
0x1331   :  { %2980 = vperm.xlu1 %7493, %v2971_v24  }
0x1332   :  { %v2969_v7 = vmul.f32 0.2, %v2963_v9  ;;  %vm2966_vm8 = vcmp.gt.f32.partialorder %v2963_v9, 0.0 }
0x1333   :  { %v2947_v25 = vpop.xlane.xlu1 %2946 }
0x1334   :  { %v2961_v27 = vadd.f32 %v6567_v21, %v2947_v25  ;;  %v2972_v33 = vsel %vm2966_vm8, %v2963_v9, %v2969_v7 }
0x1335   :  { %2985 = vperm.xlu0 %7492, %v2972_v33  }
0x1336   :  { %v2967_v39 = vmul.f32 0.2, %v2961_v27  ;;  %vm2964_vm10 = vcmp.gt.f32.partialorder %v2961_v27, 0.0 }
0x1338   :  { %v2970_v45 = vsel %vm2964_vm10, %v2961_v27, %v2967_v39 }
0x1339   :  { %2975 = vperm.xlu1 %7493, %v2970_v45  }
0x1354   :  { %2036 = vadd.xlane.f32.xlu0 %v2035_v52 }
0x1358   :  { %2504 = vadd.xlane.f32.xlu0 %v2503_v53 }
0x135c   :  { %2507 = vadd.xlane.f32.xlu0 %v2506_v55 }
0x135d   :  { %2033 = vadd.xlane.f32.xlu1 %v2032_v28 }
0x13ac   :  { %v2981_v61 = vpop.permute.xlu1 %2980 }
0x13ad   :  { %v2989_v63 = vmul.f32 %v8424_v50, %v2981_v61 }
0x13b0   :  { %v2986_v18 = vpop.permute.xlu0 %2985 }
0x13b1   :  { %v2990_v62 = vmul.f32 %v8431_v37, %v2986_v18 }
0x13b3   :  { %7181 = vmatpush3.msra.mxu0 %v2990_v62 }
0x13b4   :  { %7182 = vmatprep.subr.mxu0 %v7721_v12  ;;  %v2976_v17 = vpop.permute.xlu1 %2975 }
0x13b5   :  { %v2988_v0 = vmul.f32 %v8416_v57, %v2976_v17  ;;  %7183 = vmatpush3.msra.mxu0 %v2989_v63 }
0x13b6   :  { %7184 = vmatprep.subr.mxu0 %v7721_v12 }
0x13b7   :  { %7185 = vmatpush3.msra.mxu0 %v2988_v0 }
0x13b8   :  { %7187 = vmatmul.mubr.msk.f32.vlgmr.msra.gmra.mxu0 %vm9285_vm4, %v8072_v35  ;;  %7200 = vmatprep.subr.mxu0 %v7721_v12 }
0x13b9   :  { %7204 = vmatprep.mubr.msk.f32.mxu0 %vm7722_vm1, %v7721_v12 }
0x1478   :  { %v3057_v47 = vpop.f32.mrf.mxu0 }
0x1479   :  { %v3062_v6 = vsel %vm9281_vm9, %v3057_v47, -1e+15 }
0x147a   :  { %v3063_v8 = vsel %vm867_vm5, %v3062_v6, -inf  ;;  %v7188_v15 = vpop.f32.mrf.mxu0 }
0x147b   :  { %v3064_v30 = vrot.slane %v3063_v8, 4 }
0x147d   :  { %v3065_v16 = vmax.f32 %v3063_v8, %v3064_v30 }
0x147f   :  { %v3066_v21 = vrot.slane %v3065_v16, 2 }
0x1481   :  { %v3067_v32 = vmax.f32 %v3065_v16, %v3066_v21 }
0x1483   :  { %v3068_v58 = vrot.slane %v3067_v32, 1 }
0x1485   :  { %v3069_v23 = vmax.f32 %v3067_v32, %v3068_v58 }
0x1487   :  { %vm3070_vm7 = vcmp.eq.f32.partialorder %v3062_v6, %v3069_v23 }
0x1488   :  { %v3071_v56 = vsel %vm3070_vm7, %v8397_v59, 8 }
0x1489   :  { %v3072_v9 = vsel %vm867_vm5, %v3071_v56, 2147483647 }
0x148a   :  { %v3073_v24 = vrot.slane %v3072_v9, 4 }
0x148c   :  { %vm3074_vm11 = vcmp.lt.s32.totalorder %v3072_v9, %v3073_v24 }
0x148d   :  { %v3075_v7 = vsel %vm3074_vm11, %v3072_v9, %v3073_v24  ;;  %v8531_v9 = vpop.xlane.xlu1 %2033 }
0x148e   :  { %v3076_v25 = vrot.slane %v3075_v7, 2  ;;  %v2038_v24 = vsel %vm1524_vm15, %v8531_v9, -1e+30 }
0x1490   :  { %vm3077_vm8 = vcmp.lt.s32.totalorder %v3075_v7, %v3076_v25 }
0x1491   :  { %v3078_v27 = vsel %vm3077_vm8, %v3075_v7, %v3076_v25 }
0x1492   :  { %v3079_v33 = vrot.slane %v3078_v27, 1 }
0x1494   :  { %vm3080_vm10 = vcmp.lt.s32.totalorder %v3078_v27, %v3079_v33 }
0x1495   :  { %v3081_v39 = vsel %vm3080_vm10, %v3078_v27, %v3079_v33 }
0x1496   :  { %vm3082_vm9 = vcmp.eq.s32.totalorder %v8397_v59, %v3081_v39 }
0x1497   :  { %v3083_v45 = vsel %vm3082_vm9, -1e+15, %v3062_v6 }
0x1498   :  { %v3084_v46 = vsel %vm867_vm5, %v3083_v45, -inf }
0x1499   :  { %v3085_v48 = vrot.slane %v3084_v46, 4 }
0x149b   :  { %v3086_v52 = vmax.f32 %v3084_v46, %v3085_v48 }
0x149d   :  { %v3087_v42 = vrot.slane %v3086_v52, 2 }
0x149f   :  { %v3088_v53 = vmax.f32 %v3086_v52, %v3087_v42 }
0x14a1   :  { %v3089_v54 = vrot.slane %v3088_v53, 1 }
0x14a3   :  { %v3090_v55 = vmax.f32 %v3088_v53, %v3089_v54 }
0x14a5   :  { %vm3091_vm7 = vcmp.eq.f32.partialorder %v3083_v45, %v3090_v55 }
0x14a6   :  { %v3092_v28 = vsel %vm3091_vm7, %v8397_v59, 8 }
0x14a7   :  { %v3093_v61 = vsel %vm867_vm5, %v3092_v28, 2147483647 }
0x14a8   :  { %v3094_v18 = vrot.slane %v3093_v61, 4 }
0x14aa   :  { %vm3095_vm11 = vcmp.lt.s32.totalorder %v3093_v61, %v3094_v18 }
0x14ab   :  { %v3096_v62 = vsel %vm3095_vm11, %v3093_v61, %v3094_v18  ;;  %vm9284_vm11 = vcmp.gt.f32.partialorder %v8416_v57, 0.0 }
0x14ac   :  { %v3097_v63 = vrot.slane %v3096_v62, 2 }
0x14ae   :  { %vm3098_vm8 = vcmp.lt.s32.totalorder %v3096_v62, %v3097_v63 }
0x14af   :  { %v3099_v17 = vsel %vm3098_vm8, %v3096_v62, %v3097_v63  ;;  %vm9283_vm8 = vcmp.gt.f32.partialorder %v8424_v50, 0.0 }
0x14b0   :  { %v3100_v0 = vrot.slane %v3099_v17, 1 }
0x14b2   :  { %vm3101_vm9 = vcmp.lt.s32.totalorder %v3099_v17, %v3100_v0 }
0x14b3   :  { %v3102_v47 = vsel %vm3101_vm9, %v3099_v17, %v3100_v0  ;;  %vm9282_vm9 = vcmp.gt.f32.partialorder %v8431_v37, 0.0 }
0x14b4   :  { %vm3103_vm10 = vcmp.eq.s32.totalorder %v8397_v59, %v3102_v47 }
0x14b5   :  { %v3104_v8 = vsel %vm3103_vm10, -1e+15, %v3083_v45  ;;  %vm3580_vm10 = vcmp.gt.f32.partialorder %v8267_v22, 0.0 }
0x14b6   :  { %v3105_v15 = vsel %vm867_vm5, %v3104_v8, -inf }
0x14b7   :  { %v3106_v30 = vrot.slane %v3105_v15, 4 }
0x14b9   :  { %v3107_v16 = vmax.f32 %v3105_v15, %v3106_v30 }
0x14bb   :  { %v3108_v21 = vrot.slane %v3107_v16, 2 }
0x14bd   :  { %v3109_v32 = vmax.f32 %v3107_v16, %v3108_v21 }
0x14bf   :  { %v3110_v58 = vrot.slane %v3109_v32, 1 }
0x14c1   :  { %v3111_v23 = vmax.f32 %v3109_v32, %v3110_v58 }
0x14c3   :  { %vm3112_vm7 = vcmp.le.f32.partialorder %v3062_v6, %v3111_v23 }
0x14c4   :  { %v3113_v56 = vsel %vm3112_vm7, -1e+15, %v3062_v6  ;;  %v8527_v6 = vpop.xlane.xlu0 %2036  ;;  %vm3581_vm7 = vcmp.gt.f32.partialorder %v8271_v31, 0.0 }
0x14c5   :  { %7190 = vmatpush3.msra.mxu1 %v3113_v56  ;;  %v2039_v7 = vsel %vm1525_vm3, %v8527_v6, -1e+30 }
0x14c6   :  { %7192 = vmatmul.mubr.msk.f32.vlgmr.msra.gmra.mxu1 %vm867_vm5, %v8369_v40  ;;  %7223 = vmatprep.subr.mxu1 %v7721_v12  ;;  %v2041_v27 = vsel %vm1255_vm14, %v2039_v7, -inf }
0x14c7   :  { %7194 = vmatprep.mubr.msk.f32.mxu1 %vm7722_vm1, %v7721_v12 }
0x14c8   :  { %v8529_v40 = vpop.xlane.xlu0 %2504 }
0x14c9   :  { %v2509_v33 = vsel %vm1240_vm13, %v8529_v40, -1e+30 }
0x14ca   :  { %7195 = vmatmul.mubr.msk.f32.gmra.mxu1 %vm867_vm5, %v8376_v41  ;;  %v2511_v46 = vsel %vm867_vm5, %v2509_v33, -inf }
0x14cb   :  { %7197 = vmatprep.mubr.msk.f32.mxu1 %vm7722_vm1, %v7721_v12 }
0x14cc   :  { %v8536_v41 = vpop.xlane.xlu0 %2507 }
0x14cd   :  { %v2510_v25 = vsel %vm1241_vm12, %v8536_v41, -1e+30 }
0x14ce   :  { %7198 = vmatmul.mubr.msk.f32.gmra.mxu1 %vm867_vm5, %v8383_v43  ;;  %v2040_v43 = vsel %vm867_vm5, %v2038_v24, -inf  ;;  %v2512_v45 = vsel %vm1255_vm14, %v2510_v25, -inf }
0x14cf   :  { %7231 = vmatprep.mubr.msk.f32.mxu1 %vm7722_vm1, %v7721_v12  ;;  %v2042_v39 = vmax.f32 %v2040_v43, %v2041_v27  ;;  %v2513_v48 = vmax.f32 %v2511_v46, %v2512_v45 }
0x14d1   :  { %v2043_v52 = vrot.slane %v2042_v39, 4  ;;  %v2514_v42 = vrot.slane %v2513_v48, 4 }
0x14d3   :  { %v2044_v53 = vmax.f32 %v2042_v39, %v2043_v52  ;;  %v2515_v54 = vmax.f32 %v2513_v48, %v2514_v42 }
0x14d5   :  { %v2045_v55 = vrot.slane %v2044_v53, 2  ;;  %v2516_v28 = vrot.slane %v2515_v54, 2 }
0x14d7   :  { %v2046_v61 = vmax.f32 %v2044_v53, %v2045_v55  ;;  %v2517_v62 = vmax.f32 %v2515_v54, %v2516_v28 }
0x14d9   :  { %v2047_v18 = vrot.slane %v2046_v61, 1  ;;  %v2518_v15 = vrot.slane %v2517_v62, 1 }
0x14db   :  { %v2048_v8 = vmax.f32 %v2046_v61, %v2047_v18  ;;  %v2519_v23 = vmax.f32 %v2517_v62, %v2518_v15 }
0x14dd   :  { %v2049_v58 = vmul.f32 %v8333_v60, %v2048_v8  ;;  %v2520_v27 = vmul.f32 %v8356_v38, %v2519_v23  ;;  %v2050_v33 = vmul.f32 %v8322_v49, %v2048_v8  ;;  %v2521_v46 = vmul.f32 %v8352_v26, %v2519_v23 }
0x14df   :  { %v2051_v43 = vsel %vm867_vm5, %v2049_v58, 0.0  ;;  %v2522_v39 = vsel %vm867_vm5, %v2520_v27, 0.0  ;;  %v2054_v45 = vsel %vm1255_vm14, %v2050_v33, 0.0  ;;  %v2525_v48 = vsel %vm1255_vm14, %v2521_v46, 0.0 }
0x1586   :  { %v3180_v63 = vpop.f32.mrf.mxu1 }
0x1587   :  { %v3194_v17 = vmul.f32 %v8416_v57, %v3180_v63 }
0x1588   :  { %v7193_v0 = vpop.f32.mrf.mxu1 }
0x1589   :  { %v3197_v47 = vsel %vm867_vm5, %v3194_v17, 0.0 }
0x158a   :  { %3198 = vadd.xlane.f32.xlu1 %v3197_v47  ;;  %v3185_v30 = vpop.f32.mrf.mxu1 }
0x158b   :  { %v3195_v16 = vmul.f32 %v8424_v50, %v3185_v30 }
0x158c   :  { %v7196_v21 = vpop.f32.mrf.mxu1 }
0x158d   :  { %v3200_v32 = vsel %vm867_vm5, %v3195_v16, 0.0 }
0x158e   :  { %3201 = vadd.xlane.f32.xlu0 %v3200_v32  ;;  %v3190_v56 = vpop.f32.mrf.mxu1 }
0x158f   :  { %v3196_v24 = vmul.f32 %v8431_v37, %v3190_v56 }
0x1590   :  { %v7199_v7 = vpop.f32.mrf.mxu1 }
0x1591   :  { %v3203_v25 = vsel %vm867_vm5, %v3196_v24, 0.0 }
0x1592   :  { %2052 = vadd.xlane.f32.xlu0 %v2051_v43  ;;  %3204 = vadd.xlane.f32.xlu1 %v3203_v25 }
0x1596   :  { %2523 = vadd.xlane.f32.xlu0 %v2522_v39  ;;  %2055 = vadd.xlane.f32.xlu1 %v2054_v45 }
0x159a   :  { %2526 = vadd.xlane.f32.xlu1 %v2525_v48 }
0x1613   :  { %v8566_v52 = vpop.xlane.xlu1 %3198 }
0x1614   :  { %v3209_v53 = vsel %vm9284_vm11, %v8566_v52, -1e+30 }
0x1615   :  { %v3212_v28 = vsel %vm867_vm5, %v3209_v53, -inf }
0x1617   :  { %v8569_v42 = vpop.xlane.xlu0 %3201 }
0x1618   :  { %v3210_v54 = vsel %vm9283_vm8, %v8569_v42, -1e+30  ;;  %vm4114_vm8 = vcmask 89088  }
0x1619   :  { %v3213_v55 = vsel %vm867_vm5, %v3210_v54, -inf }
0x161a   :  { %v3215_v62 = vmax.f32 %v3212_v28, %v3213_v55 }
0x161b   :  { %v2053_v61 = vpop.xlane.xlu0 %2052  ;;  %v8580_v18 = vpop.xlane.xlu1 %3204 }
0x161c   :  { %v2057_v63 = vsub.f32 %v8531_v9, %v2053_v61  ;;  %v3211_v17 = vsel %vm9282_vm9, %v8580_v18, -1e+30  ;;  %vm4118_vm9 = vcmask 84992  }
0x161d   :  { %v3214_v0 = vsel %vm867_vm5, %v3211_v17, -inf }
0x161e   :  { %v2059_v47 = vmul.f32 1.442695, %v2057_v63  ;;  %v3216_v8 = vmax.f32 %v3215_v62, %v3214_v0 }
0x161f   :  { %v2524_v15 = vpop.xlane.xlu0 %2523  ;;  %v2056_v30 = vpop.xlane.xlu1 %2055 }
0x1620   :  { %v3217_v16 = vrot.slane %v3216_v8, 4  ;;  %v2528_v21 = vsub.f32 %v8529_v40, %v2524_v15  ;;  %v2058_v32 = vsub.f32 %v8527_v6, %v2056_v30  ;;  %7510 = vpow2.f32 %v2059_v47 }
0x1622   :  { %v3218_v58 = vmax.f32 %v3216_v8, %v3217_v16  ;;  %v2530_v23 = vmul.f32 1.442695, %v2528_v21  ;;  %v2061_v56 = vmul.f32 1.442695, %v2058_v32 }
0x1623   :  { %v2527_v9 = vpop.xlane.xlu1 %2526 }
0x1624   :  { %v3219_v24 = vrot.slane %v3218_v58, 2  ;;  %7512 = vpow2.f32 %v2530_v23  ;;  %v2529_v7 = vsub.f32 %v8536_v41, %v2527_v9 }
0x1625   :  { %7514 = vpow2.f32 %v2061_v56 }
0x1626   :  { %v3220_v43 = vmax.f32 %v3218_v58, %v3219_v24  ;;  %v2532_v25 = vmul.f32 1.442695, %v2529_v7 }
0x1628   :  { %7516 = vpow2.f32 %v2532_v25  ;;  %v3221_v27 = vrot.slane %v3220_v43, 1 }
0x162a   :  { %v3222_v33 = vmax.f32 %v3220_v43, %v3221_v27 }
0x162c   :  { %v3224_v39 = vmul.f32 %v8424_v50, %v3222_v33  ;;  %v3223_v40 = vmul.f32 %v8416_v57, %v3222_v33  ;;  %v3225_v48 = vmul.f32 %v8431_v37, %v3222_v33 }
0x162d   :  { %v8592_v6 = vpop.eup %7510 }
0x162e   :  { %v3229_v45 = vsel %vm867_vm5, %v3224_v39, 0.0  ;;  %v3226_v46 = vsel %vm867_vm5, %v3223_v40, 0.0  ;;  %v2063_v53 = vmul.f32 %v8333_v60, %v8592_v6  ;;  %v3232_v55 = vsel %vm867_vm5, %v3225_v48, 0.0 }
0x162f   :  { %3230 = vadd.xlane.f32.xlu1 %v3229_v45  ;;  %3227 = vadd.xlane.f32.xlu0 %v3226_v46 }
0x1630   :  { %v2065_v63 = vsel %vm867_vm5, %v2063_v53, 0.0 }
0x1631   :  { %v8597_v41 = vpop.eup %7512 }
0x1632   :  { %v8601_v54 = vpop.eup %7514  ;;  %v2534_v61 = vmul.f32 %v8356_v38, %v8597_v41 }
0x1633   :  { %3233 = vadd.xlane.f32.xlu0 %v3232_v55  ;;  %v2064_v28 = vmul.f32 %v8322_v49, %v8601_v54 }
0x1634   :  { %v2536_v15 = vsel %vm867_vm5, %v2534_v61, 0.0 }
0x1635   :  { %v8608_v62 = vpop.eup %7516  ;;  %v2066_v17 = vsel %vm1255_vm14, %v2064_v28, 0.0 }
0x1636   :  { %v2067_v0 = vadd.f32 %v2066_v17, %v2065_v63  ;;  %v2535_v47 = vmul.f32 %v8352_v26, %v8608_v62 }
0x1638   :  { %v2068_v8 = vrot.slane %v2067_v0, 4  ;;  %v2537_v30 = vsel %vm1255_vm14, %v2535_v47, 0.0 }
0x1639   :  { %v2538_v16 = vadd.f32 %v2537_v30, %v2536_v15 }
0x163a   :  { %v2069_v21 = vadd.f32 %v2068_v8, %v2067_v0 }
0x163b   :  { %v2539_v32 = vrot.slane %v2538_v16, 4 }
0x163c   :  { %v2070_v58 = vrot.slane %v2069_v21, 2 }
0x163d   :  { %v2540_v23 = vadd.f32 %v2539_v32, %v2538_v16 }
0x163e   :  { %v2071_v56 = vadd.f32 %v2070_v58, %v2069_v21 }
0x163f   :  { %v2541_v9 = vrot.slane %v2540_v23, 2 }
0x1640   :  { %v2072_v24 = vrot.slane %v2071_v56, 1 }
0x1641   :  { %v2542_v7 = vadd.f32 %v2541_v9, %v2540_v23 }
0x1642   :  { %v2073_v43 = vadd.f32 %v2072_v24, %v2071_v56 }
0x1643   :  { %v2543_v25 = vrot.slane %v2542_v7, 1 }
0x1644   :  { %v2075_v27 = vmul.f32 %v8322_v49, %v2073_v43  ;;  %v2074_v33 = vmul.f32 %v8333_v60, %v2073_v43 }
0x1645   :  { %v2544_v39 = vadd.f32 %v2543_v25, %v2542_v7 }
0x1646   :  { %v2079_v40 = vsel %vm1255_vm14, %v2075_v27, 0.0  ;;  %v2076_v45 = vsel %vm867_vm5, %v2074_v33, 0.0 }
0x1647   :  { %2080 = vadd.xlane.f32.xlu1 %v2079_v40  ;;  %2077 = vadd.xlane.f32.xlu0 %v2076_v45  ;;  %v2546_v46 = vmul.f32 %v8352_v26, %v2544_v39  ;;  %v2545_v48 = vmul.f32 %v8356_v38, %v2544_v39 }
0x1649   :  { %v2550_v53 = vsel %vm1255_vm14, %v2546_v46, 0.0  ;;  %v2547_v55 = vsel %vm867_vm5, %v2545_v48, 0.0 }
0x164b   :  { %2551 = vadd.xlane.f32.xlu1 %v2550_v53  ;;  %2548 = vadd.xlane.f32.xlu0 %v2547_v55 }
0x16b8   :  { %v3228_v49 = vpop.xlane.xlu0 %3227  ;;  %v3231_v28 = vpop.xlane.xlu1 %3230 }
0x16b9   :  { %v3235_v60 = vsub.f32 %v8566_v52, %v3228_v49  ;;  %v3236_v61 = vsub.f32 %v8569_v42, %v3231_v28 }
0x16bb   :  { %v3238_v63 = vmul.f32 1.442695, %v3235_v60  ;;  %v3240_v17 = vmul.f32 1.442695, %v3236_v61 }
0x16bc   :  { %v3234_v0 = vpop.xlane.xlu0 %3233 }
0x16bd   :  { %7518 = vpow2.f32 %v3238_v63  ;;  %v3237_v47 = vsub.f32 %v8580_v18, %v3234_v0 }
0x16be   :  { %7520 = vpow2.f32 %v3240_v17 }
0x16bf   :  { %v3242_v8 = vmul.f32 1.442695, %v3237_v47 }
0x16c1   :  { %7522 = vpow2.f32 %v3242_v8 }
0x16ca   :  { %v8627_v15 = vpop.eup %7518 }
0x16cb   :  { %v8629_v30 = vpop.eup %7520  ;;  %v3244_v16 = vmul.f32 %v8416_v57, %v8627_v15 }
0x16cc   :  { %v3245_v52 = vmul.f32 %v8424_v50, %v8629_v30 }
0x16cd   :  { %v3247_v42 = vsel %vm867_vm5, %v3244_v16, 0.0 }
0x16ce   :  { %v8636_v21 = vpop.eup %7522  ;;  %v3248_v32 = vsel %vm867_vm5, %v3245_v52, 0.0 }
0x16cf   :  { %v3246_v18 = vmul.f32 %v8431_v37, %v8636_v21  ;;  %v3249_v56 = vadd.f32 %v3248_v32, %v3247_v42 }
0x16d0   :  { %v2078_v58 = vpop.xlane.xlu0 %2077  ;;  %v2081_v23 = vpop.xlane.xlu1 %2080 }
0x16d1   :  { %v2082_v9 = vadd.f32 1e-16, %v2078_v58  ;;  %v2083_v24 = vadd.f32 1e-16, %v2081_v23  ;;  %v3250_v7 = vsel %vm867_vm5, %v3246_v18, 0.0 }
0x16d2   :  { %v3251_v43 = vadd.f32 %v3250_v7, %v3249_v56  ;;  %v3582_v56 = vmin.f32 %v8267_v22, 0.0 }
0x16d3   :  { %7524 = vrcp.f32 %v2082_v9 }
0x16d4   :  { %7526 = vrcp.f32 %v2083_v24  ;;  %v2549_v25 = vpop.xlane.xlu0 %2548  ;;  %v2552_v27 = vpop.xlane.xlu1 %2551  ;;  %v3252_v33 = vrot.slane %v3251_v43, 4 }
0x16d5   :  { %v2553_v39 = vadd.f32 1e-16, %v2549_v25  ;;  %v2554_v40 = vadd.f32 1e-16, %v2552_v27 }
0x16d6   :  { %v3253_v45 = vadd.f32 %v3252_v33, %v3251_v43 }
0x16d7   :  { %7528 = vrcp.f32 %v2553_v39 }
0x16d8   :  { %7530 = vrcp.f32 %v2554_v40  ;;  %v3254_v46 = vrot.slane %v3253_v45, 2 }
0x16da   :  { %v3255_v48 = vadd.f32 %v3254_v46, %v3253_v45 }
0x16dc   :  { %v3256_v53 = vrot.slane %v3255_v48, 1 }
0x16de   :  { %v3257_v55 = vadd.f32 %v3256_v53, %v3255_v48 }
0x16e0   :  { %v7525_v49 = vpop.eup %7524  ;;  %v3260_v28 = vmul.f32 %v8431_v37, %v3257_v55  ;;  %v3259_v60 = vmul.f32 %v8424_v50, %v3257_v55  ;;  %v3258_v63 = vmul.f32 %v8416_v57, %v3257_v55  ;;  %v3676_v55 = vld [vmem:[%s9347_s14] sm:$0xff] }
0x16e1   :  { %v7527_v61 = vpop.eup %7526  ;;  %v2085_v8 = vmul.f32 %v7525_v49, %v8592_v6 }
0x16e2   :  { %v3267_v17 = vsel %vm867_vm5, %v3260_v28, 0.0  ;;  %v3264_v0 = vsel %vm867_vm5, %v3259_v60, 0.0  ;;  %v2087_v47 = vmul.f32 %v7527_v61, %v8601_v54  ;;  %v3261_v18 = vsel %vm867_vm5, %v3258_v63, 0.0  ;;  %v3595_v61 = vld [vmem:[%s9348_s10 + $0x18] sm:$0xff]  ;;  %v3594_v63 = vld [vmem:[%s9348_s10 + $0x10] sm:$0xff] }
0x16e3   :  { %3268 = vadd.xlane.f32.xlu1 %v3267_v17  ;;  %3265 = vadd.xlane.f32.xlu0 %v3264_v0  ;;  %v2088_v32 = vmul.f32 %v2085_v8, %v8281_v36  ;;  %v3593_v17 = vld [vmem:[%s9348_s10 + $0x8] sm:$0xff]  ;;  %v3592_v0 = vld [vmem:[%s9348_s10] sm:$0xff]  ;;  %v3568_v8 = vmul.f32 3.0, %v8125_v19 }
0x16e4   :  { %v7529_v16 = vpop.eup %7528  ;;  %v2089_v52 = vmul.f32 %v2087_v47, %v8279_v29  ;;  %7224 = vmatpush3.msra.mxu1 %v3595_v61  ;;  %v8711_v19 = vld [vmem:[%s7746_s13] sm:$0xff] }
0x16e5   :  { %v7531_v42 = vpop.eup %7530  ;;  %v2556_v23 = vmul.f32 %v7529_v16, %v8597_v41  ;;  %7225 = vmatprep.subr.mxu1 %v7721_v12 }
0x16e6   :  { %7201 = vmatpush3.msk.msra.mxu0 %vm309_vm0, %v2089_v52  ;;  %v2558_v58 = vmul.f32 %v7531_v42, %v8608_v62  ;;  %7226 = vmatpush3.msra.mxu1 %v3594_v63  ;;  %v6595_v63 = vld [vmem:[%s9353_s11] ss:$0 sm:$0xff] }
0x16e7   :  { %7202 = vmatprep.subr.mxu0 %v7721_v12  ;;  %3262 = vadd.xlane.f32.xlu1 %v3261_v18  ;;  %v2559_v29 = vmul.f32 %v2556_v23, %v8345_v34 }
0x16e8   :  { %7203 = vmatpush3.msra.mxu0 %v2088_v32  ;;  %v2560_v6 = vmul.f32 %v2558_v58, %v8343_v5  ;;  %7227 = vmatprep.subr.mxu1 %v7721_v12 }
0x16e9   :  { %7205 = vmatmul.mubr.msk.f32.vlgmr.msra.gmra.mxu0 %vm9287_vm2, %v8044_v20  ;;  %7207 = vmatprep.subr.mxu0 %v7721_v12 }
0x16ea   :  { %7208 = vmatpush3.msk.msra.mxu0 %vm309_vm0, %v2560_v6  ;;  %7211 = vmatprep.mubr.msk.f32.mxu0 %vm7722_vm1, %v7721_v12 }
0x16eb   :  { %7209 = vmatprep.subr.mxu0 %v7721_v12  ;;  %7228 = vmatpush3.msra.mxu1 %v3593_v17 }
0x16ec   :  { %7210 = vmatpush3.msra.mxu0 %v2559_v29  ;;  %7229 = vmatprep.subr.mxu1 %v7721_v12 }
0x16ed   :  { %7214 = vmatprep.subr.mxu0 %v7721_v12  ;;  %7230 = vmatpush3.msra.mxu1 %v3592_v0 }
0x1710   :  { %3355 = vxpose.xlu0.b32.start [1/2] (short) (narrow) %v8356_v38, 8  ;;  %v3584_v38 = vmul.f32 1.442695, %v3582_v56  ;;  %v8721_v56 = vld [vmem:[%s7746_s13 + $0x8] sm:$0xf] }
0x1714   :  { %3356 = vxpose.xlu0.b32.end [2/2] (short) (narrow) %v8352_v26, 8  ;;  %v3583_v26 = vmin.f32 %v8271_v31, 0.0 }
0x1716   :  { %v3586_v24 = vmul.f32 1.442695, %v3583_v26  ;;  %v8733_v26 = vld [vmem:[%s7751_s17 + $0x8] sm:$0xf] }
0x171a   :  { %3463 = vxpose.xlu1.b32.start [1/3] (short) (narrow) %v8416_v57, 8 }
0x171e   :  { %3464 = vxpose.xlu1.b32.cont [2/3] (short) (narrow) %v8424_v50, 8 }
0x1722   :  { %3465 = vxpose.xlu1.b32.end [3/3] (short) (narrow) %v8431_v37, 8 }
0x176c   :  { %v3269_v36 = vpop.xlane.xlu1 %3268  ;;  %v3266_v5 = vpop.xlane.xlu0 %3265 }
0x176d   :  { %v3272_v34 = vadd.f32 1e-16, %v3269_v36  ;;  %v3271_v54 = vadd.f32 1e-16, %v3266_v5 }
0x176f   :  { %7532 = vrcp.f32 %v3272_v34  ;;  %v6580_v34 = vld [vmem:[%s9349_s27] ss:$0 sm:$0xff] }
0x1770   :  { %v3263_v41 = vpop.xlane.xlu1 %3262  ;;  %7534 = vrcp.f32 %v3271_v54 }
0x1771   :  { %v3270_v62 = vadd.f32 1e-16, %v3263_v41 }
0x1773   :  { %7536 = vrcp.f32 %v3270_v62 }
0x1774   :  { %7538 = vpow2.f32 %v3584_v38  ;;  %v8728_v38 = vld [vmem:[%s7751_s17] sm:$0xff] }
0x1775   :  { %7540 = vpow2.f32 %v3586_v24 }
0x177c   :  { %v7533_v9 = vpop.eup %7532 }
0x177d   :  { %v7535_v7 = vpop.eup %7534  ;;  %v3278_v43 = vmul.f32 %v7533_v9, %v8636_v21  ;;  %v3920_v9 = vld [vmem:[%s9350_s7 + $0x10] sm:$0x3] }
0x177e   :  { %v3276_v27 = vmul.f32 %v7535_v7, %v8629_v30  ;;  %v3925_v24 = vrot.slane %v3920_v9, 1  ;;  %v3919_v7 = vld [vmem:[%s9350_s7 + $0x8] sm:$0xff]  ;;  %v6605_v9 = vld [vmem:[%s9356_s5] ss:$0 sm:$0xff] }
0x177f   :  { %v3281_v39 = vmul.f32 %v3278_v43, %v8474_v4  ;;  %v3679_v4 = vld [vmem:[%s9347_s14 + $0x18] sm:$0xff]  ;;  %v3924_v43 = vrot.slane %v3919_v7, 1 }
0x1780   :  { %v7537_v25 = vpop.eup %7536  ;;  %v3280_v45 = vmul.f32 %v3276_v27, %v8468_v44  ;;  %v3678_v44 = vld [vmem:[%s9347_s14 + $0x10] sm:$0xff] }
0x1781   :  { %v3274_v40 = vmul.f32 %v7537_v25, %v8627_v15  ;;  %v7539_v30 = vpop.eup %7538  ;;  %v4223_v27 = vld [vmem:[%s9351_s24 + $0x10] sm:$0x3] }
0x1782   :  { %v6578_v15 = vadd.f32 -1.0, %v7539_v30  ;;  %v7541_v48 = vpop.eup %7540 }
0x1783   :  { %v3279_v21 = vmul.f32 %v3274_v40, %v8472_v3  ;;  %v3677_v3 = vld [vmem:[%s9347_s14 + $0x8] sm:$0xff]  ;;  %v6579_v49 = vadd.f32 -1.0, %v7541_v48  ;;  %v3918_v40 = vld [vmem:[%s9350_s7] sm:$0xff] }
0x1784   :  { %v3590_v53 = vsel %vm3580_vm10, %v8267_v22, %v6578_v15 }
0x1785   :  { %v3591_v22 = vsel %vm3581_vm7, %v8271_v31, %v6579_v49  ;;  %vm3923_vm7 = vcmask 1046528  }
0x1786   :  { %v3926_v25 = vsel %vm3923_vm7, %v3924_v43, %v3925_v24 }
0x178c   :  { %v8675_v33 = vpop.trf.xlu0 }
0x178d   :  { %7212 = vmatmul.mubr.msk.f32.vlgmr.msra.gmra.mxu0 %vm9287_vm2, %v8675_v33 }
0x178e   :  { %7215 = vmatpush3.msra.mxu0 %v3281_v39  ;;  %7220 = vmatprep.mubr.msk.f32.mxu0 %vm7722_vm1, %v7721_v12  ;;  %v4227_v39 = vrot.slane %v4223_v27, 1  ;;  %v6597_v27 = vld [vmem:[#allocation7] ss:$0 sm:$0xff] }
0x178f   :  { %7216 = vmatprep.subr.mxu0 %v7721_v12 }
0x1790   :  { %7217 = vmatpush3.msra.mxu0 %v3280_v45  ;;  %v4222_v45 = vld [vmem:[%s9351_s24 + $0x8] sm:$0xff] }
0x1791   :  { %7218 = vmatprep.subr.mxu0 %v7721_v12  ;;  %v4226_v30 = vrot.slane %v4222_v45, 1 }
0x1792   :  { %7219 = vmatpush3.msra.mxu0 %v3279_v21 }
0x1793   :  { %7234 = vmatprep.subr.mxu0 %v3679_v4  ;;  %v4228_v15 = vsel %vm3923_vm7, %v4226_v30, %v4227_v39 }
0x1796   :  { %v8688_v46 = vpop.trf.xlu1 }
0x1797   :  { %7221 = vmatmul.mubr.msk.f32.vlgmr.msra.gmra.mxu0 %vm9285_vm4, %v8688_v46 }
0x1798   :  { %7235 = vmatpush3.msra.mxu0 %v3679_v4  ;;  %7242 = vmatprep.mubr.msk.f32.mxu0 %vm1037_vm6, %v3590_v53  ;;  %v4221_v53 = vld [vmem:[%s9351_s24] sm:$0xff] }
0x1799   :  { %7236 = vmatprep.subr.mxu0 %v3678_v44 }
0x179a   :  { %7237 = vmatpush3.msra.mxu0 %v3678_v44 }
0x179b   :  { %7238 = vmatprep.subr.mxu0 %v3677_v3 }
0x179c   :  { %7239 = vmatpush3.msra.mxu0 %v3677_v3  ;;  %v8768_v3 = vld [vmem:[%s9352_s16 + $0x8] sm:$0xff] }
0x179d   :  { %7240 = vmatprep.subr.mxu0 %v3676_v55 }
0x179e   :  { %7241 = vmatpush3.msra.mxu0 %v3676_v55  ;;  %v4511_v55 = vld [vmem:[%s9352_s16] sm:$0xff] }
0x179f   :  { %7243 = vmatmul.mubr.msk.f32.vlgmr.msra.gmra.mxu0 %vm1037_vm6, %v3591_v22 }
0x17a9   :  { %v3351_v28 = vpop.f32.mrf.mxu0 }
0x17aa   :  { %v3569_v16 = vadd.f32 %v3568_v8, %v3351_v28 }
0x17ab   :  { %v7206_v60 = vpop.f32.mrf.mxu0 }
0x184d   :  { %v3459_v47 = vpop.f32.mrf.mxu0 }
0x184e   :  { %v3570_v52 = vadd.f32 %v3569_v16, %v3459_v47 }
0x184f   :  { %v7213_v31 = vpop.f32.mrf.mxu0 }
0x1850   :  { %v6596_v31 = vld [vmem:[%s9354_s3] ss:$0 sm:$0xff] }
0x1857   :  { %v3564_v42 = vpop.f32.mrf.mxu0 }
0x1858   :  { %v3571_v32 = vadd.f32 %v3570_v52, %v3564_v42 }
0x1859   :  { %v7222_v18 = vpop.f32.mrf.mxu0 }
0x185a   :  { %v3573_v58 = vmul.f32 0.33333334, %v3571_v32 }
0x185c   :  { %v3575_v23 = vmin.f32 %v3573_v58, 0.0  ;;  %vm3574_vm10 = vcmp.gt.f32.partialorder %v3573_v58, 0.0 }
0x185e   :  { %v3576_v6 = vmul.f32 1.442695, %v3575_v23  ;;  %v6604_v23 = vld [vmem:[%s9355_s0] ss:$0 sm:$0xff] }
0x185f   :  { %v8781_v49 = vpop.f32.mrf.mxu0 }
0x1860   :  { %7542 = vpow2.f32 %v3576_v6 }
0x1861   :  { %v8783_v22 = vpop.f32.mrf.mxu0 }
0x186d   :  { %v7543_v29 = vpop.eup %7542 }
0x186e   :  { %v6577_v36 = vadd.f32 -1.0, %v7543_v29 }
0x1870   :  { %v3579_v5 = vsel %vm3574_vm10, %v3573_v58, %v6577_v36  ;;  %vm3928_vm10 = vcmask 72704  }
0x1871   :  { %7232 = vmatmul.mubr.msk.f32.vlgmr.msra.gmra.mxu1 %vm1037_vm6, %v3579_v5  ;;  %vm9286_vm6 = vcmask 1040384  }
0x1872   :  { %7247 = vmatprep.mubr.msk.f32.mxu1 %vm867_vm5, %v8711_v19  ;;  %7255 = vmatprep.subr.msk.mxu0 %vm9286_vm6, %v3925_v24 }
0x1873   :  { %7256 = vmatpush3.msk.msra.mxu0 %vm9286_vm6, %v3925_v24 }
0x1874   :  { %7257 = vmatprep.subr.mxu0 %v3926_v25 }
0x1875   :  { %7258 = vmatpush3.msra.mxu0 %v3926_v25 }
0x1876   :  { %7269 = vmatprep.subr.msk.mxu0 %vm9286_vm6, %v4227_v39 }
0x1931   :  { %v3672_v41 = vpop.f32.mrf.mxu1 }
0x1932   :  { %v8716_v54 = vadd.f32 %v6580_v34, %v3672_v41 }
0x1933   :  { %v7233_v62 = vpop.f32.mrf.mxu1 }
0x1934   :  { %7245 = vmatprep.subr.mxu1 %v8716_v54 }
0x1935   :  { %7246 = vmatpush3.msra.mxu1 %v8716_v54 }
0x1936   :  { %7248 = vmatmul.mubr.msk.f32.vlgmr.msra.gmra.mxu1 %vm867_vm5, %v8721_v56  ;;  %7250 = vmatprep.subr.mxu1 %v8716_v54 }
0x1937   :  { %7251 = vmatpush3.msra.mxu1 %v8716_v54  ;;  %7252 = vmatprep.mubr.msk.f32.mxu1 %vm867_vm5, %v8728_v38 }
0x1938   :  { %7262 = vmatprep.subr.msk.mxu1 %vm9286_vm6, %v3919_v7 }
0x193a   :  { %7253 = vmatmul.mubr.msk.f32.vlgmr.msra.gmra.mxu1 %vm867_vm5, %v8733_v26 }
0x193b   :  { %7263 = vmatpush3.msk.msra.mxu1 %vm9286_vm6, %v3919_v7 }
0x193c   :  { %7264 = vmatprep.subr.mxu1 %v3918_v40 }
0x193d   :  { %7265 = vmatpush3.msra.mxu1 %v3918_v40 }
0x193e   :  { %7276 = vmatprep.subr.msk.mxu1 %vm9286_vm6, %v4222_v45 }
0x19f6   :  { %v7249_v21 = vpop.f32.mrf.mxu1 }
0x19f8   :  { %v3834_v4 = vpop.f32.mrf.mxu1 }
0x19f9   :  { %7259 = vmatprep.mubr.msk.f32.mxu0 %vm3928_vm10, %v3834_v4 }
0x19fa   :  { %v8751_v44 = vpop.f32.mrf.mxu1  ;;  %7260 = vmatmul.mubr.msk.f32.vlgmr.msra.gmra.mxu0 %vm3928_vm10, %v7249_v21 }
0x19fb   :  { %7270 = vmatpush3.msk.msra.mxu0 %vm9286_vm6, %v4227_v39 }
0x19fc   :  { %v8755_v48 = vpop.f32.mrf.mxu1  ;;  %7271 = vmatprep.subr.mxu0 %v4228_v15 }
0x19fd   :  { %7266 = vmatprep.mubr.msk.f32.mxu1 %vm3928_vm10, %v8755_v48  ;;  %7272 = vmatpush3.msra.mxu0 %v4228_v15 }
0x19fe   :  { %7273 = vmatprep.mubr.msk.f32.mxu0 %vm3928_vm10, %v8755_v48  ;;  %7267 = vmatmul.mubr.msk.f32.vlgmr.msra.gmra.mxu1 %vm3928_vm10, %v8751_v44 }
0x19ff   :  { %7274 = vmatmul.mubr.msk.f32.vlgmr.msra.gmra.mxu0 %vm3928_vm10, %v8751_v44  ;;  %7277 = vmatpush3.msk.msra.mxu1 %vm9286_vm6, %v4222_v45 }
0x1a00   :  { %7280 = vmatprep.mubr.msk.f32.mxu1 %vm3928_vm10, %v3834_v4  ;;  %7278 = vmatprep.subr.mxu1 %v4221_v53 }
0x1a01   :  { %7279 = vmatpush3.msra.mxu1 %v4221_v53 }
0x1a02   :  { %7281 = vmatmul.mubr.msk.f32.vlgmr.msra.gmra.mxu1 %vm3928_vm10, %v7249_v21  ;;  %7290 = vmatprep.subr.msk.mxu1 %vm9286_vm6, %v8768_v3 }
0x1a03   :  { %7291 = vmatpush3.msk.msra.mxu1 %vm9286_vm6, %v8768_v3  ;;  %7294 = vmatprep.mubr.msk.f32.mxu1 %vm3928_vm10, %v3834_v4  ;;  %v6606_v4 = vld [vmem:[#allocation8] ss:$0 sm:$0xff] }
0x1a04   :  { %7292 = vmatprep.subr.mxu1 %v4511_v55 }
0x1a05   :  { %7293 = vmatpush3.msra.mxu1 %v4511_v55 }
0x1a06   :  { %7295 = vmatmul.mubr.msk.f32.vlgmr.msra.gmra.mxu1 %vm3928_vm10, %v7249_v21 }
0x1a07   :  { %7306 = vmatprep.mubr.msk.f32.mxu1 %vm867_vm5, %v8711_v19 }
0x1aba   :  { %v7261_v28 = vpop.f32.mrf.mxu0 }
0x1abc   :  { %v4004_v60 = vpop.f32.mrf.mxu0 }
0x1abe   :  { %v7268_v61 = vpop.f32.mrf.mxu1 }
0x1abf   :  { %v4093_v17 = vadd.f32 %v7268_v61, %v7261_v28  ;;  %v7275_v0 = vpop.f32.mrf.mxu0 }
0x1ac0   :  { %v4087_v47 = vpop.f32.mrf.mxu1 }
0x1ac1   :  { %v8787_v8 = vadd.f32 %v6595_v63, %v4093_v17  ;;  %v4088_v16 = vadd.f32 %v4087_v47, %v4004_v60  ;;  %v4298_v58 = vpop.f32.mrf.mxu0 }
0x1ac2   :  { %v7282_v52 = vpop.f32.mrf.mxu1 }
0x1ac3   :  { %v8789_v42 = vadd.f32 %v6595_v63, %v4088_v16  ;;  %v4381_v32 = vadd.f32 %v7282_v52, %v7275_v0  ;;  %v4113_v18 = vmul.f32 %v6596_v31, %v8787_v8 }
0x1ac4   :  { %v4375_v6 = vpop.f32.mrf.mxu1 }
0x1ac5   :  { %v4376_v29 = vadd.f32 %v4375_v6, %v4298_v58  ;;  %v4119_v36 = vsel %vm4118_vm9, %v4113_v18, 0.0  ;;  %v4112_v5 = vmul.f32 %v6596_v31, %v8789_v42  ;;  %v8795_v34 = vadd.f32 %v6604_v23, %v4381_v32 }
0x1ac6   :  { %4120 = vadd.xlane.f32.xlu1 %v4119_v36 }
0x1ac7   :  { %v8797_v41 = vadd.f32 %v6604_v23, %v4376_v29  ;;  %v4115_v62 = vsel %vm4114_vm8, %v4112_v5, 0.0  ;;  %v4401_v43 = vmul.f32 %v6605_v9, %v8795_v34 }
0x1ac8   :  { %4116 = vadd.xlane.f32.xlu0 %v4115_v62 }
0x1ac9   :  { %v4400_v24 = vmul.f32 %v6605_v9, %v8797_v41  ;;  %v4405_v25 = vsel %vm4118_vm9, %v4401_v43, 0.0 }
0x1acb   :  { %v4402_v7 = vsel %vm4114_vm8, %v4400_v24, 0.0 }
0x1acc   :  { %4403 = vadd.xlane.f32.xlu0 %v4402_v7 }
0x1ad0   :  { %4406 = vadd.xlane.f32.xlu0 %v4405_v25 }
0x1b4f   :  { %v4121_v39 = vpop.xlane.xlu1 %4120 }
0x1b50   :  { %v4130_v40 = vadd.f32 %v6597_v27, %v4121_v39 }
0x1b51   :  { %v4117_v45 = vpop.xlane.xlu0 %4116 }
0x1b52   :  { %v4134_v30 = vmul.f32 0.2, %v4130_v40  ;;  %v4129_v21 = vadd.f32 %v6597_v27, %v4117_v45  ;;  %vm4132_vm11 = vcmp.gt.f32.partialorder %v4130_v40, 0.0 }
0x1b54   :  { %v4133_v15 = vmul.f32 0.2, %v4129_v21  ;;  %v4136_v53 = vsel %vm4132_vm11, %v4130_v40, %v4134_v30  ;;  %vm4131_vm4 = vcmp.gt.f32.partialorder %v4129_v21, 0.0 }
0x1b55   :  { %4144 = vperm.xlu0 %7492, %v4136_v53   ;;  %v4404_v55 = vpop.xlane.xlu0 %4403 }
0x1b56   :  { %v4415_v28 = vadd.f32 %v6606_v4, %v4404_v55  ;;  %v4135_v60 = vsel %vm4131_vm4, %v4129_v21, %v4133_v15 }
0x1b57   :  { %4139 = vperm.xlu1 %7493, %v4135_v60  }
0x1b58   :  { %v4419_v61 = vmul.f32 0.2, %v4415_v28  ;;  %vm4417_vm6 = vcmp.gt.f32.partialorder %v4415_v28, 0.0 }
0x1b59   :  { %v4407_v63 = vpop.xlane.xlu0 %4406 }
0x1b5a   :  { %v4416_v17 = vadd.f32 %v6606_v4, %v4407_v63  ;;  %v4421_v0 = vsel %vm4417_vm6, %v4415_v28, %v4419_v61  ;;  %vm4702_vm6 = vcmask 68608  }
0x1b5b   :  { %4425 = vperm.xlu1 %7493, %v4421_v0  }
0x1b5c   :  { %v4420_v47 = vmul.f32 0.2, %v4416_v17  ;;  %vm4418_vm2 = vcmp.gt.f32.partialorder %v4416_v17, 0.0 }
0x1b5e   :  { %v4422_v31 = vsel %vm4418_vm2, %v4416_v17, %v4420_v47  ;;  %vm4526_vm2 = vcmask 1042432  }
0x1b5f   :  { %4430 = vperm.xlu1 %7493, %v4422_v31  }
0x1bd0   :  { %v4145_v16 = vpop.permute.xlu0 %4144 }
0x1bd1   :  { %v4148_v52 = vsel %vm1241_vm12, %v4145_v16, -1e+30 }
0x1bd2   :  { %v4140_v32 = vpop.permute.xlu1 %4139  ;;  %v4150_v58 = vsel %vm1255_vm14, %v4148_v52, -inf }
0x1bd3   :  { %v4147_v18 = vsel %vm1240_vm13, %v4140_v32, -1e+30 }
0x1bd4   :  { %v4149_v23 = vsel %vm867_vm5, %v4147_v18, -inf }
0x1bd5   :  { %v4151_v6 = vmax.f32 %v4149_v23, %v4150_v58 }
0x1bd6   :  { %v4426_v29 = vpop.permute.xlu1 %4425 }
0x1bd7   :  { %v4152_v36 = vrot.slane %v4151_v6, 4  ;;  %v4433_v62 = vsel %vm1524_vm15, %v4426_v29, -1e+30 }
0x1bd8   :  { %v4435_v43 = vsel %vm867_vm5, %v4433_v62, -inf }
0x1bd9   :  { %v4153_v5 = vmax.f32 %v4151_v6, %v4152_v36 }
0x1bda   :  { %v4431_v9 = vpop.permute.xlu1 %4430 }
0x1bdb   :  { %v4154_v24 = vrot.slane %v4153_v5, 2  ;;  %v4434_v7 = vsel %vm1525_vm3, %v4431_v9, -1e+30 }
0x1bdc   :  { %v4436_v25 = vsel %vm1255_vm14, %v4434_v7, -inf }
0x1bdd   :  { %v4437_v27 = vmax.f32 %v4435_v43, %v4436_v25  ;;  %v4155_v39 = vmax.f32 %v4153_v5, %v4154_v24 }
0x1bdf   :  { %v4438_v40 = vrot.slane %v4437_v27, 4  ;;  %v4156_v45 = vrot.slane %v4155_v39, 1 }
0x1be1   :  { %v4439_v30 = vmax.f32 %v4437_v27, %v4438_v40  ;;  %v4157_v21 = vmax.f32 %v4155_v39, %v4156_v45 }
0x1be3   :  { %v4440_v4 = vrot.slane %v4439_v30, 2  ;;  %v4159_v15 = vmul.f32 %v8733_v26, %v4157_v21  ;;  %v4158_v55 = vmul.f32 %v8728_v38, %v4157_v21 }
0x1be5   :  { %v4163_v28 = vsel %vm1255_vm14, %v4159_v15, 0.0  ;;  %v4160_v61 = vsel %vm867_vm5, %v4158_v55, 0.0  ;;  %v4441_v63 = vmax.f32 %v4439_v30, %v4440_v4 }
0x1be6   :  { %4164 = vadd.xlane.f32.xlu0 %v4163_v28  ;;  %4161 = vadd.xlane.f32.xlu1 %v4160_v61 }
0x1be7   :  { %v4442_v17 = vrot.slane %v4441_v63, 1 }
0x1be9   :  { %v4443_v47 = vmax.f32 %v4441_v63, %v4442_v17 }
0x1beb   :  { %v4444_v16 = vmul.f32 %v8711_v19, %v4443_v47  ;;  %v4445_v32 = vmul.f32 %v8721_v56, %v4443_v47 }
0x1bed   :  { %v4446_v52 = vsel %vm867_vm5, %v4444_v16, 0.0  ;;  %v4449_v18 = vsel %vm1255_vm14, %v4445_v32, 0.0 }
0x1bee   :  { %4447 = vadd.xlane.f32.xlu0 %v4446_v52 }
0x1bf2   :  { %4450 = vadd.xlane.f32.xlu0 %v4449_v18 }
0x1c6f   :  { %v4165_v58 = vpop.xlane.xlu0 %4164  ;;  %v4162_v23 = vpop.xlane.xlu1 %4161 }
0x1c70   :  { %v4167_v6 = vsub.f32 %v4136_v53, %v4165_v58  ;;  %v4166_v29 = vsub.f32 %v4135_v60, %v4162_v23 }
0x1c72   :  { %v4170_v36 = vmul.f32 1.442695, %v4167_v6  ;;  %v4168_v5 = vmul.f32 1.442695, %v4166_v29 }
0x1c74   :  { %7544 = vpow2.f32 %v4170_v36 }
0x1c75   :  { %7546 = vpow2.f32 %v4168_v5 }
0x1c77   :  { %v4448_v62 = vpop.xlane.xlu0 %4447 }
0x1c78   :  { %v4452_v9 = vsub.f32 %v4421_v0, %v4448_v62 }
0x1c7a   :  { %v4454_v24 = vmul.f32 1.442695, %v4452_v9 }
0x1c7b   :  { %v4451_v7 = vpop.xlane.xlu0 %4450 }
0x1c7c   :  { %7548 = vpow2.f32 %v4454_v24  ;;  %v4453_v43 = vsub.f32 %v4422_v31, %v4451_v7 }
0x1c7e   :  { %v4456_v25 = vmul.f32 1.442695, %v4453_v43 }
0x1c80   :  { %7550 = vpow2.f32 %v4456_v25 }
0x1c81   :  { %v7545_v27 = vpop.eup %7544 }
0x1c82   :  { %v7547_v39 = vpop.eup %7546  ;;  %4179 = vperm.xlu0 %7492, %v7545_v27  }
0x1c83   :  { %4174 = vperm.xlu1 %7493, %v7547_v39  }
0x1c89   :  { %v7549_v40 = vpop.eup %7548 }
0x1c8a   :  { %4460 = vperm.xlu1 %7493, %v7549_v40  }
0x1c8d   :  { %v7551_v53 = vpop.eup %7550 }
0x1c8e   :  { %4465 = vperm.xlu1 %7493, %v7551_v53  }
0x1cfd   :  { %v4180_v60 = vpop.permute.xlu0 %4179 }
0x1cfe   :  { %v4183_v45 = vmul.f32 %v8733_v26, %v4180_v60  ;;  %v4175_v30 = vpop.permute.xlu1 %4174 }
0x1cff   :  { %v4182_v0 = vmul.f32 %v8728_v38, %v4175_v30 }
0x1d00   :  { %v4185_v21 = vsel %vm1255_vm14, %v4183_v45, 0.0 }
0x1d01   :  { %v4184_v31 = vsel %vm867_vm5, %v4182_v0, 0.0 }
0x1d02   :  { %v4186_v4 = vadd.f32 %v4185_v21, %v4184_v31 }
0x1d04   :  { %v4187_v15 = vrot.slane %v4186_v4, 4 }
0x1d05   :  { %v4461_v55 = vpop.permute.xlu1 %4460 }
0x1d06   :  { %v4188_v28 = vadd.f32 %v4187_v15, %v4186_v4  ;;  %v4468_v63 = vmul.f32 %v8711_v19, %v4461_v55 }
0x1d08   :  { %v4189_v61 = vrot.slane %v4188_v28, 2  ;;  %v4470_v52 = vsel %vm867_vm5, %v4468_v63, 0.0 }
0x1d09   :  { %v4466_v17 = vpop.permute.xlu1 %4465 }
0x1d0a   :  { %v4469_v47 = vmul.f32 %v8721_v56, %v4466_v17  ;;  %v4190_v16 = vadd.f32 %v4189_v61, %v4188_v28 }
0x1d0c   :  { %v4471_v32 = vsel %vm1255_vm14, %v4469_v47, 0.0  ;;  %v4191_v18 = vrot.slane %v4190_v16, 1 }
0x1d0d   :  { %v4472_v58 = vadd.f32 %v4471_v32, %v4470_v52 }
0x1d0e   :  { %v4192_v23 = vadd.f32 %v4191_v18, %v4190_v16 }
0x1d0f   :  { %v4473_v6 = vrot.slane %v4472_v58, 4 }
0x1d10   :  { %v4194_v29 = vmul.f32 %v8733_v26, %v4192_v23  ;;  %v4193_v36 = vmul.f32 %v8728_v38, %v4192_v23 }
0x1d11   :  { %v4474_v5 = vadd.f32 %v4473_v6, %v4472_v58  ;;  %v4516_v6 = vrot.slane %v8768_v3, 1 }
0x1d12   :  { %v4198_v62 = vsel %vm1255_vm14, %v4194_v29, 0.0  ;;  %v4195_v9 = vsel %vm867_vm5, %v4193_v36, 0.0  ;;  %v4513_v29 = vld [vmem:[%s9352_s16 + $0x10] sm:$0xf] }
0x1d13   :  { %v4475_v24 = vrot.slane %v4474_v5, 2  ;;  %4199 = vadd.xlane.f32.xlu0 %v4198_v62  ;;  %4196 = vadd.xlane.f32.xlu1 %v4195_v9  ;;  %v4517_v36 = vrot.slane %v4513_v29, 1 }
0x1d15   :  { %v4476_v7 = vadd.f32 %v4475_v24, %v4474_v5  ;;  %7283 = vmatprep.subr.msk.mxu0 %vm4526_vm2, %v4517_v36 }
0x1d16   :  { %7284 = vmatpush3.msk.msra.mxu0 %vm4526_vm2, %v4517_v36 }
0x1d17   :  { %v4477_v43 = vrot.slane %v4476_v7, 1 }
0x1d19   :  { %v4478_v25 = vadd.f32 %v4477_v43, %v4476_v7 }
0x1d1b   :  { %v4479_v60 = vmul.f32 %v8711_v19, %v4478_v25  ;;  %v4480_v30 = vmul.f32 %v8721_v56, %v4478_v25 }
0x1d1d   :  { %v4481_v45 = vsel %vm867_vm5, %v4479_v60, 0.0  ;;  %v4484_v0 = vsel %vm1255_vm14, %v4480_v30, 0.0 }
0x1d1e   :  { %4482 = vadd.xlane.f32.xlu0 %v4481_v45 }
0x1d22   :  { %4485 = vadd.xlane.f32.xlu0 %v4484_v0 }
0x1d9c   :  { %v4200_v21 = vpop.xlane.xlu0 %4199  ;;  %v4197_v31 = vpop.xlane.xlu1 %4196 }
0x1d9d   :  { %v4201_v4 = vadd.f32 1e-16, %v4197_v31  ;;  %v4202_v15 = vadd.f32 1e-16, %v4200_v21 }
0x1d9f   :  { %7552 = vrcp.f32 %v4201_v4 }
0x1da0   :  { %7554 = vrcp.f32 %v4202_v15 }
0x1da7   :  { %v4483_v55 = vpop.xlane.xlu0 %4482 }
0x1da8   :  { %v4487_v28 = vadd.f32 1e-16, %v4483_v55 }
0x1daa   :  { %7556 = vrcp.f32 %v4487_v28 }
0x1dab   :  { %v4486_v61 = vpop.xlane.xlu0 %4485 }
0x1dac   :  { %v4488_v63 = vadd.f32 1e-16, %v4486_v61  ;;  %v7553_v17 = vpop.eup %7552 }
0x1dad   :  { %v4204_v47 = vmul.f32 %v7553_v17, %v7547_v39  ;;  %v7555_v16 = vpop.eup %7554  ;;  %v4518_v39 = vsel %vm3923_vm7, %v4516_v6, %v4517_v36  ;;  %v7296_v17 = vpop.f32.mrf.mxu1 }
0x1dae   :  { %7558 = vrcp.f32 %v4488_v63  ;;  %v4206_v52 = vmul.f32 %v7555_v16, %v7545_v27  ;;  %7285 = vmatprep.subr.mxu0 %v4518_v39  ;;  %v6613_v16 = vld [vmem:[%s9358_s29] ss:$0 sm:$0xff] }
0x1daf   :  { %4209 = vperm.xlu1 %7493, %v4204_v47   ;;  %7286 = vmatpush3.msra.mxu0 %v4518_v39 }
0x1db0   :  { %7297 = vmatprep.subr.mxu0 %v7721_v12 }
0x1db3   :  { %4214 = vperm.xlu1 %7493, %v4206_v52  }
0x1db7   :  { %v7557_v32 = vpop.eup %7556 }
0x1db8   :  { %v4490_v18 = vmul.f32 %v7557_v32, %v7549_v40  ;;  %v4672_v32 = vpop.f32.mrf.mxu1 }
0x1dba   :  { %4495 = vperm.xlu0 %7492, %v4490_v18  }
0x1dbb   :  { %v7559_v58 = vpop.eup %7558 }
0x1dbc   :  { %v4492_v23 = vmul.f32 %v7559_v58, %v7551_v53  ;;  %v6582_v53 = vld [vmem:[%s9357_s9] ss:$0 sm:$0xff] }
0x1dbd   :  { %v3760_v62 = vadd.f32 %v6582_v53, %v8783_v22  ;;  %v3765_v60 = vadd.f32 %v8781_v49, %v6582_v53  ;;  %v6614_v58 = vld [vmem:[%s9359_s8] ss:$0 sm:$0xff]  ;;  %v6615_v53 = vld [vmem:[#allocation9] ss:$0 sm:$0xff] }
0x1dbe   :  { %4500 = vperm.xlu1 %7493, %v4492_v23  }
0x1e2a   :  { %v4210_v27 = vpop.permute.xlu1 %4209 }
0x1e2b   :  { %v4217_v40 = vmul.f32 %v4210_v27, %v8789_v42 }
0x1e2d   :  { %v4219_v24 = vadd.f32 %v4217_v40, %v3760_v62 }
0x1e2e   :  { %v4215_v5 = vpop.permute.xlu1 %4214 }
0x1e2f   :  { %v4218_v7 = vmul.f32 %v4215_v5, %v8787_v8 }
0x1e31   :  { %v4220_v0 = vadd.f32 %v4218_v7, %v3765_v60 }
0x1e35   :  { %v4496_v3 = vpop.permute.xlu0 %4495 }
0x1e36   :  { %v4503_v9 = vmul.f32 %v4496_v3, %v8797_v41 }
0x1e38   :  { %v4505_v43 = vadd.f32 %v4503_v9, %v3760_v62 }
0x1e39   :  { %v4501_v25 = vpop.permute.xlu1 %4500 }
0x1e3a   :  { %v4507_v45 = vadd.f32 %v4505_v43, %v4219_v24  ;;  %v4504_v30 = vmul.f32 %v4501_v25, %v8795_v34 }
0x1e3c   :  { %v8854_v21 = vmul.f32 0.5, %v4507_v45  ;;  %v4506_v42 = vadd.f32 %v4504_v30, %v3765_v60  ;;  %v4993_v60 = vld [vmem:[%s9360_s19 + $0x10] sm:$0xf]  ;;  %v8884_v45 = vld [vmem:[%s9360_s19 + $0x8] sm:$0xff] }
0x1e3e   :  { %v6398_v31 = vmin.f32 %v8854_v21, 0.0  ;;  %v4508_v4 = vadd.f32 %v4506_v42, %v4220_v0  ;;  %7287 = vmatprep.mubr.msk.f32.mxu0 %vm4114_vm8, %v8854_v21  ;;  %vm6396_vm4 = vcmp.gt.f32.partialorder %v8854_v21, 0.0  ;;  %v4997_v42 = vrot.slane %v4993_v60, 1 }
0x1e40   :  { %v8859_v22 = vmul.f32 0.5, %v4508_v4  ;;  %v6400_v8 = vmul.f32 1.442695, %v6398_v31  ;;  %v4996_v31 = vrot.slane %v8884_v45, 1 }
0x1e42   :  { %v6399_v41 = vmin.f32 %v8859_v22, 0.0  ;;  %7288 = vmatmul.mubr.msk.f32.vlgmr.msra.gmra.mxu0 %vm4114_vm8, %v8859_v22  ;;  %7560 = vpow2.f32 %v6400_v8  ;;  %vm6397_vm11 = vcmp.gt.f32.partialorder %v8859_v22, 0.0 }
0x1e43   :  { %7301 = vmatprep.mubr.msk.f32.mxu0 %vm7722_vm1, %v7721_v12 }
0x1e44   :  { %v6402_v49 = vmul.f32 1.442695, %v6399_v41  ;;  %v4998_v41 = vsel %vm3923_vm7, %v4996_v31, %v4997_v42 }
0x1e46   :  { %7562 = vpow2.f32 %v6402_v49 }
0x1e4f   :  { %v7561_v34 = vpop.eup %7560 }
0x1e50   :  { %v6660_v15 = vadd.f32 -1.0, %v7561_v34 }
0x1e52   :  { %v6406_v55 = vsel %vm6396_vm4, %v8854_v21, %v6660_v15 }
0x1e53   :  { %v7563_v28 = vpop.eup %7562  ;;  %6409 = vst.msk [vmem:[#allocation14] sm:$0xff] %vm4114_vm8, %v6406_v55 }
0x1e54   :  { %v6661_v61 = vadd.f32 -1.0, %v7563_v28 }
0x1e56   :  { %v6407_v63 = vsel %vm6397_vm11, %v8859_v22, %v6661_v61  ;;  %vm9361_vm11 = vcmask 97280  }
0x1e57   :  { %6410 = vst.msk [vmem:[#allocation14 + $0x8] sm:$0xf] %vm4118_vm9, %v6407_v63 }
0x1f02   :  { %v7289_v47 = vpop.f32.mrf.mxu0 }
0x1f03   :  { %v4678_v52 = vadd.f32 %v7296_v17, %v7289_v47 }
0x1f04   :  { %v4595_v18 = vpop.f32.mrf.mxu0 }
0x1f05   :  { %v8874_v23 = vadd.f32 %v6613_v16, %v4678_v52  ;;  %v4673_v6 = vadd.f32 %v4672_v32, %v4595_v18 }
0x1f07   :  { %v8876_v29 = vadd.f32 %v6613_v16, %v4673_v6  ;;  %v4698_v36 = vmul.f32 %v6614_v58, %v8874_v23 }
0x1f09   :  { %v4703_v39 = vsel %vm4702_vm6, %v4698_v36, 0.0  ;;  %v4697_v27 = vmul.f32 %v6614_v58, %v8876_v29 }
0x1f0a   :  { %4704 = vadd.xlane.f32.xlu1 %v4703_v39 }
0x1f0b   :  { %v4699_v40 = vsel %vm3928_vm10, %v4697_v27, 0.0 }
0x1f0c   :  { %4700 = vadd.xlane.f32.xlu0 %v4699_v40 }
0x1f93   :  { %v4705_v5 = vpop.xlane.xlu1 %4704 }
0x1f94   :  { %v4714_v3 = vadd.f32 %v6615_v53, %v4705_v5 }
0x1f95   :  { %v4701_v62 = vpop.xlane.xlu0 %4700 }
0x1f96   :  { %v4718_v9 = vmul.f32 0.2, %v4714_v3  ;;  %v4713_v24 = vadd.f32 %v6615_v53, %v4701_v62  ;;  %vm4716_vm9 = vcmp.gt.f32.partialorder %v4714_v3, 0.0 }
0x1f98   :  { %vm4715_vm4 = vcmp.gt.f32.partialorder %v4713_v24, 0.0  ;;  %v4717_v7 = vmul.f32 0.2, %v4713_v24  ;;  %v4720_v43 = vsel %vm4716_vm9, %v4714_v3, %v4718_v9  ;;  %vm9362_vm9 = vcmp.gt.f32.partialorder %v8104_v51, 0.0 }
0x1f99   :  { %4728 = vperm.xlu0 %7492, %v4720_v43  }
0x1f9a   :  { %v4719_v25 = vsel %vm4715_vm4, %v4713_v24, %v4717_v7 }
0x1f9b   :  { %4723 = vperm.xlu1 %7493, %v4719_v25  }
0x2014   :  { %v4729_v30 = vpop.permute.xlu0 %4728 }
0x2015   :  { %v4732_v0 = vmul.f32 %v8733_v26, %v4729_v30 }
0x2016   :  { %v4724_v4 = vpop.permute.xlu1 %4723 }
0x2017   :  { %v4731_v8 = vmul.f32 %v8728_v38, %v4724_v4  ;;  %7298 = vmatpush3.msk.msra.mxu0 %vm309_vm0, %v4732_v0 }
0x2018   :  { %7299 = vmatprep.subr.mxu0 %v7721_v12 }
0x2019   :  { %7300 = vmatpush3.msra.mxu0 %v4731_v8 }
0x201a   :  { %7302 = vmatmul.mubr.msk.f32.vlgmr.msra.gmra.mxu0 %vm9361_vm11, %v8044_v20  ;;  %7309 = vmatprep.subr.msk.mxu0 %vm4526_vm2, %v4997_v42 }
0x201b   :  { %7310 = vmatpush3.msk.msra.mxu0 %vm4526_vm2, %v4997_v42  ;;  %7313 = vmatprep.mubr.msk.f32.mxu0 %vm4114_vm8, %v8854_v21 }
0x201c   :  { %7311 = vmatprep.subr.mxu0 %v4998_v41 }
0x201d   :  { %7312 = vmatpush3.msra.mxu0 %v4998_v41 }
0x201e   :  { %7314 = vmatmul.mubr.msk.f32.vlgmr.msra.gmra.mxu0 %vm4114_vm8, %v8859_v22  ;;  %7323 = vmatprep.subr.mxu0 %v7721_v12 }
0x201f   :  { %7327 = vmatprep.mubr.msk.f32.mxu0 %vm7722_vm1, %v7721_v12 }
0x20da   :  { %v4802_v49 = vpop.f32.mrf.mxu0 }
0x20db   :  { %v4806_v34 = vsel %vm9362_vm9, %v4802_v49, -1e+15  ;;  %v4991_v49 = vld [vmem:[%s9360_s19] sm:$0xff] }
0x20dc   :  { %v7303_v15 = vpop.f32.mrf.mxu0  ;;  %v4807_v55 = vsel %vm867_vm5, %v4806_v34, -inf }
0x20dd   :  { %4808 = vmax.xlane.f32.xlu1 %v4807_v55 }
0x2166   :  { %v4809_v28 = vpop.xlane.xlu1 %4808 }
0x2167   :  { %vm4810_vm2 = vcmp.eq.f32.partialorder %v4806_v34, %v4809_v28  ;;  %v6626_v28 = vld [vmem:[%s9363_s30] ss:$0 sm:$0xff] }
0x2168   :  { %v4811_v21 = vsel %vm4810_vm2, %v8309_v2, 8 }
0x2169   :  { %v4812_v61 = vsel %vm867_vm5, %v4811_v21, 2147483647 }
0x216a   :  { %v4814_v22 = vshra.s32 %v4812_v61, 16  ;;  %v4813_v17 = vand.u32 65535, %v4812_v61 }
0x216c   :  { %v4816_v63 = vcvt.s32.f32 %v4814_v22  ;;  %v4815_v16 = vcvt.s32.f32 %v4813_v17  ;;  %v6627_v22 = vld [vmem:[%s9365_s20] ss:$0 sm:$0xff] }
0x216e   :  { %4817 = vmin.xlane.f32.xlu0 %v4816_v63 }
0x21f7   :  { %v4818_v47 = vpop.xlane.xlu0 %4817 }
0x21f8   :  { %vm4819_vm8 = vcmp.eq.f32.partialorder %v4816_v63, %v4818_v47  ;;  %v4824_v32 = vcvt.f32.s32 %v4818_v47 }
0x21f9   :  { %v4820_v52 = vsel %vm4819_vm8, %v4815_v16, inf }
0x21fa   :  { %4821 = vmin.xlane.f32.xlu0 %v4820_v52  ;;  %v4825_v58 = vshll.u32 %v4824_v32, 16  ;;  %v6628_v52 = vld [vmem:[#allocation10] ss:$0 sm:$0xff] }
0x2283   :  { %v4822_v18 = vpop.xlane.xlu0 %4821 }
0x2284   :  { %v4823_v6 = vcvt.f32.s32 %v4822_v18 }
0x2286   :  { %v4826_v36 = vadd.s32 %v4825_v58, %v4823_v6 }
0x2288   :  { %vm4827_vm4 = vcmp.eq.s32.totalorder %v8309_v2, %v4826_v36 }
0x2289   :  { %v4828_v39 = vsel %vm4827_vm4, -1e+15, %v4806_v34  ;;  %vm9364_vm4 = vcmask 1040384  }
0x228a   :  { %v4829_v27 = vsel %vm867_vm5, %v4828_v39, -inf }
0x228b   :  { %4830 = vmax.xlane.f32.xlu0 %v4829_v27 }
0x2314   :  { %v4831_v40 = vpop.xlane.xlu0 %4830 }
0x2315   :  { %vm4832_vm11 = vcmp.eq.f32.partialorder %v4828_v39, %v4831_v40 }
0x2316   :  { %v4833_v53 = vsel %vm4832_vm11, %v8309_v2, 8  ;;  %vm9366_vm11 = vmmov %vm9364_vm4 }
0x2317   :  { %v4834_v5 = vsel %vm867_vm5, %v4833_v53, 2147483647 }
0x2318   :  { %v4836_v3 = vshra.s32 %v4834_v5, 16  ;;  %v4835_v9 = vand.u32 65535, %v4834_v5 }
0x231a   :  { %v4838_v62 = vcvt.s32.f32 %v4836_v3  ;;  %v4837_v7 = vcvt.s32.f32 %v4835_v9  ;;  %v8967_v9 = vld [vmem:[%s7756_s21 + $0x10] sm:$0xff] }
0x231c   :  { %4839 = vmin.xlane.f32.xlu1 %v4838_v62 }
0x23a5   :  { %v4840_v24 = vpop.xlane.xlu1 %4839 }
0x23a6   :  { %vm4841_vm9 = vcmp.eq.f32.partialorder %v4838_v62, %v4840_v24  ;;  %v4846_v25 = vcvt.f32.s32 %v4840_v24 }
0x23a7   :  { %v4842_v43 = vsel %vm4841_vm9, %v4837_v7, inf }
0x23a8   :  { %4843 = vmin.xlane.f32.xlu0 %v4842_v43  ;;  %v4847_v30 = vshll.u32 %v4846_v25, 16 }
0x2431   :  { %v4844_v60 = vpop.xlane.xlu0 %4843 }
0x2432   :  { %v4845_v0 = vcvt.f32.s32 %v4844_v60 }
0x2434   :  { %v4848_v42 = vadd.s32 %v4847_v30, %v4845_v0 }
0x2436   :  { %vm4849_vm2 = vcmp.eq.s32.totalorder %v8309_v2, %v4848_v42 }
0x2437   :  { %v4850_v31 = vsel %vm4849_vm2, -1e+15, %v4828_v39 }
0x2438   :  { %v4851_v4 = vsel %vm867_vm5, %v4850_v31, -inf }
0x2439   :  { %4852 = vmax.xlane.f32.xlu1 %v4851_v4 }
0x24c2   :  { %v4853_v8 = vpop.xlane.xlu1 %4852 }
0x24c3   :  { %vm4854_vm8 = vcmp.le.f32.partialorder %v4806_v34, %v4853_v8 }
0x24c4   :  { %v4855_v41 = vsel %vm4854_vm8, -1e+15, %v4806_v34  ;;  %v7315_v34 = vpop.f32.mrf.mxu0  ;;  %vm9368_vm8 = vcmp.gt.f32.partialorder %v8104_v51, 0.0 }
0x24c5   :  { %7304 = vmatprep.subr.mxu1 %v4855_v41 }
0x24c6   :  { %7305 = vmatpush3.msra.mxu1 %v4855_v41 }
0x24c7   :  { %7307 = vmatmul.mubr.msk.f32.vlgmr.msra.gmra.mxu1 %vm867_vm5, %v8721_v56  ;;  %7316 = vmatprep.subr.msk.mxu1 %vm9364_vm4, %v8884_v45 }
0x24c8   :  { %7317 = vmatpush3.msk.msra.mxu1 %vm9366_vm11, %v8884_v45  ;;  %7320 = vmatprep.mubr.msk.f32.mxu1 %vm3928_vm10, %v8755_v48  ;;  %v5068_v45 = vpop.f32.mrf.mxu0 }
0x24c9   :  { %7318 = vmatprep.subr.mxu1 %v4991_v49 }
0x24ca   :  { %7319 = vmatpush3.msra.mxu1 %v4991_v49 }
0x24cb   :  { %7321 = vmatmul.mubr.msk.f32.vlgmr.msra.gmra.mxu1 %vm3928_vm10, %v8751_v44 }
0x24cc   :  { %7332 = vmatprep.mubr.msk.f32.mxu1 %vm867_vm5, %v8711_v19 }
0x2587   :  { %v8927_v2 = vpop.f32.mrf.mxu1 }
0x2589   :  { %v8929_v15 = vpop.f32.mrf.mxu1 }
0x258b   :  { %v7322_v55 = vpop.f32.mrf.mxu1 }
0x258c   :  { %v5151_v21 = vadd.f32 %v7322_v55, %v7315_v34 }
0x258d   :  { %v5145_v61 = vpop.f32.mrf.mxu1 }
0x258e   :  { %v8933_v48 = vadd.f32 %v6626_v28, %v5151_v21  ;;  %v5146_v63 = vadd.f32 %v5145_v61, %v5068_v45 }
0x2590   :  { %v8935_v17 = vadd.f32 %v6626_v28, %v5146_v63  ;;  %v5171_v44 = vmul.f32 %v6627_v22, %v8933_v48 }
0x2592   :  { %v5175_v19 = vsel %vm4702_vm6, %v5171_v44, 0.0  ;;  %v5170_v47 = vmul.f32 %v6627_v22, %v8935_v17  ;;  %vm9367_vm6 = vcmask 97280  }
0x2593   :  { %5176 = vadd.xlane.f32.xlu0 %v5175_v19 }
0x2594   :  { %v5172_v16 = vsel %vm3928_vm10, %v5170_v47, 0.0 }
0x2595   :  { %5173 = vadd.xlane.f32.xlu1 %v5172_v16 }
0x261c   :  { %v5177_v32 = vpop.xlane.xlu0 %5176 }
0x261d   :  { %v5186_v18 = vadd.f32 %v6628_v52, %v5177_v32 }
0x261e   :  { %v5174_v58 = vpop.xlane.xlu1 %5173 }
0x261f   :  { %vm5188_vm9 = vcmp.gt.f32.partialorder %v5186_v18, 0.0  ;;  %v5190_v6 = vmul.f32 0.2, %v5186_v18  ;;  %v5185_v36 = vadd.f32 %v6628_v52, %v5174_v58 }
0x2621   :  { %vm5187_vm2 = vcmp.gt.f32.partialorder %v5185_v36, 0.0  ;;  %v5189_v39 = vmul.f32 0.2, %v5185_v36  ;;  %v5192_v27 = vsel %vm5188_vm9, %v5186_v18, %v5190_v6 }
0x2622   :  { %5200 = vperm.xlu0 %7492, %v5192_v27  }
0x2623   :  { %v5191_v40 = vsel %vm5187_vm2, %v5185_v36, %v5189_v39 }
0x2624   :  { %5195 = vperm.xlu1 %7493, %v5191_v40  }
0x269d   :  { %v5201_v53 = vpop.permute.xlu0 %5200 }
0x269e   :  { %v5204_v5 = vmul.f32 %v8733_v26, %v5201_v53  ;;  %v8953_v26 = vld [vmem:[%s7756_s21] sm:$0xff] }
0x269f   :  { %v5196_v3 = vpop.permute.xlu1 %5195 }
0x26a0   :  { %v5203_v62 = vmul.f32 %v8728_v38, %v5196_v3  ;;  %7324 = vmatpush3.msk.msra.mxu0 %vm309_vm0, %v5204_v5  ;;  %v8960_v38 = vld [vmem:[%s7756_s21 + $0x8] sm:$0xff]  ;;  %s9369_s21 = sld [smem:[#allocation53_spill]] }
0x26a1   :  { %7325 = vmatprep.subr.mxu0 %v7721_v12 }
0x26a2   :  { %7326 = vmatpush3.msra.mxu0 %v5203_v62 }
0x26a3   :  { %7328 = vmatmul.mubr.msk.f32.vlgmr.msra.gmra.mxu0 %vm9367_vm6, %v8044_v20  ;;  %7335 = vmatprep.subr.mxu0 %v7721_v12 }
0x26a4   :  { %7336 = vmatpush3.msra.mxu0 %v8716_v54  ;;  %7337 = vmatprep.mubr.msk.f32.mxu0 %vm7722_vm1, %v7721_v12 }
0x26a5   :  { %7357 = vmatprep.subr.mxu0 %v7721_v12 }
0x26a7   :  { %7338 = vmatmul.mubr.msk.f32.vlgmr.msra.gmra.mxu0 %vm867_vm5, %v8953_v26 }
0x26a8   :  { %7340 = vmatprep.mubr.msk.f32.mxu0 %vm7722_vm1, %v7721_v12 }
0x26ab   :  { %7341 = vmatmul.mubr.msk.f32.gmra.mxu0 %vm867_vm5, %v8960_v38 }
0x26ac   :  { %7343 = vmatprep.mubr.msk.f32.mxu0 %vm7722_vm1, %v7721_v12 }
0x26af   :  { %7344 = vmatmul.mubr.msk.f32.gmra.mxu0 %vm867_vm5, %v8967_v9 }
0x26b0   :  { %7361 = vmatprep.mubr.msk.f32.mxu0 %vm7722_vm1, %v7721_v12 }
0x2763   :  { %v5274_v24 = vpop.f32.mrf.mxu0 }
0x2764   :  { %v5278_v7 = vsel %vm9368_vm8, %v5274_v24, -1e+15 }
0x2765   :  { %v5279_v43 = vsel %vm867_vm5, %v5278_v7, -inf  ;;  %v7329_v25 = vpop.f32.mrf.mxu0 }
0x2766   :  { %v5280_v60 = vrot.slane %v5279_v43, 4 }
0x2768   :  { %v5281_v30 = vmax.f32 %v5279_v43, %v5280_v60 }
0x276a   :  { %v5282_v0 = vrot.slane %v5281_v30, 2 }
0x276c   :  { %v5283_v42 = vmax.f32 %v5281_v30, %v5282_v0  ;;  %v8992_v30 = vld [vmem:[%s7761_s25] sm:$0xff]  ;;  %v5627_v0 = vld [vmem:[%s9369_s21 + $0x10] sm:$0x3] }
0x276e   :  { %v5284_v31 = vrot.slane %v5283_v42, 1 }
0x2770   :  { %v5285_v4 = vmax.f32 %v5283_v42, %v5284_v31  ;;  %v5631_v42 = vrot.slane %v5627_v0, 1  ;;  %v5626_v31 = vld [vmem:[%s9369_s21 + $0x8] sm:$0xff] }
0x2772   :  { %vm5286_vm4 = vcmp.eq.f32.partialorder %v5278_v7, %v5285_v4  ;;  %v5630_v4 = vrot.slane %v5626_v31, 1 }
0x2773   :  { %v5287_v8 = vsel %vm5286_vm4, %v8397_v59, 8 }
0x2774   :  { %v5288_v41 = vsel %vm867_vm5, %v5287_v8, 2147483647  ;;  %v5531_v8 = vpop.f32.mrf.mxu0 }
0x2775   :  { %v5289_v49 = vrot.slane %v5288_v41, 4 }
0x2777   :  { %vm5290_vm11 = vcmp.lt.s32.totalorder %v5288_v41, %v5289_v49 }
0x2778   :  { %v5291_v34 = vsel %vm5290_vm11, %v5288_v41, %v5289_v49  ;;  %v5632_v41 = vsel %vm3923_vm7, %v5630_v4, %v5631_v42  ;;  %v5625_v49 = vld [vmem:[%s9369_s21] sm:$0xff] }
0x2779   :  { %v5292_v55 = vrot.slane %v5291_v34, 2 }
0x277b   :  { %vm5293_vm9 = vcmp.lt.s32.totalorder %v5291_v34, %v5292_v55 }
0x277c   :  { %v5294_v51 = vsel %vm5293_vm9, %v5291_v34, %v5292_v55  ;;  %v7339_v34 = vpop.f32.mrf.mxu0 }
0x277d   :  { %v5295_v28 = vrot.slane %v5294_v51, 1 }
0x277e   :  { %v5536_v55 = vpop.f32.mrf.mxu0 }
0x277f   :  { %vm5296_vm2 = vcmp.lt.s32.totalorder %v5294_v51, %v5295_v28 }
0x2780   :  { %v5297_v21 = vsel %vm5296_vm2, %v5294_v51, %v5295_v28  ;;  %v7342_v51 = vpop.f32.mrf.mxu0 }
0x2781   :  { %vm5298_vm6 = vcmp.eq.s32.totalorder %v8397_v59, %v5297_v21  ;;  %v6649_v51 = vld [vmem:[#allocation11] ss:$0 sm:$0xff] }
0x2782   :  { %v5299_v45 = vsel %vm5298_vm6, -1e+15, %v5278_v7  ;;  %v5541_v28 = vpop.f32.mrf.mxu0 }
0x2783   :  { %v5300_v61 = vsel %vm867_vm5, %v5299_v45, -inf }
0x2784   :  { %v5301_v22 = vrot.slane %v5300_v61, 4  ;;  %v7345_v21 = vpop.f32.mrf.mxu0 }
0x2786   :  { %v5302_v63 = vmax.f32 %v5300_v61, %v5301_v22 }
0x2788   :  { %v5303_v44 = vrot.slane %v5302_v63, 2 }
0x278a   :  { %v5304_v19 = vmax.f32 %v5302_v63, %v5303_v44 }
0x278c   :  { %v5305_v47 = vrot.slane %v5304_v19, 1 }
0x278e   :  { %v5306_v16 = vmax.f32 %v5304_v19, %v5305_v47 }
0x2790   :  { %vm5307_vm8 = vcmp.eq.f32.partialorder %v5299_v45, %v5306_v16 }
0x2791   :  { %v5308_v52 = vsel %vm5307_vm8, %v8397_v59, 8  ;;  %vm9370_vm8 = vcmask 1040384  }
0x2792   :  { %v5309_v32 = vsel %vm867_vm5, %v5308_v52, 2147483647 }
0x2793   :  { %v5310_v18 = vrot.slane %v5309_v32, 4 }
0x2795   :  { %vm5311_vm4 = vcmp.lt.s32.totalorder %v5309_v32, %v5310_v18 }
0x2796   :  { %v5312_v58 = vsel %vm5311_vm4, %v5309_v32, %v5310_v18  ;;  %vm9371_vm4 = vmmov %vm9370_vm8 }
0x2797   :  { %v5313_v6 = vrot.slane %v5312_v58, 2  ;;  %7358 = vmatpush3.msk.msra.mxu0 %vm9371_vm4, %v5631_v42 }
0x2798   :  { %7359 = vmatprep.subr.mxu0 %v7721_v12 }
0x2799   :  { %vm5314_vm11 = vcmp.lt.s32.totalorder %v5312_v58, %v5313_v6  ;;  %7360 = vmatpush3.msra.mxu0 %v5632_v41 }
0x279a   :  { %v5315_v36 = vsel %vm5314_vm11, %v5312_v58, %v5313_v6  ;;  %7362 = vmatmul.mubr.msk.f32.vlgmr.msra.gmra.mxu0 %vm3928_vm10, %v5531_v8  ;;  %7383 = vmatprep.subr.mxu0 %v7721_v12 }
0x279b   :  { %v5316_v39 = vrot.slane %v5315_v36, 1  ;;  %7364 = vmatprep.mubr.msk.f32.mxu0 %vm7722_vm1, %v7721_v12 }
0x279d   :  { %vm5317_vm9 = vcmp.lt.s32.totalorder %v5315_v36, %v5316_v39 }
0x279e   :  { %v5318_v27 = vsel %vm5317_vm9, %v5315_v36, %v5316_v39  ;;  %7365 = vmatmul.mubr.msk.f32.gmra.mxu0 %vm3928_vm10, %v5536_v55 }
0x279f   :  { %vm5319_vm2 = vcmp.eq.s32.totalorder %v8397_v59, %v5318_v27  ;;  %7367 = vmatprep.mubr.msk.f32.mxu0 %vm7722_vm1, %v7721_v12 }
0x27a0   :  { %v5320_v40 = vsel %vm5319_vm2, -1e+15, %v5299_v45  ;;  %vm9374_vm2 = vcmask 195584  }
0x27a1   :  { %v5321_v53 = vsel %vm867_vm5, %v5320_v40, -inf }
0x27a2   :  { %v5322_v5 = vrot.slane %v5321_v53, 4  ;;  %7368 = vmatmul.mubr.msk.f32.gmra.mxu0 %vm3928_vm10, %v5541_v28 }
0x27a3   :  { %7389 = vmatprep.mubr.msk.f32.mxu0 %vm7722_vm1, %v7721_v12 }
0x27a4   :  { %v5323_v3 = vmax.f32 %v5321_v53, %v5322_v5 }
0x27a6   :  { %v5324_v62 = vrot.slane %v5323_v3, 2 }
0x27a8   :  { %v5325_v24 = vmax.f32 %v5323_v3, %v5324_v62 }
0x27aa   :  { %v5326_v43 = vrot.slane %v5325_v24, 1 }
0x27ac   :  { %v5327_v25 = vmax.f32 %v5325_v24, %v5326_v43 }
0x27ae   :  { %vm5328_vm6 = vcmp.le.f32.partialorder %v5278_v7, %v5327_v25 }
0x27af   :  { %v5329_v60 = vsel %vm5328_vm6, -1e+15, %v5278_v7  ;;  %v8999_v7 = vld [vmem:[%s7761_s25 + $0x8] sm:$0xff]  ;;  %vm9375_vm6 = vcmp.gt.f32.partialorder %v8115_v1, 0.0 }
0x27b0   :  { %7330 = vmatprep.subr.mxu1 %v5329_v60 }
0x27b1   :  { %7331 = vmatpush3.msra.mxu1 %v5329_v60  ;;  %v6648_v60 = vld [vmem:[%s9373_s22] ss:$0 sm:$0xff] }
0x27b2   :  { %7333 = vmatmul.mubr.msk.f32.vlgmr.msra.gmra.mxu1 %vm867_vm5, %v8721_v56  ;;  %7346 = vmatprep.subr.mxu1 %v7721_v12  ;;  %v9006_v56 = vld [vmem:[%s7761_s25 + $0x10] sm:$0xff]  ;;  %s9372_s25 = sld [smem:[#allocation54_spill]] }
0x27b3   :  { %7347 = vmatpush3.msra.mxu1 %v8716_v54  ;;  %7348 = vmatprep.mubr.msk.f32.mxu1 %vm7722_vm1, %v7721_v12 }
0x27b4   :  { %7370 = vmatprep.subr.mxu1 %v7721_v12 }
0x27b6   :  { %7349 = vmatmul.mubr.msk.f32.vlgmr.msra.gmra.mxu1 %vm867_vm5, %v8992_v30 }
0x27b7   :  { %7351 = vmatprep.mubr.msk.f32.mxu1 %vm7722_vm1, %v7721_v12  ;;  %7371 = vmatpush3.msk.msra.mxu1 %vm9370_vm8, %v5626_v31 }
0x27b8   :  { %7372 = vmatprep.subr.mxu1 %v7721_v12  ;;  %v6647_v53 = vld [vmem:[%s9372_s25] ss:$0 sm:$0xff] }
0x27b9   :  { %7373 = vmatpush3.msra.mxu1 %v5625_v49 }
0x27ba   :  { %7352 = vmatmul.mubr.msk.f32.gmra.mxu1 %vm867_vm5, %v8999_v7  ;;  %7392 = vmatprep.subr.mxu1 %v7721_v12 }
0x27bb   :  { %7354 = vmatprep.mubr.msk.f32.mxu1 %vm7722_vm1, %v7721_v12 }
0x27be   :  { %7355 = vmatmul.mubr.msk.f32.gmra.mxu1 %vm867_vm5, %v9006_v56 }
0x27bf   :  { %7374 = vmatprep.mubr.msk.f32.mxu1 %vm7722_vm1, %v7721_v12 }
0x285a   :  { %v5711_v52 = vpop.f32.mrf.mxu0 }
0x285c   :  { %v7363_v32 = vpop.f32.mrf.mxu0 }
0x285e   :  { %v5716_v18 = vpop.f32.mrf.mxu0 }
0x2860   :  { %v7366_v58 = vpop.f32.mrf.mxu0 }
0x2862   :  { %v5721_v6 = vpop.f32.mrf.mxu0 }
0x2864   :  { %v7369_v36 = vpop.f32.mrf.mxu0 }
0x2872   :  { %v9031_v45 = vpop.f32.mrf.mxu1 }
0x2874   :  { %v9033_v61 = vpop.f32.mrf.mxu1 }
0x2876   :  { %v5611_v22 = vpop.f32.mrf.mxu1 }
0x2877   :  { %7375 = vmatmul.mubr.msk.f32.vlgmr.msra.gmra.mxu1 %vm3928_vm10, %v5611_v22 }
0x2878   :  { %v7350_v63 = vpop.f32.mrf.mxu1  ;;  %7377 = vmatprep.mubr.msk.f32.mxu1 %vm7722_vm1, %v7721_v12 }
0x287a   :  { %v5616_v44 = vpop.f32.mrf.mxu1 }
0x287b   :  { %7378 = vmatmul.mubr.msk.f32.gmra.mxu1 %vm3928_vm10, %v5616_v44 }
0x287c   :  { %v7353_v19 = vpop.f32.mrf.mxu1  ;;  %7380 = vmatprep.mubr.msk.f32.mxu1 %vm7722_vm1, %v7721_v12 }
0x287e   :  { %v5621_v47 = vpop.f32.mrf.mxu1 }
0x287f   :  { %7381 = vmatmul.mubr.msk.f32.gmra.mxu1 %vm3928_vm10, %v5621_v47 }
0x2880   :  { %v7356_v16 = vpop.f32.mrf.mxu1  ;;  %7394 = vmatprep.mubr.msk.f32.mxu1 %vm7722_vm1, %v7721_v12 }
0x2937   :  { %v5802_v39 = vpop.f32.mrf.mxu1 }
0x2938   :  { %v5803_v40 = vadd.f32 %v5802_v39, %v5711_v52 }
0x2939   :  { %v7376_v27 = vpop.f32.mrf.mxu1 }
0x293a   :  { %v9045_v24 = vadd.f32 %v6647_v53, %v5803_v40  ;;  %v9065_v27 = vld [vmem:[%s7751_s17] sm:$0xff] }
0x293b   :  { %v5807_v5 = vpop.f32.mrf.mxu1  ;;  %v4931_v40 = vmul.f32 %v9065_v27, %v8929_v15 }
0x293c   :  { %v5808_v3 = vadd.f32 %v5807_v5, %v5716_v18  ;;  %v5833_v41 = vmul.f32 %v6648_v60, %v9045_v24 }
0x293d   :  { %v7379_v62 = vpop.f32.mrf.mxu1 }
0x293e   :  { %v9047_v43 = vadd.f32 %v6647_v53, %v5808_v3  ;;  %v5836_v34 = vsel %vm3928_vm10, %v5833_v41, 0.0 }
0x293f   :  { %v5812_v25 = vpop.f32.mrf.mxu1 }
0x2940   :  { %v5813_v0 = vadd.f32 %v5812_v25, %v5721_v6  ;;  %v5834_v42 = vmul.f32 %v6648_v60, %v9047_v43  ;;  %v9059_v6 = vld [vmem:[%s7751_s17 + $0x8] sm:$0xf] }
0x2941   :  { %v7382_v31 = vpop.f32.mrf.mxu1  ;;  %v4932_v36 = vmul.f32 %v9059_v6, %v8927_v2 }
0x2942   :  { %v9051_v4 = vadd.f32 %v6647_v53, %v5813_v0  ;;  %v5839_v8 = vsel %vm3928_vm10, %v5834_v42, 0.0  ;;  %v4933_v53 = vsel %vm867_vm5, %v4931_v40, 0.0 }
0x2943   :  { %5840 = vadd.xlane.f32.xlu0 %v5839_v8  ;;  %v4936_v39 = vsel %vm1255_vm14, %v4932_v36, 0.0 }
0x2944   :  { %v5835_v49 = vmul.f32 %v6648_v60, %v9051_v4 }
0x2946   :  { %v5842_v55 = vsel %vm3928_vm10, %v5835_v49, 0.0 }
0x2947   :  { %5837 = vadd.xlane.f32.xlu0 %v5836_v34  ;;  %5843 = vadd.xlane.f32.xlu1 %v5842_v55 }
0x29cc   :  { %v5841_v28 = vpop.xlane.xlu0 %5840 }
0x29cd   :  { %v5853_v21 = vadd.f32 %v6649_v51, %v5841_v28 }
0x29cf   :  { %vm5856_vm7 = vcmp.gt.f32.partialorder %v5853_v21, 0.0  ;;  %v5859_v22 = vmul.f32 0.2, %v5853_v21 }
0x29d0   :  { %v5838_v63 = vpop.xlane.xlu0 %5837  ;;  %v5844_v44 = vpop.xlane.xlu1 %5843 }
0x29d1   :  { %v5852_v19 = vadd.f32 %v6649_v51, %v5838_v63  ;;  %v5854_v47 = vadd.f32 %v6649_v51, %v5844_v44  ;;  %v5862_v16 = vsel %vm5856_vm7, %v5853_v21, %v5859_v22 }
0x29d2   :  { %5871 = vperm.xlu0 %7492, %v5862_v16  }
0x29d3   :  { %vm5857_vm11 = vcmp.gt.f32.partialorder %v5854_v47, 0.0  ;;  %v5860_v52 = vmul.f32 0.2, %v5854_v47  ;;  %v5858_v32 = vmul.f32 0.2, %v5852_v19  ;;  %vm5855_vm9 = vcmp.gt.f32.partialorder %v5852_v19, 0.0 }
0x29d5   :  { %v5863_v18 = vsel %vm5857_vm11, %v5854_v47, %v5860_v52  ;;  %v5861_v58 = vsel %vm5855_vm9, %v5852_v19, %v5858_v32 }
0x29d6   :  { %5876 = vperm.xlu1 %7493, %v5863_v18  }
0x29da   :  { %5866 = vperm.xlu1 %7493, %v5861_v58  }
0x29f1   :  { %4937 = vadd.xlane.f32.xlu0 %v4936_v39 }
0x29fe   :  { %4934 = vadd.xlane.f32.xlu1 %v4933_v53 }
0x2a4d   :  { %v5872_v5 = vpop.permute.xlu0 %5871 }
0x2a4e   :  { %v5880_v25 = vmul.f32 %v8999_v7, %v5872_v5 }
0x2a51   :  { %v5877_v3 = vpop.permute.xlu1 %5876 }
0x2a52   :  { %v5881_v62 = vmul.f32 %v9006_v56, %v5877_v3 }
0x2a54   :  { %7384 = vmatpush3.msra.mxu0 %v5881_v62 }
0x2a55   :  { %7385 = vmatprep.subr.mxu0 %v7721_v12  ;;  %v5867_v2 = vpop.permute.xlu1 %5866 }
0x2a56   :  { %v5879_v60 = vmul.f32 %v8992_v30, %v5867_v2  ;;  %7386 = vmatpush3.msra.mxu0 %v5880_v25 }
0x2a57   :  { %7387 = vmatprep.subr.mxu0 %v7721_v12 }
0x2a58   :  { %7388 = vmatpush3.msra.mxu0 %v5879_v60 }
0x2a59   :  { %7390 = vmatmul.mubr.msk.f32.vlgmr.msra.gmra.mxu0 %vm9374_vm2, %v8072_v35  ;;  %7403 = vmatprep.subr.mxu0 %v7721_v12 }
0x2a5a   :  { %7407 = vmatprep.mubr.msk.f32.mxu0 %vm7722_vm1, %v7721_v12 }
0x2b19   :  { %v5948_v15 = vpop.f32.mrf.mxu0 }
0x2b1a   :  { %v5952_v0 = vsel %vm9375_vm6, %v5948_v15, -1e+15 }
0x2b1b   :  { %v5953_v42 = vsel %vm867_vm5, %v5952_v0, -inf  ;;  %v7391_v31 = vpop.f32.mrf.mxu0 }
0x2b1c   :  { %v5954_v8 = vrot.slane %v5953_v42, 4 }
0x2b1e   :  { %v5955_v41 = vmax.f32 %v5953_v42, %v5954_v8 }
0x2b20   :  { %v5956_v49 = vrot.slane %v5955_v41, 2 }
0x2b22   :  { %v5957_v34 = vmax.f32 %v5955_v41, %v5956_v49 }
0x2b24   :  { %v5958_v55 = vrot.slane %v5957_v34, 1 }
0x2b26   :  { %v5959_v51 = vmax.f32 %v5957_v34, %v5958_v55 }
0x2b28   :  { %vm5960_vm8 = vcmp.eq.f32.partialorder %v5952_v0, %v5959_v51 }
0x2b29   :  { %v5961_v35 = vsel %vm5960_vm8, %v8397_v59, 8 }
0x2b2a   :  { %v5962_v28 = vsel %vm867_vm5, %v5961_v35, 2147483647 }
0x2b2b   :  { %v5963_v21 = vrot.slane %v5962_v28, 4 }
0x2b2d   :  { %vm5964_vm4 = vcmp.lt.s32.totalorder %v5962_v28, %v5963_v21 }
0x2b2e   :  { %v5965_v22 = vsel %vm5964_vm4, %v5962_v28, %v5963_v21 }
0x2b2f   :  { %v5966_v63 = vrot.slane %v5965_v22, 2 }
0x2b31   :  { %vm5967_vm7 = vcmp.lt.s32.totalorder %v5965_v22, %v5966_v63 }
0x2b32   :  { %v5968_v1 = vsel %vm5967_vm7, %v5965_v22, %v5966_v63 }
0x2b33   :  { %v5969_v44 = vrot.slane %v5968_v1, 1 }
0x2b35   :  { %vm5970_vm11 = vcmp.lt.s32.totalorder %v5968_v1, %v5969_v44 }
0x2b36   :  { %v5971_v19 = vsel %vm5970_vm11, %v5968_v1, %v5969_v44 }
0x2b37   :  { %vm5972_vm9 = vcmp.eq.s32.totalorder %v8397_v59, %v5971_v19 }
0x2b38   :  { %v5973_v47 = vsel %vm5972_vm9, -1e+15, %v5952_v0  ;;  %vm9378_vm9 = vcmp.gt.f32.partialorder %v8431_v37, 0.0 }
0x2b39   :  { %v5974_v16 = vsel %vm867_vm5, %v5973_v47, -inf }
0x2b3a   :  { %v5975_v52 = vrot.slane %v5974_v16, 4 }
0x2b3c   :  { %v5976_v32 = vmax.f32 %v5974_v16, %v5975_v52 }
0x2b3e   :  { %v5977_v18 = vrot.slane %v5976_v32, 2 }
0x2b40   :  { %v5978_v58 = vmax.f32 %v5976_v32, %v5977_v18  ;;  %v5405_v18 = vmul.f32 %v9065_v27, %v9033_v61 }
0x2b42   :  { %v5979_v36 = vrot.slane %v5978_v58, 1 }
0x2b44   :  { %v5980_v39 = vmax.f32 %v5978_v58, %v5979_v36 }
0x2b46   :  { %vm5981_vm2 = vcmp.eq.f32.partialorder %v5973_v47, %v5980_v39 }
0x2b47   :  { %v5982_v40 = vsel %vm5981_vm2, %v8397_v59, 8 }
0x2b48   :  { %v5983_v53 = vsel %vm867_vm5, %v5982_v40, 2147483647 }
0x2b49   :  { %v5984_v5 = vrot.slane %v5983_v53, 4 }
0x2b4b   :  { %vm5985_vm6 = vcmp.lt.s32.totalorder %v5983_v53, %v5984_v5 }
0x2b4c   :  { %v5986_v3 = vsel %vm5985_vm6, %v5983_v53, %v5984_v5  ;;  %v5406_v5 = vmul.f32 %v9059_v6, %v9031_v45 }
0x2b4d   :  { %v5987_v62 = vrot.slane %v5986_v3, 2 }
0x2b4f   :  { %vm5988_vm8 = vcmp.lt.s32.totalorder %v5986_v3, %v5987_v62 }
0x2b50   :  { %v5989_v25 = vsel %vm5988_vm8, %v5986_v3, %v5987_v62  ;;  %v5407_v3 = vsel %vm867_vm5, %v5405_v18, 0.0 }
0x2b51   :  { %v5990_v2 = vrot.slane %v5989_v25, 1 }
0x2b53   :  { %vm5991_vm4 = vcmp.lt.s32.totalorder %v5989_v25, %v5990_v2 }
0x2b54   :  { %v5992_v60 = vsel %vm5991_vm4, %v5989_v25, %v5990_v2  ;;  %v9128_v25 = vld [vmem:[%s7746_s13] sm:$0xff] }
0x2b55   :  { %vm5993_vm7 = vcmp.eq.s32.totalorder %v8397_v59, %v5992_v60  ;;  %v9104_v59 = vpop.xlane.xlu1 %4934  ;;  %v5410_v60 = vsel %vm1255_vm14, %v5406_v5, 0.0 }
0x2b56   :  { %v5994_v15 = vsel %vm5993_vm7, -1e+15, %v5973_v47 }
0x2b57   :  { %v5995_v42 = vsel %vm867_vm5, %v5994_v15, -inf  ;;  %v9134_v15 = vld [vmem:[%s7746_s13 + $0x8] sm:$0xf]  ;;  %s7724_s13 = smov [#allocation14]  }
0x2b58   :  { %v5996_v31 = vrot.slane %v5995_v42, 4  ;;  %s6426_s17 = sshll.u32 %s7724_s13, 4  ;;  %s6427_s17 = int_to_ptr.vmem [resolvable:$true] %s6426_s17 }
0x2b59   :  { %s7618_s2 = scalar_lea.vmem %s6427_s17, 256  ;;  %p7623_p1 = scmp.lt.s32.totalorder %s6427_s17, %s6427_s17 }
0x2b5a   :  { %v5997_v8 = vmax.f32 %v5995_v42, %v5996_v31  ;;  %p7619_p0 = scmp.ne.s32.totalorder %s6427_s17, %s7618_s2  ;;  %p7624_p2 = scmp.lt.s32.totalorder %s7618_s2, %s7618_s2 }
0x2b5c   :  { %v5998_v41 = vrot.slane %v5997_v8, 2  ;;  %p7625_p3 = por %p7624_p2, %p7623_p1 }
0x2b5e   :  { %v5999_v49 = vmax.f32 %v5997_v8, %v5998_v41  ;;  %p7626_p4 = pnand %p7625_p3, %p7619_p0 }
0x2b60   :  { %v6000_v34 = vrot.slane %v5999_v49, 1 }
0x2b62   :  { %v6001_v55 = vmax.f32 %v5999_v49, %v6000_v34 }
0x2b64   :  { %vm6002_vm11 = vcmp.le.f32.partialorder %v5952_v0, %v6001_v55 }
0x2b65   :  { %v6003_v51 = vsel %vm6002_vm11, -1e+15, %v5952_v0  ;;  %v4939_v0 = vsel %vm1524_vm15, %v9104_v59, -1e+30  ;;  %vm9376_vm15 = vcmp.gt.f32.partialorder %v8416_v57, 0.0 }
0x2b66   :  { %7393 = vmatpush3.msra.mxu1 %v6003_v51  ;;  %v4941_v35 = vsel %vm867_vm5, %v4939_v0, -inf }
0x2b67   :  { %7395 = vmatmul.mubr.msk.f32.vlgmr.msra.gmra.mxu1 %vm867_vm5, %v8953_v26  ;;  %7417 = vmatprep.subr.mxu1 %v7721_v12  ;;  %v9106_v26 = vpop.xlane.xlu0 %4937 }
0x2b68   :  { %7397 = vmatprep.mubr.msk.f32.mxu1 %vm7722_vm1, %v7721_v12 }
0x2b6b   :  { %7398 = vmatmul.mubr.msk.f32.gmra.mxu1 %vm867_vm5, %v8960_v38  ;;  %v4940_v38 = vsel %vm1525_vm3, %v9106_v26, -1e+30  ;;  %vm9377_vm3 = vcmp.gt.f32.partialorder %v8424_v50, 0.0 }
0x2b6c   :  { %7400 = vmatprep.mubr.msk.f32.mxu1 %vm7722_vm1, %v7721_v12  ;;  %v4942_v28 = vsel %vm1255_vm14, %v4940_v38, -inf }
0x2b6f   :  { %7401 = vmatmul.mubr.msk.f32.gmra.mxu1 %vm867_vm5, %v8967_v9  ;;  %v4943_v9 = vmax.f32 %v4941_v35, %v4942_v28 }
0x2b70   :  { %7423 = vmatprep.mubr.msk.f32.mxu1 %vm7722_vm1, %v7721_v12 }
0x2b71   :  { %v4944_v21 = vrot.slane %v4943_v9, 4 }
0x2b73   :  { %v4945_v22 = vmax.f32 %v4943_v9, %v4944_v21 }
0x2b75   :  { %v4946_v63 = vrot.slane %v4945_v22, 2 }
0x2b77   :  { %v4947_v1 = vmax.f32 %v4945_v22, %v4946_v63 }
0x2b79   :  { %v4948_v16 = vrot.slane %v4947_v1, 1 }
0x2b7b   :  { %v4949_v36 = vmax.f32 %v4947_v1, %v4948_v16 }
0x2b7d   :  { %v4950_v61 = vmul.f32 %v9128_v25, %v4949_v36  ;;  %v4951_v42 = vmul.f32 %v9134_v15, %v4949_v36 }
0x2b7f   :  { %v4952_v2 = vsel %vm867_vm5, %v4950_v61, 0.0  ;;  %v4955_v45 = vsel %vm1255_vm14, %v4951_v42, 0.0 }
0x2c27   :  { %v6070_v44 = vpop.f32.mrf.mxu1 }
0x2c28   :  { %v6084_v19 = vmul.f32 %v8992_v30, %v6070_v44 }
0x2c29   :  { %v7396_v47 = vpop.f32.mrf.mxu1 }
0x2c2a   :  { %v6087_v10 = vsel %vm867_vm5, %v6084_v19, 0.0 }
0x2c2b   :  { %v6075_v52 = vpop.f32.mrf.mxu1  ;;  %6088 = vadd.xlane.f32.xlu0 %v6087_v10 }
0x2c2c   :  { %v6085_v14 = vmul.f32 %v8999_v7, %v6075_v52 }
0x2c2d   :  { %v7399_v32 = vpop.f32.mrf.mxu1 }
0x2c2e   :  { %v6090_v58 = vsel %vm867_vm5, %v6085_v14, 0.0 }
0x2c2f   :  { %6091 = vadd.xlane.f32.xlu1 %v6090_v58  ;;  %v6080_v39 = vpop.f32.mrf.mxu1 }
0x2c30   :  { %v6086_v40 = vmul.f32 %v9006_v56, %v6080_v39 }
0x2c31   :  { %v7402_v53 = vpop.f32.mrf.mxu1 }
0x2c32   :  { %v6093_v62 = vsel %vm867_vm5, %v6086_v40, 0.0 }
0x2c33   :  { %5408 = vadd.xlane.f32.xlu1 %v5407_v3  ;;  %6094 = vadd.xlane.f32.xlu0 %v6093_v62 }
0x2c37   :  { %4953 = vadd.xlane.f32.xlu1 %v4952_v2  ;;  %5411 = vadd.xlane.f32.xlu0 %v5410_v60 }
0x2c3b   :  { %4956 = vadd.xlane.f32.xlu0 %v4955_v45 }
0x2cb4   :  { %v9138_v31 = vpop.xlane.xlu0 %6088 }
0x2cb5   :  { %v6096_v41 = vsel %vm9376_vm15, %v9138_v31, -1e+30 }
0x2cb6   :  { %v6099_v55 = vsel %vm867_vm5, %v6096_v41, -inf }
0x2cb8   :  { %v9140_v8 = vpop.xlane.xlu1 %6091 }
0x2cb9   :  { %v6097_v49 = vsel %vm9377_vm3, %v9140_v8, -1e+30 }
0x2cba   :  { %v6100_v34 = vsel %vm867_vm5, %v6097_v49, -inf }
0x2cbb   :  { %v6102_v38 = vmax.f32 %v6099_v55, %v6100_v34 }
0x2cbc   :  { %v9150_v51 = vpop.xlane.xlu1 %5408  ;;  %v9152_v0 = vpop.xlane.xlu0 %6094 }
0x2cbd   :  { %v6098_v35 = vsel %vm9378_vm9, %v9152_v0, -1e+30  ;;  %v5413_v50 = vsel %vm1240_vm13, %v9150_v51, -1e+30 }
0x2cbe   :  { %v6101_v57 = vsel %vm867_vm5, %v6098_v35, -inf  ;;  %v5415_v37 = vsel %vm867_vm5, %v5413_v50, -inf }
0x2cbf   :  { %v6103_v28 = vmax.f32 %v6102_v38, %v6101_v57 }
0x2cc0   :  { %v4954_v9 = vpop.xlane.xlu1 %4953  ;;  %v9161_v21 = vpop.xlane.xlu0 %5411 }
0x2cc1   :  { %v6104_v22 = vrot.slane %v6103_v28, 4  ;;  %v4958_v63 = vsub.f32 %v9104_v59, %v4954_v9  ;;  %v5414_v1 = vsel %vm1241_vm12, %v9161_v21, -1e+30  ;;  %vm9379_vm12 = vcmask 97280  }
0x2cc2   :  { %v5416_v44 = vsel %vm1255_vm14, %v5414_v1, -inf }
0x2cc3   :  { %v6105_v19 = vmax.f32 %v6103_v28, %v6104_v22  ;;  %v4960_v47 = vmul.f32 1.442695, %v4958_v63  ;;  %v5417_v10 = vmax.f32 %v5415_v37, %v5416_v44 }
0x2cc4   :  { %v4957_v13 = vpop.xlane.xlu0 %4956 }
0x2cc5   :  { %v6106_v16 = vrot.slane %v6105_v19, 2  ;;  %7564 = vpow2.f32 %v4960_v47  ;;  %v5418_v52 = vrot.slane %v5417_v10, 4  ;;  %v4959_v14 = vsub.f32 %v9106_v26, %v4957_v13 }
0x2cc7   :  { %v6107_v32 = vmax.f32 %v6105_v19, %v6106_v16  ;;  %v5419_v18 = vmax.f32 %v5417_v10, %v5418_v52  ;;  %v4962_v59 = vmul.f32 1.442695, %v4959_v14 }
0x2cc9   :  { %v6108_v58 = vrot.slane %v6107_v32, 1  ;;  %v5420_v36 = vrot.slane %v5419_v18, 2  ;;  %7566 = vpow2.f32 %v4962_v59 }
0x2ccb   :  { %v6109_v11 = vmax.f32 %v6107_v32, %v6108_v58  ;;  %v5421_v39 = vmax.f32 %v5419_v18, %v5420_v36 }
0x2ccd   :  { %v6111_v40 = vmul.f32 %v8999_v7, %v6109_v11  ;;  %v5422_v53 = vrot.slane %v5421_v39, 1  ;;  %v6110_v42 = vmul.f32 %v8992_v30, %v6109_v11  ;;  %v6112_v34 = vmul.f32 %v9006_v56, %v6109_v11 }
0x2ccf   :  { %v6116_v5 = vsel %vm867_vm5, %v6111_v40, 0.0  ;;  %v5423_v3 = vmax.f32 %v5421_v39, %v5422_v53  ;;  %v6113_v49 = vsel %vm867_vm5, %v6110_v42, 0.0  ;;  %v6119_v50 = vsel %vm867_vm5, %v6112_v34, 0.0 }
0x2cd0   :  { %6117 = vadd.xlane.f32.xlu0 %v6116_v5 }
0x2cd1   :  { %v5425_v62 = vmul.f32 %v9059_v6, %v5423_v3  ;;  %v5424_v61 = vmul.f32 %v9065_v27, %v5423_v3 }
0x2cd2   :  { %v9174_v26 = vpop.eup %7564 }
0x2cd3   :  { %v5429_v2 = vsel %vm1255_vm14, %v5425_v62, 0.0  ;;  %v5426_v60 = vsel %vm867_vm5, %v5424_v61, 0.0  ;;  %v4964_v45 = vmul.f32 %v9128_v25, %v9174_v26 }
0x2cd4   :  { %5430 = vadd.xlane.f32.xlu0 %v5429_v2  ;;  %5427 = vadd.xlane.f32.xlu1 %v5426_v60 }
0x2cd5   :  { %v4966_v38 = vsel %vm867_vm5, %v4964_v45, 0.0 }
0x2cd6   :  { %v9181_v41 = vpop.eup %7566 }
0x2cd7   :  { %v4965_v55 = vmul.f32 %v9134_v15, %v9181_v41 }
0x2cd8   :  { %6114 = vadd.xlane.f32.xlu1 %v6113_v49 }
0x2cd9   :  { %v4967_v35 = vsel %vm1255_vm14, %v4965_v55, 0.0 }
0x2cda   :  { %v4968_v57 = vadd.f32 %v4967_v35, %v4966_v38 }
0x2cdc   :  { %6120 = vadd.xlane.f32.xlu1 %v6119_v50  ;;  %v4969_v28 = vrot.slane %v4968_v57, 4 }
0x2cde   :  { %v4970_v9 = vadd.f32 %v4969_v28, %v4968_v57 }
0x2ce0   :  { %v4971_v22 = vrot.slane %v4970_v9, 2 }
0x2ce2   :  { %v4972_v63 = vadd.f32 %v4971_v22, %v4970_v9 }
0x2ce4   :  { %v4973_v1 = vrot.slane %v4972_v63, 1 }
0x2ce6   :  { %v4974_v37 = vadd.f32 %v4973_v1, %v4972_v63 }
0x2ce8   :  { %v4976_v44 = vmul.f32 %v9134_v15, %v4974_v37  ;;  %v4975_v19 = vmul.f32 %v9128_v25, %v4974_v37 }
0x2cea   :  { %v4980_v47 = vsel %vm1255_vm14, %v4976_v44, 0.0  ;;  %v4977_v10 = vsel %vm867_vm5, %v4975_v19, 0.0 }
0x2ceb   :  { %4981 = vadd.xlane.f32.xlu0 %v4980_v47  ;;  %4978 = vadd.xlane.f32.xlu1 %v4977_v10 }
0x2d59   :  { %v6118_v13 = vpop.xlane.xlu0 %6117 }
0x2d5a   :  { %v6123_v16 = vsub.f32 %v9140_v8, %v6118_v13 }
0x2d5c   :  { %v6127_v59 = vmul.f32 1.442695, %v6123_v16 }
0x2d5d   :  { %v5428_v52 = vpop.xlane.xlu1 %5427  ;;  %v5431_v14 = vpop.xlane.xlu0 %5430 }
0x2d5e   :  { %v5432_v32 = vsub.f32 %v9150_v51, %v5428_v52  ;;  %v5433_v18 = vsub.f32 %v9161_v21, %v5431_v14 }
0x2d60   :  { %v5434_v58 = vmul.f32 1.442695, %v5432_v32  ;;  %v5436_v15 = vmul.f32 1.442695, %v5433_v18 }
0x2d61   :  { %v6115_v36 = vpop.xlane.xlu1 %6114 }
0x2d62   :  { %7568 = vpow2.f32 %v5434_v58  ;;  %v6122_v25 = vsub.f32 %v9138_v31, %v6115_v36 }
0x2d63   :  { %7570 = vpow2.f32 %v5436_v15 }
0x2d64   :  { %7572 = vpow2.f32 %v6127_v59  ;;  %v6125_v11 = vmul.f32 1.442695, %v6122_v25 }
0x2d65   :  { %v6121_v39 = vpop.xlane.xlu1 %6120 }
0x2d66   :  { %7574 = vpow2.f32 %v6125_v11  ;;  %v6124_v8 = vsub.f32 %v9152_v0, %v6121_v39 }
0x2d68   :  { %v6129_v40 = vmul.f32 1.442695, %v6124_v8 }
0x2d6a   :  { %7576 = vpow2.f32 %v6129_v40 }
0x2d6f   :  { %v9199_v53 = vpop.eup %7568 }
0x2d70   :  { %v9201_v51 = vpop.eup %7570  ;;  %v5438_v21 = vmul.f32 %v9065_v27, %v9199_v53 }
0x2d71   :  { %v9205_v5 = vpop.eup %7572  ;;  %v5439_v31 = vmul.f32 %v9059_v6, %v9201_v51 }
0x2d72   :  { %v5440_v3 = vsel %vm867_vm5, %v5438_v21, 0.0  ;;  %v6132_v61 = vmul.f32 %v8999_v7, %v9205_v5 }
0x2d73   :  { %v9210_v62 = vpop.eup %7574  ;;  %v5441_v0 = vsel %vm1255_vm14, %v5439_v31, 0.0 }
0x2d74   :  { %v6131_v2 = vmul.f32 %v8992_v30, %v9210_v62  ;;  %v4979_v60 = vpop.xlane.xlu1 %4978  ;;  %v4982_v42 = vpop.xlane.xlu0 %4981  ;;  %v5442_v45 = vadd.f32 %v5441_v0, %v5440_v3  ;;  %v6135_v28 = vsel %vm867_vm5, %v6132_v61, 0.0 }
0x2d75   :  { %v4983_v49 = vadd.f32 1e-16, %v4979_v60  ;;  %v4984_v34 = vadd.f32 1e-16, %v4982_v42 }
0x2d76   :  { %v5443_v55 = vrot.slane %v5442_v45, 4  ;;  %v6134_v38 = vsel %vm867_vm5, %v6131_v2, 0.0 }
0x2d77   :  { %v9218_v35 = vpop.eup %7576  ;;  %7578 = vrcp.f32 %v4983_v49  ;;  %v6136_v9 = vadd.f32 %v6135_v28, %v6134_v38 }
0x2d78   :  { %v6133_v57 = vmul.f32 %v9006_v56, %v9218_v35  ;;  %7580 = vrcp.f32 %v4984_v34  ;;  %v5444_v50 = vadd.f32 %v5443_v55, %v5442_v45 }
0x2d7a   :  { %v5445_v22 = vrot.slane %v5444_v50, 2  ;;  %v6137_v63 = vsel %vm867_vm5, %v6133_v57, 0.0 }
0x2d7b   :  { %v6138_v1 = vadd.f32 %v6137_v63, %v6136_v9 }
0x2d7c   :  { %v5446_v37 = vadd.f32 %v5445_v22, %v5444_v50 }
0x2d7d   :  { %v6139_v44 = vrot.slane %v6138_v1, 4 }
0x2d7e   :  { %v5447_v19 = vrot.slane %v5446_v37, 1 }
0x2d7f   :  { %v6140_v47 = vadd.f32 %v6139_v44, %v6138_v1 }
0x2d80   :  { %v5448_v10 = vadd.f32 %v5447_v19, %v5446_v37 }
0x2d81   :  { %v6141_v13 = vrot.slane %v6140_v47, 2 }
0x2d82   :  { %v5450_v16 = vmul.f32 %v9059_v6, %v5448_v10  ;;  %v5449_v18 = vmul.f32 %v9065_v27, %v5448_v10 }
0x2d83   :  { %v6142_v52 = vadd.f32 %v6141_v13, %v6140_v47 }
0x2d84   :  { %v7579_v14 = vpop.eup %7578  ;;  %v5454_v32 = vsel %vm1255_vm14, %v5450_v16, 0.0  ;;  %v5451_v11 = vsel %vm867_vm5, %v5449_v18, 0.0 }
0x2d85   :  { %v7581_v59 = vpop.eup %7580  ;;  %5455 = vadd.xlane.f32.xlu0 %v5454_v32  ;;  %v6143_v58 = vrot.slane %v6142_v52, 1  ;;  %v4986_v36 = vmul.f32 %v7579_v14, %v9174_v26 }
0x2d86   :  { %v4988_v15 = vmul.f32 %v7581_v59, %v9181_v41 }
0x2d87   :  { %v6144_v25 = vadd.f32 %v6143_v58, %v6142_v52  ;;  %v4989_v27 = vmul.f32 %v4986_v36, %v8876_v29 }
0x2d88   :  { %v4990_v39 = vmul.f32 %v4988_v15, %v8874_v23 }
0x2d89   :  { %5452 = vadd.xlane.f32.xlu0 %v5451_v11  ;;  %v6147_v6 = vmul.f32 %v9006_v56, %v6144_v25  ;;  %v6145_v8 = vmul.f32 %v8992_v30, %v6144_v25  ;;  %v6146_v40 = vmul.f32 %v8999_v7, %v6144_v25 }
0x2d8a   :  { %7404 = vmatpush3.msk.msra.mxu0 %vm309_vm0, %v4990_v39 }
0x2d8b   :  { %7405 = vmatprep.subr.mxu0 %v7721_v12  ;;  %v6154_v41 = vsel %vm867_vm5, %v6147_v6, 0.0  ;;  %v6148_v26 = vsel %vm867_vm5, %v6145_v8, 0.0  ;;  %v6151_v23 = vsel %vm867_vm5, %v6146_v40, 0.0 }
0x2d8c   :  { %7406 = vmatpush3.msra.mxu0 %v4989_v27  ;;  %6155 = vadd.xlane.f32.xlu1 %v6154_v41 }
0x2d8d   :  { %6149 = vadd.xlane.f32.xlu0 %v6148_v26  ;;  %7408 = vmatmul.mubr.msk.f32.vlgmr.msra.gmra.mxu0 %vm9379_vm12, %v8044_v20 }
0x2d8e   :  { %7410 = vmatprep.subr.mxu0 %v7721_v12  ;;  %7414 = vmatprep.mubr.msk.f32.mxu0 %vm7722_vm1, %v7721_v12  ;;  %vm9380_vm1 = vmmov %vm9379_vm12 }
0x2d90   :  { %6152 = vadd.xlane.f32.xlu1 %v6151_v23 }
0x2e0e   :  { %v5456_v29 = vpop.xlane.xlu0 %5455 }
0x2e0f   :  { %v5458_v30 = vadd.f32 1e-16, %v5456_v29 }
0x2e11   :  { %7582 = vrcp.f32 %v5458_v30 }
0x2e12   :  { %v5453_v56 = vpop.xlane.xlu0 %5452 }
0x2e13   :  { %v5457_v21 = vadd.f32 1e-16, %v5453_v56 }
0x2e15   :  { %7584 = vrcp.f32 %v5457_v21  ;;  %v6156_v7 = vpop.xlane.xlu1 %6155 }
0x2e16   :  { %v6159_v31 = vadd.f32 1e-16, %v6156_v7  ;;  %v6150_v3 = vpop.xlane.xlu0 %6149 }
0x2e17   :  { %v6157_v0 = vadd.f32 1e-16, %v6150_v3 }
0x2e18   :  { %7586 = vrcp.f32 %v6159_v31 }
0x2e19   :  { %v6153_v20 = vpop.xlane.xlu1 %6152  ;;  %7588 = vrcp.f32 %v6157_v0 }
0x2e1a   :  { %v6158_v61 = vadd.f32 1e-16, %v6153_v20 }
0x2e1c   :  { %7590 = vrcp.f32 %v6158_v61 }
0x2e1e   :  { %v7583_v2 = vpop.eup %7582 }
0x2e1f   :  { %v5462_v60 = vmul.f32 %v7583_v2, %v9201_v51 }
0x2e21   :  { %v5464_v42 = vmul.f32 %v5462_v60, %v8933_v48 }
0x2e22   :  { %v7585_v45 = vpop.eup %7584 }
0x2e23   :  { %7411 = vmatpush3.msk.msra.mxu0 %vm309_vm0, %v5464_v42  ;;  %v5460_v49 = vmul.f32 %v7585_v45, %v9199_v53  ;;  %vm9381_vm0 = vcmask 195584  }
0x2e24   :  { %7412 = vmatprep.subr.mxu0 %v7721_v12 }
0x2e25   :  { %v7587_v34 = vpop.eup %7586  ;;  %v5463_v55 = vmul.f32 %v5460_v49, %v8935_v17 }
0x2e26   :  { %v6165_v38 = vmul.f32 %v7587_v34, %v9218_v35  ;;  %v7589_v57 = vpop.eup %7588 }
0x2e27   :  { %7413 = vmatpush3.msra.mxu0 %v5463_v55  ;;  %v6161_v53 = vmul.f32 %v7589_v57, %v9210_v62 }
0x2e28   :  { %7415 = vmatmul.mubr.msk.f32.vlgmr.msra.gmra.mxu0 %vm9380_vm1, %v8675_v33  ;;  %v6168_v51 = vmul.f32 %v6165_v38, %v9051_v4 }
0x2e29   :  { %v7591_v48 = vpop.eup %7590  ;;  %v6166_v17 = vmul.f32 %v6161_v53, %v9045_v24 }
0x2e2a   :  { %7418 = vmatpush3.msra.mxu1 %v6168_v51  ;;  %v6163_v50 = vmul.f32 %v7591_v48, %v9205_v5 }
0x2e2b   :  { %7419 = vmatprep.subr.mxu1 %v7721_v12 }
0x2e2c   :  { %v6167_v28 = vmul.f32 %v6163_v50, %v9047_v43 }
0x2e2e   :  { %7420 = vmatpush3.msra.mxu1 %v6167_v28 }
0x2e2f   :  { %7421 = vmatprep.subr.mxu1 %v7721_v12 }
0x2e30   :  { %7422 = vmatpush3.msra.mxu1 %v6166_v17 }
0x2e31   :  { %7424 = vmatmul.mubr.msk.f32.vlgmr.msra.gmra.mxu1 %vm9381_vm0, %v8688_v46 }
0x2e4d   :  { %v6238_v33 = vpop.f32.mrf.mxu0 }
0x2e4f   :  { %v7409_v4 = vpop.f32.mrf.mxu0 }
0x2e50   :  { %7629 = shalt.err (!%p7626_p4)
}
0x2e51   :  { %s7725_s6 = smov 128   ;;  %s9382_s4 = sld [smem:[#allocation57_spill]]  ;;  %v6385_v46 = vmul.f32 3.0, %v8716_v54 }
0x2e52   :  { %s7726_s15 = smov 8   ;;  %s7727_s18 = smov [#allocation12]  }
0x2e53   :  { %v6386_v43 = vadd.f32 %v6385_v46, %v6238_v33  ;;  %s6417_s23 = sshll.u32 %s7727_s18, 4  ;;  %s6418_s23 = int_to_ptr.vmem [resolvable:$true] %s6417_s23 }
0x2e54   :  { %s7638_s28 = scalar_lea.vmem %s6418_s23, 128  ;;  %p7643_p6 = scmp.lt.s32.totalorder %s6418_s23, %s6418_s23 }
0x2e55   :  { %p7639_p5 = scmp.ne.s32.totalorder %s6418_s23, %s7638_s28  ;;  %p7644_p7 = scmp.lt.s32.totalorder %s7638_s28, %s7638_s28 }
0x2e57   :  { %6432 = dma.vmem_to_hbm [thread:$0]  %s6427_s17, 256, %s9382_s4, [#allocation15], %s7725_s6, %s7725_s6, %s7726_s15  }
0x2e58   :  { %p7645_p8 = por %p7644_p7, %p7643_p6 }
0x2e5a   :  { %p7646_p9 = pnand %p7645_p8, %p7639_p5 }
0x2ee8   :  { %v6311_v12 = vpop.f32.mrf.mxu0 }
0x2ee9   :  { %v6387_v5 = vadd.f32 %v6386_v43, %v6311_v12 }
0x2eea   :  { %v7416_v24 = vpop.f32.mrf.mxu0 }
0x2ef1   :  { %v6381_v62 = vpop.f32.mrf.mxu1 }
0x2ef2   :  { %v6388_v35 = vadd.f32 %v6387_v5, %v6381_v62 }
0x2ef3   :  { %v7425_v9 = vpop.f32.mrf.mxu1 }
0x2ef4   :  { %v6389_v22 = vmul.f32 0.33333334, %v6388_v35 }
0x2ef6   :  { %v6391_v63 = vmin.f32 %v6389_v22, 0.0  ;;  %vm6390_vm5 = vcmp.gt.f32.partialorder %v6389_v22, 0.0 }
0x2ef8   :  { %v6392_v1 = vmul.f32 1.442695, %v6391_v63 }
0x2efa   :  { %7592 = vpow2.f32 %v6392_v1 }
0x2f07   :  { %v7593_v37 = vpop.eup %7592 }
0x2f08   :  { %v6659_v44 = vadd.f32 -1.0, %v7593_v37 }
0x2f0a   :  { %v6395_v19 = vsel %vm6390_vm5, %v6389_v22, %v6659_v44 }
0x2f0b   :  { %6408 = vst.msk [vmem:[#allocation12] sm:$0xff] %vm3928_vm10, %v6395_v19 }
0x2f0c   :  { %7649 = shalt.err (!%p7646_p9)
}
0x2f0d   :  { %s9383_s26 = sld [smem:[#allocation56_spill]] }
0x2f13   :  { %6420 = dma.vmem_to_hbm [thread:$0]  %s6418_s23, 128, %s9383_s26, [#allocation13]  }
0x2f14   :  { %7658 = dma.done.wait [#allocation13], 128  }
0x2f15   :  { %7659 = vsyncadd [#allocation13], 4294967168 }
0x2f16   :  { %7660 = dma.done.wait [#allocation15], 256  }
0x2f17   :  { %7661 = vsyncadd [#allocation15], 4294967040 }
0x2f18   :  { %6439 = vsyncpa [#allocation13], 1 }
0x2f19   :  { %6440 = vsyncpa [#allocation15], 1 }

</bundles_post_ra>
